<compile_context>
chip_gen: v7x
topology: tpu7x:2x2x1
jax: 0.10.0
libtpu: 0.0.40
codegen_flags: <defaults>
</compile_context>

<pallas_src>
import jax
import jax.numpy as jnp
from jax import lax
from jax.experimental import pallas as pl
from jax.experimental.pallas import tpu as pltpu

LANE = 128


# ----------------------------- small helpers --------------------------------

def _round_up(v, m):
    return (v + m - 1) // m * m


def _pick_row_tile(ho, target):
    """Largest divisor of `ho` that is <= target (never returns the full image
    unless ho <= target).  Worst case (prime ho) degrades to small tiles.
    # TODO(synk): support ragged last tiles (cdiv grid + in-kernel row masking)
    # so awkward Ho values keep large tiles."""
    target = max(1, min(int(target), int(ho)))
    for th in range(target, 0, -1):
        if ho % th == 0:
            return th
    return 1


def _fake_quant_sym(x, bit):
    """Symmetric per-tensor fake quantization to `bit` bits ("scale" method)."""
    qmax = 2.0 ** (bit - 1) - 1.0
    scale = jnp.max(jnp.abs(x)) / qmax
    scale = jnp.where(scale > 0, scale, 1.0)
    return jnp.round(x / scale) * scale


# ----------------------------- fused Pallas kernel ---------------------------

def _make_kernel(Ho, Wo, TH, s, Cout, Cout_p, K1, alpha, act_bit, quantization,
                 im2col_in):
    alpha = float(alpha)
    q = (2.0 ** act_bit - 1.0) / alpha
    inv_q = alpha / (2.0 ** act_bit - 1.0)   # static constant -> mul, not div

    def kernel(x_ref, w1_ref, b1_ref, w2_ref, b2_ref, o_ref, h_ref):
        t = pl.program_id(1)
        base = t * TH                         # first output row of this tile

        # ---------------- conv1: ONE im2col MXU matmul ----------------------
        if im2col_in:
            # x_ref holds the wrapper-built packed im2col tensor
            # (1, Ho+2, Wo, 9*Cin); row r+1 <-> conv1 output row r, rows 0 and
            # Ho+1 are zero padding, stride already applied.  K = 9*Cin.
            lhs1 = x_ref[0, pl.ds(base, TH + 2), :, :].reshape(
                (TH + 2) * Wo, K1)
        else:
            # x_ref holds the zero-padded bf16 image (1, H+2s+2, W+2, Cin_p);
            # gather the 9 lane-aligned taps and pack them on the K axis.
            cols = []
            for ky in range(3):
                rstart = s * base + ky
                for kx in range(3):
                    if s == 1:
                        win = x_ref[0, pl.ds(rstart, TH + 2), kx:kx + Wo, :]
                    else:
                        win = x_ref[0, pl.ds(rstart, TH + 2, stride=s),
                                    pl.ds(kx, Wo, stride=s), :]
                    cols.append(win)
            lhs1 = jnp.concatenate(cols, axis=-1).reshape((TH + 2) * Wo, K1)

        acc1 = jnp.dot(lhs1, w1_ref[...], preferred_element_type=jnp.float32)
        h = acc1.reshape(TH + 2, Wo, Cout_p) + b1_ref[...].reshape(1, 1, Cout_p)

        # quantized clipped ReLU epilogue (f32)
        h = jnp.clip(h, 0.0, alpha)
        if quantization:
            h = jnp.round(h * q) * inv_q

        # conv1 halo rows outside [0, Ho) are conv2's zero padding (otherwise
        # the bias would leak through the padded rows).
        hrow = base - 1 + lax.broadcasted_iota(jnp.int32, (TH + 2, 1, 1), 0)
        h = jnp.where(jnp.logical_and(hrow >= 0, hrow < Ho), h, 0.0)

        # ---- stage h in VMEM for conv2: zero ONLY the two padded columns ----
        zcol = jnp.zeros((TH + 2, 1, Cout_p), jnp.bfloat16)
        h_ref[:, 0:1, :] = zcol
        h_ref[:, Wo + 1:Wo + 2, :] = zcol
        h_ref[:, 1:1 + Wo, :] = h.astype(jnp.bfloat16)

        # ---------------- conv2 (stride 1): ONE im2col MXU matmul ------------
        cols2 = [h_ref[ky:ky + TH, kx:kx + Wo, :]
                 for ky in range(3) for kx in range(3)]
        lhs2 = jnp.concatenate(cols2, axis=-1).reshape(TH * Wo, 9 * Cout_p)
        acc2 = jnp.dot(lhs2, w2_ref[...], preferred_element_type=jnp.float32)
        out = (acc2.reshape(1, TH, Wo, Cout_p)[..., :Cout]
               + b2_ref[...].reshape(1, 1, 1, Cout))
        o_ref[...] = out.astype(o_ref.dtype)   # exactly Cout channels to HBM

    return kernel


def quant_residual33_forward(x_nhwc, w1, b1, w2, b2, *, stride, alpha, act_bit,
                             quantization, row_tile=32):
    """x_nhwc: (N,H,W,Cin) f32; w: (3,3,Ci,Co) HWIO; b: (Co,).
    Returns (N,Ho,Wo,Cout) f32."""
    N, H, W, Cin = x_nhwc.shape
    Cout = w1.shape[-1]
    s = int(stride)
    Ho = (H + 2 - 3) // s + 1
    Wo = (W + 2 - 3) // s + 1
    Cout_p = _round_up(Cout, LANE)
    TH = _pick_row_tile(Ho, row_tile)
    T = Ho // TH

    # Thin first layers: pack conv1's K as 9*Cin (no per-tap 128-lane padding).
    im2col_in = (9 * Cin <= LANE)

    if im2col_in:
        K1 = 9 * Cin
        xb = x_nhwc.astype(jnp.bfloat16)
        xp = jnp.pad(xb, ((0, 0), (1, 1), (1, 1), (0, 0)))
        taps = [xp[:, ky:ky + s * (Ho - 1) + 1:s, kx:kx + s * (Wo - 1) + 1:s, :]
                for ky in range(3) for kx in range(3)]
        # (N, Ho, Wo, 9*Cin) with one zero halo row top/bottom for conv2's halo
        x_in = jnp.pad(jnp.concatenate(taps, axis=-1),
                       ((0, 0), (1, 1), (0, 0), (0, 0)))
        x_spec = pl.BlockSpec((1, Ho + 2, Wo, K1), lambda n, t: (n, 0, 0, 0))
        w1r = (jnp.zeros((K1, Cout_p), jnp.float32)
               .at[:, :Cout].set(w1.reshape(9 * Cin, Cout))
               .astype(jnp.bfloat16))
    else:
        Cin_p = _round_up(Cin, LANE)
        K1 = 9 * Cin_p
        Hp, Wp = H + 2 * s + 2, W + 2
        x_in = (jnp.zeros((N, Hp, Wp, Cin_p), jnp.bfloat16)
                .at[:, s + 1:s + 1 + H, 1:1 + W, :Cin]
                .set(x_nhwc.astype(jnp.bfloat16)))
        x_spec = pl.BlockSpec((1, Hp, Wp, Cin_p), lambda n, t: (n, 0, 0, 0))
        w1p = (jnp.zeros((3, 3, Cin_p, Cout_p), jnp.float32)
               .at[:, :, :Cin, :Cout].set(w1))
        w1r = w1p.reshape(K1, Cout_p).astype(jnp.bfloat16)

    w2p = (jnp.zeros((3, 3, Cout_p, Cout_p), jnp.float32)
           .at[:, :, :Cout, :Cout].set(w2))
    w2r = w2p.reshape(9 * Cout_p, Cout_p).astype(jnp.bfloat16)
    b1r = jnp.zeros((1, Cout_p), jnp.float32).at[0, :Cout].set(b1)
    b2r = b2.reshape(1, Cout).astype(jnp.float32)

    kernel = _make_kernel(Ho, Wo, TH, s, Cout, Cout_p, K1, alpha, act_bit,
                          quantization, im2col_in)

    y = pl.pallas_call(
        kernel,
        out_shape=jax.ShapeDtypeStruct((N, Ho, Wo, Cout), jnp.float32),
        grid=(N, T),
        in_specs=[
            x_spec,
            # constant index maps -> fetched once (use pl.Buffered(1) for huge Cout)
            pl.BlockSpec((K1, Cout_p), lambda n, t: (0, 0)),
            pl.BlockSpec((1, Cout_p), lambda n, t: (0, 0)),
            pl.BlockSpec((9 * Cout_p, Cout_p), lambda n, t: (0, 0)),
            pl.BlockSpec((1, Cout), lambda n, t: (0, 0)),
        ],
        out_specs=pl.BlockSpec((1, TH, Wo, Cout), lambda n, t: (n, t, 0, 0)),
        scratch_shapes=[
            pltpu.VMEM((TH + 2, Wo + 2, Cout_p), jnp.bfloat16),  # h tile (padded)
        ],
        compiler_params=pltpu.CompilerParams(
            dimension_semantics=("parallel", "parallel")),
    )(x_in, w1r, b1r, w2r, b2r)
    return y


# ----------------------------- module wrapper --------------------------------

class QuantResidual33Pallas:
    def __init__(self, in_channels, out_channels, stride, key, *,
                 bias=True, quantization=True, weight_bit=8, act_bit=8,
                 bias_bit=16, alpha_coeff=10.0, row_tile=32):
        self.stride = stride
        self.quantization = quantization
        self.weight_bit = weight_bit
        self.act_bit = act_bit
        self.bias_bit = bias_bit
        self.alpha = alpha_coeff
        self.row_tile = row_tile

        k1, k2, k3, k4 = jax.random.split(key, 4)
        bound1 = 1.0 / (in_channels * 9) ** 0.5
        bound2 = 1.0 / (out_channels * 9) ** 0.5
        # weights stored HWIO (3, 3, Cin, Cout)
        self.w1 = jax.random.uniform(k1, (3, 3, in_channels, out_channels),
                                     minval=-bound1, maxval=bound1,
                                     dtype=jnp.float32)
        self.b1 = (jax.random.uniform(k2, (out_channels,), minval=-bound1,
                                      maxval=bound1, dtype=jnp.float32)
                   if bias else jnp.zeros((out_channels,), jnp.float32))
        self.w2 = jax.random.uniform(k3, (3, 3, out_channels, out_channels),
                                     minval=-bound2, maxval=bound2,
                                     dtype=jnp.float32)
        self.b2 = (jax.random.uniform(k4, (out_channels,), minval=-bound2,
                                      maxval=bound2, dtype=jnp.float32)
                   if bias else jnp.zeros((out_channels,), jnp.float32))

    def quant_params(self):
        if self.quantization:
            return (_fake_quant_sym(self.w1, self.weight_bit),
                    _fake_quant_sym(self.b1, self.bias_bit),
                    _fake_quant_sym(self.w2, self.weight_bit),
                    _fake_quant_sym(self.b2, self.bias_bit))
        return self.w1, self.b1, self.w2, self.b2

    def __call__(self, x_nchw):
        w1, b1, w2, b2 = self.quant_params()
        x = jnp.transpose(x_nchw, (0, 2, 3, 1))          # NCHW -> NHWC
        y = quant_residual33_forward(x, w1, b1, w2, b2, stride=self.stride,
                                     alpha=self.alpha, act_bit=self.act_bit,
                                     quantization=self.quantization,
                                     row_tile=self.row_tile)
        return jnp.transpose(y, (0, 3, 1, 2))            # NHWC -> NCHW


# ----------------------------- pure-XLA reference ----------------------------

def _reference_forward_nhwc(x, w1, b1, w2, b2, *, stride, alpha, act_bit,
                            quantization):
    """Reference mirroring the kernel's precision (bf16 operands, f32 accum)."""
    dn = ('NHWC', 'HWIO', 'NHWC')
    h = lax.conv_general_dilated(
        x.astype(jnp.bfloat16), w1.astype(jnp.bfloat16),
        window_strides=(stride, stride), padding=((1, 1), (1, 1)),
        dimension_numbers=dn, preferred_element_type=jnp.float32) + b1
    h = jnp.clip(h, 0.0, float(alpha))
    if quantization:
        q = (2.0 ** act_bit - 1.0) / float(alpha)
        h = jnp.round(h * q) * (float(alpha) / (2.0 ** act_bit - 1.0))
    y = lax.conv_general_dilated(
        h.astype(jnp.bfloat16), w2.astype(jnp.bfloat16),
        window_strides=(1, 1), padding=((1, 1), (1, 1)),
        dimension_numbers=dn, preferred_element_type=jnp.float32) + b2
    return y


# ----------------------------- demo ------------------------------------------

if __name__ == "__main__":
    key = jax.random.PRNGKey(0)
    k_x, k_p = jax.random.split(key)

    in_channels, out_channels, stride = 4, 8, 1
    N, H, W = 2, 16, 16

    x = jax.random.normal(k_x, (N, in_channels, H, W), dtype=jnp.float32)  # NCHW
    model = QuantResidual33Pallas(in_channels, out_channels, stride, k_p)

    y = model(x)
    y = jax.block_until_ready(y)

    Ho = (H + 2 - 3) // stride + 1
    Wo = (W + 2 - 3) // stride + 1
    assert y.shape == (N, out_channels, Ho, Wo), y.shape
    assert bool(jnp.all(jnp.isfinite(y)))

    # validate against a pure-XLA reference with matching precision choices
    w1, b1, w2, b2 = model.quant_params()
    y_ref = _reference_forward_nhwc(jnp.transpose(x, (0, 2, 3, 1)),
                                    w1, b1, w2, b2, stride=stride,
                                    alpha=model.alpha, act_bit=model.act_bit,
                                    quantization=model.quantization)
    y_ref = jnp.transpose(y_ref, (0, 3, 1, 2))
    assert bool(jnp.allclose(y, y_ref, rtol=5e-2, atol=5e-2)), \
        float(jnp.max(jnp.abs(y - y_ref)))

    print("KERNEL_OK")
</pallas_src>

<mosaic_0001>
module attributes {stable_mosaic.version = 11 : i64} {
  func.func @kernel(%arg0: i32, %arg1: i32, %arg2: memref<1x18x16x36xbf16, #tpu.memory_space<vmem>>, %arg3: memref<36x128xbf16, #tpu.memory_space<vmem>>, %arg4: memref<1x128xf32, #tpu.memory_space<vmem>>, %arg5: memref<1152x128xbf16, #tpu.memory_space<vmem>>, %arg6: memref<1x8xf32, #tpu.memory_space<vmem>>, %arg7: memref<1x16x16x8xf32, #tpu.memory_space<vmem>>, %arg8: memref<18x18x128xbf16, #tpu.memory_space<vmem>>) attributes {dimension_semantics = [#tpu.dimension_semantics<parallel>, #tpu.dimension_semantics<parallel>], iteration_bounds = array<i64: 2, 1>, scalar_prefetch = 0 : i64, scratch_operands = 1 : i64, tpu.core_type = #tpu.core_type<tc>, window_params = [{transform_indices = @transform_0, window_bounds = array<i64: 1, 18, 16, 36>}, {pipeline_mode = #tpu.pipeline_mode<synchronous>, transform_indices = @transform_1, window_bounds = array<i64: 36, 128>}, {pipeline_mode = #tpu.pipeline_mode<synchronous>, transform_indices = @transform_2, window_bounds = array<i64: 1, 128>}, {pipeline_mode = #tpu.pipeline_mode<synchronous>, transform_indices = @transform_3, window_bounds = array<i64: 1152, 128>}, {pipeline_mode = #tpu.pipeline_mode<synchronous>, transform_indices = @transform_4, window_bounds = array<i64: 1, 8>}, {transform_indices = @transform_5, window_bounds = array<i64: 1, 16, 16, 8>}]} {
    %c16_i32 = arith.constant 16 : i32
    %0 = arith.muli %arg1, %c16_i32 : i32
    %c0 = arith.constant 0 : index
    %1 = arith.index_cast %0 : i32 to index
    %c0_0 = arith.constant 0 : index
    %c0_1 = arith.constant 0 : index
    %2 = vector.load %arg2[%c0, %1, %c0_0, %c0_1] : memref<1x18x16x36xbf16, #tpu.memory_space<vmem>>, vector<1x18x16x36xbf16>
    %3 = vector.shape_cast %2 : vector<1x18x16x36xbf16> to vector<18x16x36xbf16>
    %4 = vector.shape_cast %3 : vector<18x16x36xbf16> to vector<288x36xbf16>
    %c0_2 = arith.constant 0 : index
    %c0_3 = arith.constant 0 : index
    %5 = vector.load %arg3[%c0_2, %c0_3] : memref<36x128xbf16, #tpu.memory_space<vmem>>, vector<36x128xbf16>
    %cst = arith.constant dense<0.000000e+00> : vector<288x128xf32>
    %6 = tpu.matmul %4, %5, %cst {dimension_numbers = #tpu.dot_dimension_numbers<[1], [0], [0], [1], [0, 0, 1, 1], [], []>} : vector<288x36xbf16>, vector<36x128xbf16>, vector<288x128xf32> -> vector<288x128xf32>
    %7 = vector.shape_cast %6 : vector<288x128xf32> to vector<18x16x128xf32>
    %c0_4 = arith.constant 0 : index
    %c0_5 = arith.constant 0 : index
    %8 = vector.load %arg4[%c0_4, %c0_5] : memref<1x128xf32, #tpu.memory_space<vmem>>, vector<1x128xf32>
    %9 = vector.shape_cast %8 : vector<1x128xf32> to vector<1x1x128xf32>
    %10 = vector.broadcast %9 : vector<1x1x128xf32> to vector<18x16x128xf32>
    %11 = arith.addf %7, %10 : vector<18x16x128xf32>
    %cst_6 = arith.constant 0.000000e+00 : f32
    %cst_7 = arith.constant 1.000000e+01 : f32
    %12 = vector.broadcast %cst_6 : f32 to vector<18x16x128xf32>
    %13 = arith.maximumf %12, %11 : vector<18x16x128xf32>
    %14 = vector.broadcast %cst_7 : f32 to vector<18x16x128xf32>
    %15 = arith.minimumf %14, %13 : vector<18x16x128xf32>
    %cst_8 = arith.constant 2.550000e+01 : f32
    %16 = vector.broadcast %cst_8 : f32 to vector<18x16x128xf32>
    %17 = arith.mulf %15, %16 : vector<18x16x128xf32>
    %18 = math.roundeven %17 : vector<18x16x128xf32>
    %cst_9 = arith.constant 0.0392156877 : f32
    %19 = vector.broadcast %cst_9 : f32 to vector<18x16x128xf32>
    %20 = arith.mulf %18, %19 : vector<18x16x128xf32>
    %c1_i32 = arith.constant 1 : i32
    %21 = arith.subi %0, %c1_i32 : i32
    %22 = tpu.iota {dimensions = array<i32: 0>} : vector<18x1x1xi32>
    %23 = vector.broadcast %21 : i32 to vector<18x1x1xi32>
    %24 = arith.addi %23, %22 : vector<18x1x1xi32>
    %c0_i32 = arith.constant 0 : i32
    %25 = vector.broadcast %c0_i32 : i32 to vector<18x1x1xi32>
    %26 = arith.cmpi sge, %24, %25 : vector<18x1x1xi32>
    %c16_i32_10 = arith.constant 16 : i32
    %27 = vector.broadcast %c16_i32_10 : i32 to vector<18x1x1xi32>
    %28 = arith.cmpi slt, %24, %27 : vector<18x1x1xi32>
    %29 = arith.andi %26, %28 : vector<18x1x1xi1>
    %cst_11 = arith.constant 0.000000e+00 : f32
    %30 = vector.shape_cast %29 : vector<18x1x1xi1> to vector<18x1x1xi1>
    %31 = vector.broadcast %30 : vector<18x1x1xi1> to vector<18x16x128xi1>
    %32 = vector.broadcast %cst_11 : f32 to vector<18x16x128xf32>
    %33 = arith.select %31, %20, %32 : vector<18x16x128xi1>, vector<18x16x128xf32>
    %cst_12 = arith.constant 0.000000e+00 : bf16
    %34 = vector.broadcast %cst_12 : bf16 to vector<18x1x128xbf16>
    %c0_13 = arith.constant 0 : index
    %c0_14 = arith.constant 0 : index
    %c0_15 = arith.constant 0 : index
    %35 = vector.load %arg8[%c0_13, %c0_14, %c0_15] : memref<18x18x128xbf16, #tpu.memory_space<vmem>>, vector<18x1x128xbf16>
    tpu.vector_store %arg8[%c0_13, %c0_14, %c0_15], %34 {strides = array<i32>} : memref<18x18x128xbf16, #tpu.memory_space<vmem>>, vector<18x1x128xbf16>,
    %c0_16 = arith.constant 0 : index
    %c17 = arith.constant 17 : index
    %c0_17 = arith.constant 0 : index
    %36 = vector.load %arg8[%c0_16, %c17, %c0_17] : memref<18x18x128xbf16, #tpu.memory_space<vmem>>, vector<18x1x128xbf16>
    tpu.vector_store %arg8[%c0_16, %c17, %c0_17], %34 {strides = array<i32>} : memref<18x18x128xbf16, #tpu.memory_space<vmem>>, vector<18x1x128xbf16>,
    %37 = arith.truncf %33 : vector<18x16x128xf32> to vector<18x16x128xbf16>
    %c0_18 = arith.constant 0 : index
    %c1 = arith.constant 1 : index
    %c0_19 = arith.constant 0 : index
    %38 = vector.load %arg8[%c0_18, %c1, %c0_19] : memref<18x18x128xbf16, #tpu.memory_space<vmem>>, vector<18x16x128xbf16>
    tpu.vector_store %arg8[%c0_18, %c1, %c0_19], %37 {strides = array<i32>} : memref<18x18x128xbf16, #tpu.memory_space<vmem>>, vector<18x16x128xbf16>,
    %c0_20 = arith.constant 0 : index
    %c0_21 = arith.constant 0 : index
    %c0_22 = arith.constant 0 : index
    %39 = vector.load %arg8[%c0_20, %c0_21, %c0_22] : memref<18x18x128xbf16, #tpu.memory_space<vmem>>, vector<16x16x128xbf16>
    %c0_23 = arith.constant 0 : index
    %c1_24 = arith.constant 1 : index
    %c0_25 = arith.constant 0 : index
    %40 = vector.load %arg8[%c0_23, %c1_24, %c0_25] : memref<18x18x128xbf16, #tpu.memory_space<vmem>>, vector<16x16x128xbf16>
    %c0_26 = arith.constant 0 : index
    %c2 = arith.constant 2 : index
    %c0_27 = arith.constant 0 : index
    %41 = vector.load %arg8[%c0_26, %c2, %c0_27] : memref<18x18x128xbf16, #tpu.memory_space<vmem>>, vector<16x16x128xbf16>
    %c1_28 = arith.constant 1 : index
    %c0_29 = arith.constant 0 : index
    %c0_30 = arith.constant 0 : index
    %42 = vector.load %arg8[%c1_28, %c0_29, %c0_30] : memref<18x18x128xbf16, #tpu.memory_space<vmem>>, vector<16x16x128xbf16>
    %c1_31 = arith.constant 1 : index
    %c1_32 = arith.constant 1 : index
    %c0_33 = arith.constant 0 : index
    %43 = vector.load %arg8[%c1_31, %c1_32, %c0_33] : memref<18x18x128xbf16, #tpu.memory_space<vmem>>, vector<16x16x128xbf16>
    %c1_34 = arith.constant 1 : index
    %c2_35 = arith.constant 2 : index
    %c0_36 = arith.constant 0 : index
    %44 = vector.load %arg8[%c1_34, %c2_35, %c0_36] : memref<18x18x128xbf16, #tpu.memory_space<vmem>>, vector<16x16x128xbf16>
    %c2_37 = arith.constant 2 : index
    %c0_38 = arith.constant 0 : index
    %c0_39 = arith.constant 0 : index
    %45 = vector.load %arg8[%c2_37, %c0_38, %c0_39] : memref<18x18x128xbf16, #tpu.memory_space<vmem>>, vector<16x16x128xbf16>
    %c2_40 = arith.constant 2 : index
    %c1_41 = arith.constant 1 : index
    %c0_42 = arith.constant 0 : index
    %46 = vector.load %arg8[%c2_40, %c1_41, %c0_42] : memref<18x18x128xbf16, #tpu.memory_space<vmem>>, vector<16x16x128xbf16>
    %c2_43 = arith.constant 2 : index
    %c2_44 = arith.constant 2 : index
    %c0_45 = arith.constant 0 : index
    %47 = vector.load %arg8[%c2_43, %c2_44, %c0_45] : memref<18x18x128xbf16, #tpu.memory_space<vmem>>, vector<16x16x128xbf16>
    %48 = tpu.concatenate %39, %40, %41, %42, %43, %44, %45, %46, %47 in 2 : vector<16x16x128xbf16>, vector<16x16x128xbf16>, vector<16x16x128xbf16>, vector<16x16x128xbf16>, vector<16x16x128xbf16>, vector<16x16x128xbf16>, vector<16x16x128xbf16>, vector<16x16x128xbf16>, vector<16x16x128xbf16> -> vector<16x16x1152xbf16>
    %49 = vector.shape_cast %48 : vector<16x16x1152xbf16> to vector<256x1152xbf16>
    %c0_46 = arith.constant 0 : index
    %c0_47 = arith.constant 0 : index
    %50 = vector.load %arg5[%c0_46, %c0_47] : memref<1152x128xbf16, #tpu.memory_space<vmem>>, vector<1152x128xbf16>
    %cst_48 = arith.constant dense<0.000000e+00> : vector<256x128xf32>
    %51 = tpu.matmul %49, %50, %cst_48 {dimension_numbers = #tpu.dot_dimension_numbers<[1], [0], [0], [1], [0, 0, 1, 1], [], []>} : vector<256x1152xbf16>, vector<1152x128xbf16>, vector<256x128xf32> -> vector<256x128xf32>
    %52 = vector.shape_cast %51 : vector<256x128xf32> to vector<1x16x16x128xf32>
    %53 = vector.extract_strided_slice %52 {offsets = [0, 0, 0, 0], sizes = [1, 16, 16, 8], strides = [1, 1, 1, 1]} : vector<1x16x16x128xf32> to vector<1x16x16x8xf32>
    %c0_49 = arith.constant 0 : index
    %c0_50 = arith.constant 0 : index
    %54 = vector.load %arg6[%c0_49, %c0_50] : memref<1x8xf32, #tpu.memory_space<vmem>>, vector<1x8xf32>
    %55 = vector.shape_cast %54 : vector<1x8xf32> to vector<1x1x1x8xf32>
    %56 = vector.broadcast %55 : vector<1x1x1x8xf32> to vector<1x16x16x8xf32>
    %57 = arith.addf %53, %56 : vector<1x16x16x8xf32>
    %c0_51 = arith.constant 0 : index
    %c0_52 = arith.constant 0 : index
    %c0_53 = arith.constant 0 : index
    %c0_54 = arith.constant 0 : index
    %58 = vector.load %arg7[%c0_51, %c0_52, %c0_53, %c0_54] : memref<1x16x16x8xf32, #tpu.memory_space<vmem>>, vector<1x16x16x8xf32>
    tpu.vector_store %arg7[%c0_51, %c0_52, %c0_53, %c0_54], %57 {strides = array<i32>} : memref<1x16x16x8xf32, #tpu.memory_space<vmem>>, vector<1x16x16x8xf32>,
    return
  }
  func.func @transform_0(%arg0: i32, %arg1: i32) -> (i32, i32, i32, i32) {
    %c0_i32 = arith.constant 0 : i32
    %c0_i32_0 = arith.constant 0 : i32
    %c0_i32_1 = arith.constant 0 : i32
    %c0_i32_2 = arith.constant 0 : i32
    return %arg0, %c0_i32, %c0_i32_0, %c0_i32_1 : i32, i32, i32, i32
  }
  func.func @transform_1(%arg0: i32, %arg1: i32) -> (i32, i32) {
    %c0_i32 = arith.constant 0 : i32
    %c0_i32_0 = arith.constant 0 : i32
    %c0_i32_1 = arith.constant 0 : i32
    return %c0_i32, %c0_i32_0 : i32, i32
  }
  func.func @transform_2(%arg0: i32, %arg1: i32) -> (i32, i32) {
    %c0_i32 = arith.constant 0 : i32
    %c0_i32_0 = arith.constant 0 : i32
    %c0_i32_1 = arith.constant 0 : i32
    return %c0_i32, %c0_i32_0 : i32, i32
  }
  func.func @transform_3(%arg0: i32, %arg1: i32) -> (i32, i32) {
    %c0_i32 = arith.constant 0 : i32
    %c0_i32_0 = arith.constant 0 : i32
    %c0_i32_1 = arith.constant 0 : i32
    return %c0_i32, %c0_i32_0 : i32, i32
  }
  func.func @transform_4(%arg0: i32, %arg1: i32) -> (i32, i32) {
    %c0_i32 = arith.constant 0 : i32
    %c0_i32_0 = arith.constant 0 : i32
    %c0_i32_1 = arith.constant 0 : i32
    return %c0_i32, %c0_i32_0 : i32, i32
  }
  func.func @transform_5(%arg0: i32, %arg1: i32) -> (i32, i32, i32, i32) {
    %c0_i32 = arith.constant 0 : i32
    %c0_i32_0 = arith.constant 0 : i32
    %c0_i32_1 = arith.constant 0 : i32
    return %arg0, %arg1, %c0_i32, %c0_i32_0 : i32, i32, i32, i32
  }
}

</mosaic_0001>

<bundles_post_ra>
// kernel: tpu_custom_call.1
= control target key start
LH: loop header
LB: loop body
LE: loop exit
PB: predicated region body
PF: predicated region fallthrough
CT: control target
= control target key end

     0   :  { %10 = vsyncpa [#allocation4], 0  ;;  %s7891_s0 = inlined_call_operand.hbm [shape: bf16[2,18,16,36], index: 0, kind: input, shape index: {}]   ;;  %s7892_s1 = inlined_call_operand.hbm [shape: bf16[36,128], index: 1, kind: input, shape index: {}]   ;;  %s7893_s2 = inlined_call_operand.vmem [shape: f32[1,128], index: 2, kind: input, shape index: {}]   ;;  %s7894_s3 = inlined_call_operand.hbm [shape: bf16[1152,128], index: 3, kind: input, shape index: {}]   ;;  %s7895_s4 = inlined_call_operand.vmem [shape: f32[1,8], index: 4, kind: input, shape index: {}]   ;;  %s7896_s5 = inlined_call_operand.vmem [shape: f32[2,16,16,8], index: 5, kind: output, shape index: {}]  }
   0x1   :  { %12 = vsyncpa [#allocation4 + $0x1], 0 }
   0x2   :  { %13 = vsyncpa [#allocation6], 0  ;;  %s6399_s18 = smov 0   ;;  %s6401_s19 = smov 0  }
   0x3   :  { %s6403_s20 = smov 0   ;;  %s6405_s21 = smov 0  }
   0x4   :  { %s6407_s22 = smov 0   ;;  %s6409_s23 = smov 0  }
   0x5 LB: > { %s4925_s24 = sadd.s32 4294967295, %s6361_s23   ;;  %p51_p0 = scmp.ne.s32.totalorder %s6345_s19, %s6341_s18  ;;  %s6361_s23 = sphi %s6409_s23, %s19_s23   ;;  %s6357_s22 = sphi %s6407_s22, %s7935_s22   ;;  %s6353_s21 = sphi %s6405_s21, %s7934_s21   ;;  %s6349_s20 = sphi %s6403_s20, %s7933_s20   ;;  %s6345_s19 = sphi %s6401_s19, %s7932_s19   ;;  %s6341_s18 = sphi %s6399_s18, %s7931_s18  }
   0x6   : > { %p6429_p1 = scmp.eq.s32.totalorder %s4925_s24, 0  ;;  %p4927_p2 = scmp.ge.s32.totalorder %s6361_s23, 1 }
   0x7   : > { %p174_p3 = scmp.lt.s32.totalorder %s6361_s23, 3  ;;  %s6363_s28 = smov [#allocation5]  }
   0x8   : > { %s7908_s25 = scalar_select %p6429_p1, 1, 0 }
   0x9   : > { %p6437_p4 = por %p6429_p1, %p51_p0  ;;  %p6441_p5 = pnand %p4927_p2, %p174_p3 }
   0xa   : > { %s186_s29 = sshll.u32 %s6363_s28, 4  ;;  %s6364_s6 = smov [#allocation7]   ;;  %s187_s29 = int_to_ptr.vmem [resolvable:$true] %s186_s29 }
   0xb   : > { %s7909_s26 = scalar_select %p6437_p4, 1, 0 }
   0xc   : > { %s7910_s27 = scalar_select %p6441_p5, 1, 0 }
   0xd   : > { %p5894_p6 = pneg %p6441_p5  ;;  %s202_s7 = sshll.u32 %s6364_s6, 4  ;;  %s6453_s7 = int_to_ptr.vmem [resolvable:$true] %s202_s7 }
   0xe   : > { %s6221_s10 = scalar_lea.hbm %s7892_s1, 320 }
   0xf   : > { %p6449_p7 = pnand %p5894_p6, %p6429_p1  ;;  %p6222_p8 = scmp.ne.s32.totalorder %s7892_s1, %s6221_s10 }
  0x10   : > { %p6228_p12 = scmp.lt.u32.totalorder %s6221_s10, %s7892_s1 }
  0x11   : > { %p6223_p9 = pneg %p6449_p7 }
  0x13   : > { %p6224_p10 = pnand %p6223_p9, %p6222_p8 }
  0x15   : > { %p6225_p11 = pneg %p6224_p10 }
  0x17   : > { %p6230_p13 = pnand %p6228_p12, %p6225_p11 }
  0x19   : > { %6233 = shalt.err (!%p6230_p13)
}
  0x1a   : > { %s6234_s15 = scalar_lea.vmem %s187_s29, 320  ;;  %p6242_p6 = scmp.lt.s32.totalorder %s187_s29, %s187_s29 }
  0x1b   : > { %p6235_p0 = scmp.ne.s32.totalorder %s187_s29, %s6234_s15  ;;  %p6243_p1 = scmp.lt.s32.totalorder %s6234_s15, %s6234_s15 }
  0x1d   : > { %p6237_p2 = pnand %p6235_p0, %p6223_p9  ;;  %p6244_p4 = por %p6243_p1, %p6242_p6 }
  0x1f   : > { %p6238_p3 = pneg %p6237_p2 }
  0x21   : > { %p6245_p5 = pnand %p6244_p4, %p6238_p3 }
  0x23   : > { %6248 = shalt.err (!%p6245_p5)
}
  0x24   : > { %s6365_s16 = smov 64   ;;  %s6366_s17 = smov 4  }
  0x25   : > { %5897 = dma.hbm_to_vmem [thread:$0]  (!%p6449_p7), %s7892_s1, 320, %s187_s29, [#allocation6], %s6365_s16, %s6365_s16, %s6366_s17  }
  0x26   : > { %s6249_s8 = scalar_lea.hbm %s7894_s3, 9216 }
  0x27   : > { %p6250_p1 = scmp.ne.s32.totalorder %s7894_s3, %s6249_s8  ;;  %p6256_p8 = scmp.lt.u32.totalorder %s6249_s8, %s7894_s3 }
  0x29   : > { %p6252_p4 = pnand %p6250_p1, %p6223_p9 }
  0x2b   : > { %p6253_p5 = pneg %p6252_p4 }
  0x2d   : > { %p6258_p10 = pnand %p6256_p8, %p6253_p5 }
  0x2f   : > { %6261 = shalt.err (!%p6258_p10)
}
  0x30   : > { %s6262_s29 = scalar_lea.vmem %s6453_s7, 9216  ;;  %p6270_p0 = scmp.lt.s32.totalorder %s6453_s7, %s6453_s7 }
  0x31   : > { %p6263_p11 = scmp.ne.s32.totalorder %s6453_s7, %s6262_s29  ;;  %p6271_p2 = scmp.lt.s32.totalorder %s6262_s29, %s6262_s29 }
  0x33   : > { %p6265_p12 = pnand %p6263_p11, %p6223_p9  ;;  %p6272_p3 = por %p6271_p2, %p6270_p0 }
  0x35   : > { %p6266_p13 = pneg %p6265_p12 }
  0x37   : > { %p6273_p6 = pnand %p6272_p3, %p6266_p13 }
  0x39   : > { %6276 = shalt.err (!%p6273_p6)
}
  0x3a   : > { %5900 = dma.hbm_to_vmem [thread:$0]  (!%p6449_p7), %s7894_s3, 9216, %s6453_s7, [#allocation6], %s6365_s16, %s6365_s16, %s6366_s17  }
  0x3b   : > { %s31_s15 = sadd.s32 1, %s6357_s22  ;;  %s38_s30 = sadd.s32 1, %s6349_s20 }
  0x3c   : > { %p33_p9 = scmp.ge.s32.totalorder %s31_s15, 2  ;;  %p45_p1 = scmp.ne.s32.totalorder %s6349_s20, %s6345_s19 }
  0x3d   : > { %p46_p4 = scmp.eq.s32.totalorder %s6361_s23, 0  ;;  %p5907_p5 = scmp.lt.s32.totalorder %s6361_s23, 2 }
  0x3e   : > { %s7937_s15 = smov (%p33_p9, %s31_s15), 0  ;;  %s219_s18 = sand.u32 1, %s6349_s20  }
  0x3f   : > { %p47_p8 = por %p46_p4, %p45_p1  ;;  %s35_s24 = ssub.s32 %s6357_s22, %s7937_s15 }
  0x40   : > { %p36_p10 = scmp.eq.s32.totalorder %s35_s24, 0  ;;  %s5849_s28 = smul.u32 144, %s219_s18 }
  0x41   : > { %s5850_s6 = smul.u32 2304, %s6357_s22  ;;  %p6520_p11 = pnand %p5907_p5, %p47_p8 }
  0x42   : > { %s6525_s7 = scalar_select %p36_p10, %s6349_s20, %s38_s30  }
  0x43   : > { %s6530_s11 = scalar_lea.hbm %s7891_s0, %s5850_s6  ;;  %s223_s12 = scalar_lea.vmem [#allocation3], %s5849_s28 }
  0x44   : > { %s230_s29 = sshll.u32 %s223_s12, 4  ;;  %s6534_s13 = scalar_lea.sflag [#allocation4], %s219_s18  ;;  %s6532_s29 = int_to_ptr.vmem [resolvable:$true] %s230_s29 }
  0x45   : > { %s6277_s14 = scalar_lea.hbm %s6530_s11, 2304  ;;  %p6279_p12 = pneg %p6520_p11 }
  0x46   : > { %p6278_p7 = scmp.ne.s32.totalorder %s6530_s11, %s6277_s14  ;;  %s6282_s6 = scalar_lea.hbm %s7891_s0, 4608 }
  0x47   : > { %p6283_p2 = scmp.lt.u32.totalorder %s6530_s11, %s7891_s0  ;;  %p6284_p3 = scmp.lt.u32.totalorder %s6282_s6, %s6277_s14 }
  0x48   : > { %p6280_p13 = pnand %p6279_p12, %p6278_p7  ;;  %p6286_p9 = scmp.lt.u32.totalorder %s6277_s14, %s6530_s11 }
  0x49   : > { %p6285_p6 = por %p6284_p3, %p6283_p2 }
  0x4a   : > { %p6281_p0 = pneg %p6280_p13 }
  0x4b   : > { %p6287_p1 = por %p6286_p9, %p6285_p6 }
  0x4d   : > { %p6288_p4 = pnand %p6287_p1, %p6281_p0 }
  0x4f   : > { %6291 = shalt.err (!%p6288_p4)
}
  0x50   : > { %s6292_s18 = scalar_lea.vmem %s6532_s29, 2304  ;;  %s6367_s28 = smov [#allocation3]  }
  0x51   : > { %p6293_p5 = scmp.ne.s32.totalorder %s6532_s29, %s6292_s18  ;;  %s6297_s12 = sshll.u32 %s6367_s28, 4  ;;  %s6298_s12 = int_to_ptr.vmem [resolvable:$false] %s6297_s12 }
  0x52   : > { %s6299_s30 = scalar_lea.vmem %s6298_s12, 4608  ;;  %p6300_p7 = scmp.lt.s32.totalorder %s6532_s29, %s6298_s12 }
  0x53   : > { %p6295_p8 = pnand %p6293_p5, %p6279_p12  ;;  %p6301_p13 = scmp.lt.s32.totalorder %s6299_s30, %s6292_s18 }
  0x55   : > { %p6296_p10 = pneg %p6295_p8  ;;  %p6302_p2 = por %p6301_p13, %p6300_p7 }
  0x57   : > { %p6303_p3 = pnand %p6302_p2, %p6296_p10 }
  0x59   : > { %6306 = shalt.err (!%p6303_p3)
}
  0x5a   : > { %5904 = dma.hbm_to_vmem [thread:$0]  (!%p6520_p11), %s6530_s11, 2304, %s6532_s29, %s6534_s13, %s6365_s16, %s6365_s16, %s6366_s17  }
  0x5b   : > { %p7913_p12 = scmp.ne.s32.totalorder %s7910_s27, 0 }
  0x5d   : > { %242 = sbr.rel (%p7913_p12) target bundleno = 931 (0x3a3), region = 40 }
  0x64   : > { %s244_s14 = sand.u32 1, %s6345_s19   ;;  %p7914_p0 = scmp.ne.s32.totalorder %s7909_s26, 0 }
  0x65   : > { %s5851_s24 = smul.u32 144, %s244_s14  ;;  %s245_s6 = scalar_lea.sflag [#allocation4], %s244_s14 }
  0x67   : > { %s6568_s9 = scalar_lea.vmem [#allocation3], %s5851_s24 }
  0x68   : > { %6332 = dma.done.wait (%p7914_p0), %s245_s6, 2304  }
  0x69   : > { %6334 = vsyncadd (%p7914_p0), %s245_s6, 4294964992  ;;  %p7915_p6 = scmp.ne.s32.totalorder %s7908_s25, 0 }
  0x6b   : > { %6336 = dma.done.wait (%p7915_p6), [#allocation6], 9536  }
  0x6c   : > { %6338 = vsyncadd (%p7915_p6), [#allocation6], 4294957760  ;;  %v5963_v0 = vld [vmem:[#allocation5] sm:$0xff]   ;;  %v5964_v1 = vld [vmem:[#allocation5 + $0x8] sm:$0xff]   ;;  %vm450_vm0 = vcmask 293888   ;;  %vm505_vm1 = vcmask 1041408  }
  0x6d   : > { %5758 = vmatprep.subr.bf16.mxu0 %v5963_v0  ;;  %v5965_v2 = vld [vmem:[#allocation5 + $0x10] ss:$0 sps:$4 sm:$0x33]   ;;  %v5967_v5 = vld [vmem:[%s6568_s9 + $0x8] sm:$0xff]   ;;  %v5969_v7 = vld [vmem:[%s6568_s9 + $0x18] sm:$0xff]   ;;  %vm1054_vm2 = vcmask 1040384  }
  0x6e   : > { %v5966_v3 = vld [vmem:[%s6568_s9] sm:$0xff]   ;;  %5759 = vmatpush3.bf16.msra.mxu0 %v5963_v0  ;;  %v507_v4 = vsel %vm505_vm1, %v5965_v2, 0  ;;  %v5968_v6 = vld [vmem:[%s6568_s9 + $0x10] sm:$0xff]   ;;  %v5971_v9 = vld [vmem:[%s6568_s9 + $0x28] sm:$0xff]   ;;  %vm1055_vm3 = vsmask.f32 256 }
  0x6f   : > { %5760 = vmatprep.subr.bf16.mxu0 %v5964_v1  ;;  %5764 = vmatprep.mubr.msk.bf16.mxu0 %vm450_vm0, %v5966_v3  ;;  %v5970_v8 = vld [vmem:[%s6568_s9 + $0x20] sm:$0xff]   ;;  %v5972_v10 = vld [vmem:[%s6568_s9 + $0x30] sm:$0xff]   ;;  %v5973_v11 = vld [vmem:[%s6568_s9 + $0x38] sm:$0xff]   ;;  %vm1111_vm4 = vsmask.f32 7938  ;;  %v6368_v48 = vmov 0.0|0.0  }
  0x70   : > { %v5974_v12 = vld [vmem:[%s6568_s9 + $0x40] sm:$0xff]   ;;  %v5975_v13 = vld [vmem:[%s6568_s9 + $0x48] sm:$0xff]   ;;  %v5976_v14 = vld [vmem:[%s6568_s9 + $0x50] sm:$0xff]   ;;  %v4977_v49 = vcombine.low %v6368_v48, %v6368_v48  ;;  %v4978_v50 = vcombine.high %v6368_v48, %v6368_v48  ;;  %vm1637_vm7 = vcmask 1043456   ;;  %vm1275_vm8 = vsmask.f32 4368 }
  0x71   : > { %v5977_v15 = vld [vmem:[%s6568_s9 + $0x58] sm:$0xff]   ;;  %v5978_v16 = vld [vmem:[%s6568_s9 + $0x60] sm:$0xff]   ;;  %v5979_v17 = vld [vmem:[%s6568_s9 + $0x68] sm:$0xff]   ;;  %vm2103_vm11 = vsmask.f32 7424  ;;  %vm2360_vm12 = vcmask 1046528  }
  0x72   : > { %5761 = vmatpush3.bf16.msra.mxu0 %v5964_v1  ;;  %v5980_v18 = vld [vmem:[%s6568_s9 + $0x70] sm:$0xff]   ;;  %v5981_v19 = vld [vmem:[%s6568_s9 + $0x78] sm:$0xff]   ;;  %v5982_v20 = vld [vmem:[%s6568_s9 + $0x80] sm:$0xff]   ;;  %v1278_v53 = vshrl.u32 %v4977_v49, 16  ;;  %v1286_v54 = vshrl.u32 %v4978_v50, 16  ;;  %v1281_v61 = vshll.u32 %v4977_v49, 16 }
  0x73   : > { %5848 = vmatprep.subr.msk.bf16.mxu0 %vm505_vm1, %v5965_v2  ;;  %v5983_v21 = vld [vmem:[%s6568_s9 + $0x88] sm:$0xff]   ;;  %vm6616_vm5 = vmand %vm1054_vm2, %vm1055_vm3  ;;  %v1060_v34 = vld [vmem:[#allocation2 + $0xc] sm:$0x1]  ;;  %v1289_v63 = vshll.u32 %v4978_v50, 16  ;;  %p289_p11 = scmp.lt.s32.totalorder %s6353_s21, 1  ;;  %vm4773_vm13 = vcmask 64512  }
  0x74   : > { %v5984_v22 = vld [vmem:[#allocation7 + $0x40] sm:$0xff]   ;;  %v5987_v25 = vld [vmem:[#allocation7 + $0x48] sm:$0xff]   ;;  %v5991_v29 = vld [vmem:[#allocation7 + $0x50] sm:$0xff]   ;;  %v1061_v36 = vsel %vm6616_vm5, 0, %v1060_v34  ;;  %v1280_v58 = vrot.slane %v1278_v53, 7  ;;  %v6643_v62 = vrot.slane %v1286_v54, 7 }
  0x75   : > { %v5985_v23 = vld [vmem:[#allocation7] sm:$0xff]   ;;  %5286 = vmatprep.subr.bf16.mxu1 %v5984_v22  ;;  %v5989_v27 = vld [vmem:[#allocation7 + $0x8] sm:$0xff]   ;;  %v5993_v31 = vld [vmem:[#allocation7 + $0x10] sm:$0xff]   ;;  %1062 = vst [vmem:[#allocation2 + $0xc] sm:$0x1] %v1061_v36  ;;  %s7939_s21 = smov (!%p289_p11, %s6353_s21), 1 }
  0x76   : > { %5763 = vmatpush3.bf16.msra.mxu0 %v507_v4  ;;  %5287 = vmatpush3.bf16.msra.mxu1 %v5985_v23  ;;  %v5986_v24 = vld [vmem:[#allocation7 + $0xc0] sm:$0xff]   ;;  %v5990_v28 = vld [vmem:[#allocation7 + $0xc8] sm:$0xff]   ;;  %v5994_v32 = vld [vmem:[#allocation7 + $0xd0] sm:$0xff]   ;;  %v1284_v2 = vrot.slane %v1280_v58, 4  ;;  %s5232_s17 = sshll.u32 %s7939_s21, 8 }
  0x77   : > { %v5988_v26 = vld [vmem:[#allocation7 + $0x80] sm:$0xff]   ;;  %5398 = vmatprep.subr.bf16.mxu0 %v5986_v24  ;;  %5288 = vmatprep.subr.bf16.mxu1 %v5987_v25  ;;  %v5992_v30 = vld [vmem:[#allocation7 + $0x88] sm:$0xff]   ;;  %v5995_v35 = vld [vmem:[#allocation7 + $0x58] sm:$0xff]   ;;  %s7740_s10 = scalar_lea.vmem %s7896_s5, %s5232_s17 }
  0x78   : > { %v5996_v37 = vld [vmem:[#allocation7 + $0x90] sm:$0xff]   ;;  %v5997_v38 = vld [vmem:[#allocation7 + $0x18] sm:$0xff]   ;;  %vm6624_vm6 = vmand %vm1054_vm2, %vm1111_vm4 }
  0x79   : > { %5765 = vmatmul.mubr.msk.bf16.vlgmr.msra.gmra.mrb[0].mxu0 %vm450_vm0, %v5967_v5  ;;  %v1116_v40 = vld [vmem:[#allocation2 + $0x14] sm:$0x1]  ;;  %v5998_v42 = vld [vmem:[#allocation7 + $0xd8] sm:$0xff]   ;;  %v1057_v43 = vld [vmem:[#allocation2] sm:$0x1]  ;;  %v6652_v5 = vor.u32 %v1281_v61, %v1280_v58 }
  0x7a   : > { %5768 = vmatprep.mubr.msk.bf16.mxu0 %vm450_vm0, %v5968_v6  ;;  %5399 = vmatpush3.bf16.msra.mxu0 %v5988_v26  ;;  %v1117_v41 = vsel %vm6624_vm6, 0, %v1116_v40  ;;  %v5999_v44 = vld [vmem:[#allocation7 + $0x60] sm:$0xff]   ;;  %v6000_v45 = vld [vmem:[#allocation7 + $0x98] sm:$0xff]   ;;  %v1058_v46 = vsel %vm6616_vm5, 0, %v1057_v43  ;;  %v1063_v57 = vld [vmem:[#allocation2 + $0x18] sm:$0x1]  ;;  %v1291_v6 = vor.u32 %v1289_v63, %v6643_v62 }
  0x7b   : > { %5289 = vmatpush3.bf16.msra.mxu1 %v5989_v27  ;;  %5400 = vmatprep.subr.bf16.mxu0 %v5990_v28  ;;  %1118 = vst [vmem:[#allocation2 + $0x14] sm:$0x1] %v1117_v41  ;;  %v6001_v47 = vld [vmem:[#allocation7 + $0x20] sm:$0xff]   ;;  %1059 = vst [vmem:[#allocation2] sm:$0x1] %v1058_v46  ;;  %v1064_v60 = vsel %vm6616_vm5, 0, %v1063_v57 }
  0x7c   : > { %5290 = vmatprep.subr.bf16.mxu1 %v5991_v29  ;;  %v1113_v51 = vld [vmem:[#allocation2 + $0x8] sm:$0x1]  ;;  %v1066_v55 = vld [vmem:[#allocation2 + $0x24] sm:$0x1]  ;;  %vm6637_vm9 = vmand %vm1637_vm7, %vm1111_vm4  ;;  %1065 = vst [vmem:[#allocation2 + $0x18] sm:$0x1] %v1064_v60 }
  0x7d   : > { %v1114_v52 = vsel %vm6624_vm6, 0, %v1113_v51  ;;  %v1067_v56 = vsel %vm6616_vm5, 0, %v1066_v55  ;;  %vm6646_vm10 = vmor %vm1055_vm3, %vm1275_vm8  ;;  %v1122_v1 = vld [vmem:[#allocation2 + $0x2c] sm:$0x1]  ;;  %v1119_v4 = vld [vmem:[#allocation2 + $0x20] sm:$0x1] }
  0x7e   : > { %5401 = vmatpush3.bf16.msra.mxu0 %v5992_v30  ;;  %1115 = vst [vmem:[#allocation2 + $0x8] sm:$0x1] %v1114_v52  ;;  %1068 = vst [vmem:[#allocation2 + $0x24] sm:$0x1] %v1067_v56  ;;  %v1123_v3 = vsel %vm6624_vm6, 0, %v1122_v1  ;;  %v6008_v22 = vld [vmem:[#allocation7 + $0xa8] sm:$0xff]  }
  0x7f   : > { %5291 = vmatpush3.bf16.msra.mxu1 %v5993_v31  ;;  %5402 = vmatprep.subr.bf16.mxu0 %v5994_v32  ;;  %1124 = vst [vmem:[#allocation2 + $0x2c] sm:$0x1] %v1123_v3  ;;  %v6009_v24 = vld [vmem:[#allocation7 + $0x30] sm:$0xff]   ;;  %v1069_v29 = vld [vmem:[#allocation2 + $0x30] sm:$0x1]  ;;  %v6011_v30 = vld [vmem:[#allocation7 + $0x78] sm:$0xff]  }
  0x80   : > { %5292 = vmatprep.subr.bf16.mxu1 %v5995_v35  ;;  %v6010_v28 = vld [vmem:[#allocation7 + $0xf0] sm:$0xff]   ;;  %v1070_v35 = vsel %vm6616_vm5, 0, %v1069_v29  ;;  %v6013_v36 = vld [vmem:[#allocation7 + $0x38] sm:$0xff]   ;;  %v1125_v51 = vld [vmem:[#allocation2 + $0x38] sm:$0x1] }
  0x81   : > { %5769 = vmatmul.mubr.msk.bf16.gmra.mrb[4].mxu0 %vm450_vm0, %v5969_v7  ;;  %v6012_v31 = vld [vmem:[#allocation7 + $0xb0] sm:$0xff]   ;;  %1071 = vst [vmem:[#allocation2 + $0x30] sm:$0x1] %v1070_v35  ;;  %v6016_v41 = vld [vmem:[#allocation7 + $0xf8] sm:$0xff]   ;;  %v1126_v53 = vsel %vm6624_vm6, 0, %v1125_v51  ;;  %v6020_v57 = vld [vmem:[#allocation7 + $0x140] sm:$0xff]  }
  0x82   : > { %5772 = vmatprep.mubr.msk.bf16.mxu0 %vm450_vm0, %v5970_v8  ;;  %5403 = vmatpush3.bf16.msra.mxu0 %v5996_v37  ;;  %v1639_v7 = vld [vmem:[#allocation2] sm:$0xf]  ;;  %v1120_v8 = vsel %vm6624_vm6, 0, %v1119_v4  ;;  %v1128_v43 = vld [vmem:[#allocation2 + $0x44] sm:$0x1]  ;;  %v6022_v63 = vld [vmem:[#allocation7 + $0x100] sm:$0xff]  }
  0x83   : > { %5293 = vmatpush3.bf16.msra.mxu1 %v5997_v38  ;;  %5404 = vmatprep.subr.bf16.mxu0 %v5998_v42  ;;  %1121 = vst [vmem:[#allocation2 + $0x20] sm:$0x1] %v1120_v8  ;;  %1127 = vst [vmem:[#allocation2 + $0x38] sm:$0x1] %v1126_v53  ;;  %v1078_v54 = vld [vmem:[#allocation2 + $0x54] sm:$0x1] }
  0x84   : > { %5294 = vmatprep.subr.bf16.mxu1 %v5999_v44  ;;  %v1079_v55 = vsel %vm6616_vm5, 0, %v1078_v54  ;;  %v1075_v56 = vld [vmem:[#allocation2 + $0x48] sm:$0x1]  ;;  %v1134_v58 = vld [vmem:[#allocation2 + $0x5c] sm:$0x1]  ;;  %v6032_v8 = vld [vmem:[#allocation7 + $0x148] sm:$0xff]  }
  0x85   : > { %1080 = vst [vmem:[#allocation2 + $0x54] sm:$0x1] %v1079_v55  ;;  %v1076_v60 = vsel %vm6616_vm5, 0, %v1075_v56  ;;  %v1135_v61 = vsel %vm6624_vm6, 0, %v1134_v58  ;;  %v1131_v1 = vld [vmem:[#allocation2 + $0x50] sm:$0x1] }
  0x86   : > { %5405 = vmatpush3.bf16.msra.mxu0 %v6000_v45  ;;  %v6017_v45 = vld [vmem:[#allocation7 + $0xb8] sm:$0xff]   ;;  %1077 = vst [vmem:[#allocation2 + $0x48] sm:$0x1] %v1076_v60  ;;  %1136 = vst [vmem:[#allocation2 + $0x5c] sm:$0x1] %v1135_v61 }
  0x87   : > { %5295 = vmatpush3.bf16.msra.mxu1 %v6001_v47  ;;  %v1129_v47 = vsel %vm6624_vm6, 0, %v1128_v43  ;;  %v1084_v3 = vld [vmem:[#allocation2 + $0x6c] sm:$0x1]  ;;  %v6710_v29 = vld [vmem:[%s7893_s2] ss:$0 sm:$0xff] }
  0x88   : > { %1130 = vst [vmem:[#allocation2 + $0x44] sm:$0x1] %v1129_v47  ;;  %v1085_v4 = vsel %vm6616_vm5, 0, %v1084_v3 }
  0x89   : > { %5773 = vmatmul.mubr.msk.bf16.gmra.mrb[8].mxu0 %vm450_vm0, %v5971_v9  ;;  %v6002_v9 = vld [vmem:[#allocation7 + $0xe0] sm:$0xff]   ;;  %1086 = vst [vmem:[#allocation2 + $0x6c] sm:$0x1] %v1085_v4 }
  0x8a   : > { %5776 = vmatprep.mubr.msk.bf16.mxu0 %vm450_vm0, %v5972_v10  ;;  %v1292_v10 = vsel %vm6646_vm10, %v1284_v2, %v1291_v6  ;;  %5406 = vmatprep.subr.bf16.mxu0 %v6002_v9  ;;  %v1132_v2 = vsel %vm6624_vm6, 0, %v1131_v1  ;;  %v1081_v6 = vld [vmem:[#allocation2 + $0x60] sm:$0x1]  ;;  %v1140_v9 = vld [vmem:[#allocation2 + $0x74] sm:$0x1] }
  0x8b   : > { %1642 = vst [vmem:[#allocation2 + $0x4] sm:$0xf] %v1292_v10  ;;  %1761 = vst [vmem:[#allocation2 + $0xd0] sm:$0xf] %v1292_v10  ;;  %v1141_v10 = vsel %vm6624_vm6, 0, %v1140_v9 }
  0x8c   : > { %1133 = vst [vmem:[#allocation2 + $0x50] sm:$0x1] %v1132_v2  ;;  %1142 = vst [vmem:[#allocation2 + $0x74] sm:$0x1] %v1141_v10 }
  0x91   : > { %5777 = vmatmul.mubr.msk.bf16.gmra.mrb[12].mxu0 %vm450_vm0, %v5973_v11  ;;  %v7901_v11 = vrot.slane %v6643_v62, 4 }
  0x92   : > { %5780 = vmatprep.mubr.msk.bf16.mxu0 %vm450_vm0, %v5974_v12  ;;  %v1640_v12 = vsel %vm6637_vm9, %v6652_v5, %v1639_v7  ;;  %v1766_v25 = vld [vmem:[#allocation2 + $0x4] sm:$0xf]  ;;  %v1082_v7 = vsel %vm6616_vm5, 0, %v1081_v6 }
  0x93   : > { %1641 = vst [vmem:[#allocation2] sm:$0xf] %v1640_v12  ;;  %1083 = vst [vmem:[#allocation2 + $0x60] sm:$0x1] %v1082_v7  ;;  %v6033_v12 = vld [vmem:[#allocation7 + $0x108] sm:$0xff]  }
  0x99   : > { %5781 = vmatmul.mubr.msk.bf16.gmra.mrb[16].mxu0 %vm450_vm0, %v5975_v13  ;;  %v1643_v13 = vld [vmem:[#allocation2 + $0x8] sm:$0x1] }
  0x9a   : > { %5784 = vmatprep.mubr.msk.bf16.mxu0 %vm450_vm0, %v5976_v14  ;;  %v1644_v14 = vsel %vm6616_vm5, %v7901_v11, %v1643_v13  ;;  %v1765_v23 = vld [vmem:[#allocation2] sm:$0xf]  ;;  %v1137_v13 = vld [vmem:[#allocation2 + $0x68] sm:$0x1] }
  0x9b   : > { %1645 = vst [vmem:[#allocation2 + $0x8] sm:$0x1] %v1644_v14  ;;  %v5013_v26 = vcombine.low %v1765_v23, %v1766_v25  ;;  %v1813_v42 = vld [vmem:[#allocation2] sm:$0xe]  ;;  %v1138_v14 = vsel %vm6624_vm6, 0, %v1137_v13 }
  0x9c   : > { %v5045_v46 = vcombine.low %v1813_v42, %v1766_v25  ;;  %1139 = vst [vmem:[#allocation2 + $0x68] sm:$0x1] %v1138_v14  ;;  %v1143_v23 = vld [vmem:[#allocation2 + $0x80] sm:$0x1]  ;;  %v1096_v25 = vld [vmem:[#allocation2 + $0x9c] sm:$0x1] }
  0x9d   : > { %v2105_v32 = vshrl.u32 %v5013_v26, 16  ;;  %v2107_v34 = vshll.u32 %v5013_v26, 16 }
  0x9e   : > { %v2361_v50 = vrot.slane %v5045_v46, 1 }
  0x9f   : > { %v2109_v38 = vrot.slane %v2107_v34, 1 }
  0xa1   : > { %5785 = vmatmul.mubr.msk.bf16.gmra.mrb[20].mxu0 %vm450_vm0, %v5977_v15  ;;  %v6003_v15 = vld [vmem:[#allocation7 + $0x68] sm:$0xff]   ;;  %v2110_v44 = vor.u32 %v2109_v38, %v2105_v32  ;;  %v1152_v32 = vld [vmem:[#allocation2 + $0xa4] sm:$0x1] }
  0xa2   : > { %5788 = vmatprep.mubr.msk.bf16.mxu0 %vm450_vm0, %v5978_v16  ;;  %v6004_v16 = vld [vmem:[#allocation7 + $0xa0] sm:$0xff]   ;;  %5296 = vmatprep.subr.bf16.mxu1 %v6003_v15  ;;  %v6015_v27 = vld [vmem:[#allocation2 + $0x8] ss:$0 sps:$4 sm:$0x11]   ;;  %v1090_v15 = vld [vmem:[#allocation2 + $0x84] sm:$0x1] }
  0xa3   : > { %5407 = vmatpush3.bf16.msra.mxu0 %v6004_v16  ;;  %v2112_v37 = vshll.u32 %v6015_v27, 16  ;;  %v2362_v49 = vrot.slane %v6015_v27, 1  ;;  %v1091_v16 = vsel %vm6616_vm5, 0, %v1090_v15  ;;  %v1093_v27 = vld [vmem:[#allocation2 + $0x90] sm:$0x1] }
  0xa4   : > { %1092 = vst [vmem:[#allocation2 + $0x84] sm:$0x1] %v1091_v16  ;;  %v1149_v38 = vld [vmem:[#allocation2 + $0x98] sm:$0x1] }
  0xa5   : > { %v2114_v40 = vrot.slane %v2112_v37, 1  ;;  %v6675_v52 = vsel %vm2360_vm12, %v2361_v50, %v2362_v49  ;;  %v6057_v37 = vld [vmem:[#allocation7 + $0x118] sm:$0xff]   ;;  %v1150_v42 = vsel %vm6624_vm6, 0, %v1149_v38  ;;  %v1102_v50 = vld [vmem:[#allocation2 + $0xb4] sm:$0x1] }
  0xa6   : > { %1151 = vst [vmem:[#allocation2 + $0x98] sm:$0x1] %v1150_v42  ;;  %v1103_v53 = vsel %vm6616_vm5, 0, %v1102_v50  ;;  %v1650_v42 = vld [vmem:[#allocation2 + $0x14] sm:$0x1] }
  0xa7   : > { %v2115_v48 = vsel %vm2103_vm11, %v2110_v44, %v2114_v40  ;;  %v6068_v40 = vld [vmem:[#allocation7 + $0x1c0] sm:$0xff]   ;;  %1104 = vst [vmem:[#allocation2 + $0xb4] sm:$0x1] %v1103_v53 }
  0xa8   : > { %3961 = vmatprep.mubr.bf16.mxu1 %v2115_v48 }
  0xa9   : > { %5789 = vmatmul.mubr.msk.bf16.gmra.mrb[24].mxu0 %vm450_vm0, %v5979_v17  ;;  %v6005_v17 = vld [vmem:[#allocation7 + $0x28] sm:$0xff]  }
  0xaa   : > { %5792 = vmatprep.mubr.msk.bf16.mxu0 %vm450_vm0, %v5980_v18  ;;  %v1072_v18 = vld [vmem:[#allocation2 + $0x3c] sm:$0x1]  ;;  %5297 = vmatpush3.bf16.msra.mxu1 %v6005_v17  ;;  %v1087_v17 = vld [vmem:[#allocation2 + $0x78] sm:$0x1] }
  0xb1   : > { %5793 = vmatmul.mubr.msk.bf16.gmra.mrb[28].mxu0 %vm450_vm0, %v5981_v19  ;;  %v6006_v19 = vld [vmem:[#allocation7 + $0xe8] sm:$0xff]  }
  0xb2   : > { %5796 = vmatprep.mubr.msk.bf16.mxu0 %vm450_vm0, %v5982_v20  ;;  %v1073_v20 = vsel %vm6616_vm5, 0, %v1072_v18  ;;  %5408 = vmatprep.subr.bf16.mxu0 %v6006_v19  ;;  %v6044_v18 = vld [vmem:[#allocation7 + $0x150] sm:$0xff]   ;;  %v1146_v19 = vld [vmem:[#allocation2 + $0x8c] sm:$0x1] }
  0xb3   : > { %1074 = vst [vmem:[#allocation2 + $0x3c] sm:$0x1] %v1073_v20  ;;  %5409 = vmatpush3.bf16.msra.mxu0 %v6008_v22  ;;  %v1088_v20 = vsel %vm6616_vm5, 0, %v1087_v17  ;;  %v6045_v22 = vld [vmem:[#allocation7 + $0x110] sm:$0xff]  }
  0xb4   : > { %5410 = vmatprep.subr.bf16.mxu0 %v6010_v28  ;;  %1089 = vst [vmem:[#allocation2 + $0x78] sm:$0x1] %v1088_v20  ;;  %v1094_v28 = vsel %vm6616_vm5, 0, %v1093_v27  ;;  %v1646_v27 = vld [vmem:[#allocation2 + $0xc] sm:$0xf] }
  0xb5   : > { %1095 = vst [vmem:[#allocation2 + $0x90] sm:$0x1] %v1094_v28 }
  0xb7   : > { %5411 = vmatpush3.bf16.msra.mxu0 %v6012_v31  ;;  %v6056_v31 = vld [vmem:[#allocation7 + $0x158] sm:$0xff]  }
  0xb8   : > { %5412 = vmatprep.subr.bf16.mxu0 %v6016_v41 }
  0xb9   : > { %5797 = vmatmul.mubr.msk.bf16.gmra.mrb[32].mxu0 %vm450_vm0, %v5983_v21  ;;  %v6007_v21 = vld [vmem:[#allocation7 + $0x70] sm:$0xff]  }
  0xba   : > { %5298 = vmatprep.subr.bf16.mxu1 %v6007_v21  ;;  %v1147_v21 = vsel %vm6624_vm6, 0, %v1146_v19 }
  0xbb   : > { %5299 = vmatpush3.bf16.msra.mxu1 %v6009_v24  ;;  %5413 = vmatpush3.bf16.msra.mxu0 %v6017_v45  ;;  %1148 = vst [vmem:[#allocation2 + $0x8c] sm:$0x1] %v1147_v21  ;;  %v1144_v24 = vsel %vm6624_vm6, 0, %v1143_v23 }
  0xbc   : > { %5300 = vmatprep.subr.bf16.mxu1 %v6011_v30  ;;  %1145 = vst [vmem:[#allocation2 + $0x80] sm:$0x1] %v1144_v24  ;;  %5622 = vmatprep.subr.bf16.mxu0 %v6068_v40 }
  0xbf   : > { %5301 = vmatpush3.bf16.msra.mxu1 %v6013_v36  ;;  %v1153_v36 = vsel %vm6624_vm6, 0, %v1152_v32 }
  0xc0   : > { %5510 = vmatprep.subr.bf16.mxu1 %v6020_v57  ;;  %1154 = vst [vmem:[#allocation2 + $0xa4] sm:$0x1] %v1153_v36 }
  0xc2   : > { %3962 = vmatmul.mubr.bf16.vlgmr.msra.gmra.mrb[0].mxu1 %v5013_v26  ;;  %v1097_v26 = vsel %vm6616_vm5, 0, %v1096_v25 }
  0xc3   : > { %5511 = vmatpush3.bf16.msra.mxu1 %v6022_v63  ;;  %1098 = vst [vmem:[#allocation2 + $0x9c] sm:$0x1] %v1097_v26 }
  0xc4   : > { %5512 = vmatprep.subr.bf16.mxu1 %v6032_v8 }
  0xc7   : > { %5513 = vmatpush3.bf16.msra.mxu1 %v6033_v12 }
  0xc8   : > { %5514 = vmatprep.subr.bf16.mxu1 %v6044_v18 }
  0xcb   : > { %5515 = vmatpush3.bf16.msra.mxu1 %v6045_v22 }
  0xcc   : > { %5516 = vmatprep.subr.bf16.mxu1 %v6056_v31 }
  0xcf   : > { %5517 = vmatpush3.bf16.msra.mxu1 %v6057_v37 }
 0x14c   : > { %v5766_v30 = vpop.f32.mrb[0].mxu0 }
 0x14d   : > { %v695_v34 = vadd.f32 %v5766_v30, %v6710_v29  ;;  %v543_v35 = vpop.f32.mrb[1].mxu0 }
 0x14e   : > { %v5767_v41 = vpop.f32.mrb[2].mxu0  ;;  %v6070_v35 = vld [vmem:[#allocation7 + $0x160] sm:$0xff]  }
 0x14f   : > { %v731_v43 = vmax.f32 %v695_v34, 0.0  ;;  %v696_v44 = vadd.f32 %v5767_v41, %v6710_v29  ;;  %v546_v45 = vpop.f32.mrb[3].mxu0  ;;  %5518 = vmatprep.subr.bf16.mxu1 %v6070_v35 }
 0x151   : > { %v767_v46 = vmin.f32 %v731_v43, 10.0  ;;  %v732_v47 = vmax.f32 %v696_v44, 0.0 }
 0x153   : > { %v803_v48 = vmul.f32 25.5, %v767_v46  ;;  %v768_v49 = vmin.f32 %v732_v47, 10.0 }
 0x154   : > { %v5770_v51 = vpop.f32.mrb[4].mxu0 }
 0x155   : > { %v5852_v54 = vround.rtne.f32 %v803_v48  ;;  %v804_v55 = vmul.f32 25.5, %v768_v49  ;;  %v699_v56 = vadd.f32 %v5770_v51, %v6710_v29  ;;  %v559_v57 = vpop.f32.mrb[5].mxu0  ;;  %v6071_v51 = vld [vmem:[#allocation7 + $0x120] sm:$0xff]  }
 0x156   : > { %v697_v58 = vadd.f32 %v6710_v29, %v559_v57  ;;  %v5771_v60 = vpop.f32.mrb[6].mxu0  ;;  %5519 = vmatpush3.bf16.msra.mxu1 %v6071_v51 }
 0x157   : > { %v875_v61 = vmul.f32 0.039215688, %v5852_v54  ;;  %v5853_v63 = vround.rtne.f32 %v804_v55  ;;  %v735_v1 = vmax.f32 %v699_v56, 0.0  ;;  %v700_v2 = vadd.f32 %v5771_v60, %v6710_v29  ;;  %v562_v3 = vpop.f32.mrb[7].mxu0 }
 0x158   : > { %v733_v4 = vmax.f32 %v697_v58, 0.0  ;;  %v698_v6 = vadd.f32 %v6710_v29, %v562_v3 }
 0x159   : > { %v5233_v7 = vpack.c.bf16 %v875_v61, %v875_v61  ;;  %v876_v8 = vmul.f32 0.039215688, %v5853_v63  ;;  %v771_v9 = vmin.f32 %v735_v1, 10.0  ;;  %v736_v10 = vmax.f32 %v700_v2, 0.0  ;;  %v6084_v63 = vld [vmem:[#allocation7 + $0x168] sm:$0xff]  }
 0x15a   : > { %v769_v12 = vmin.f32 %v733_v4, 10.0  ;;  %v734_v13 = vmax.f32 %v698_v6, 0.0  ;;  %5520 = vmatprep.subr.bf16.mxu1 %v6084_v63 }
 0x15b   : > { %v1295_v14 = vshrl.u32 %v5233_v7, 16  ;;  %v5234_v15 = vpack.c.bf16 %v876_v8, %v876_v8  ;;  %v807_v16 = vmul.f32 25.5, %v771_v9  ;;  %v1298_v17 = vshll.u32 %v5233_v7, 16  ;;  %v6085_v7 = vld [vmem:[#allocation7 + $0x128] sm:$0xff]   ;;  %v1660_v9 = vld [vmem:[#allocation2 + $0x24] sm:$0xf] }
 0x15c   : > { %v805_v18 = vmul.f32 25.5, %v769_v12  ;;  %v772_v19 = vmin.f32 %v736_v10, 10.0  ;;  %v770_v20 = vmin.f32 %v734_v13, 10.0  ;;  %v5774_v21 = vpop.f32.mrb[8].mxu0  ;;  %5521 = vmatpush3.bf16.msra.mxu1 %v6085_v7 }
 0x15d   : > { %v1297_v22 = vrot.slane %v1295_v14, 7  ;;  %v1303_v23 = vshrl.u32 %v5234_v15, 16  ;;  %v1306_v24 = vshll.u32 %v5234_v15, 16  ;;  %v5856_v25 = vround.rtne.f32 %v807_v16  ;;  %v575_v26 = vpop.f32.mrb[9].mxu0 }
 0x15e   : > { %v5854_v28 = vround.rtne.f32 %v805_v18  ;;  %v808_v30 = vmul.f32 25.5, %v772_v19  ;;  %v806_v31 = vmul.f32 25.5, %v770_v20  ;;  %v703_v32 = vadd.f32 %v5774_v21, %v6710_v29  ;;  %v5775_v34 = vpop.f32.mrb[10].mxu0 }
 0x15f   : > { %v1300_v36 = vor.u32 %v1298_v17, %v1297_v22  ;;  %v1301_v37 = vrot.slane %v1297_v22, 4  ;;  %v1305_v38 = vrot.slane %v1303_v23, 7  ;;  %v879_v40 = vmul.f32 0.039215688, %v5856_v25  ;;  %v6725_v41 = vpop.f32.mrb[11].mxu0 }
 0x160   : > { %v877_v43 = vmul.f32 0.039215688, %v5854_v28  ;;  %v5857_v44 = vround.rtne.f32 %v808_v30  ;;  %v5855_v45 = vround.rtne.f32 %v806_v31  ;;  %v739_v46 = vmax.f32 %v703_v32, 0.0  ;;  %v1653_v22 = vld [vmem:[#allocation2 + $0x18] sm:$0xf] }
 0x161   : > { %v1647_v47 = vsel %vm6637_vm9, %v1300_v36, %v1646_v27  ;;  %v1308_v48 = vor.u32 %v1306_v24, %v1305_v38  ;;  %v1310_v49 = vrot.slane %v1305_v38, 4  ;;  %v5237_v50 = vpack.c.bf16 %v879_v40, %v879_v40  ;;  %v1664_v32 = vld [vmem:[#allocation2 + $0x2c] sm:$0x1] }
 0x162   : > { %1648 = vst [vmem:[#allocation2 + $0xc] sm:$0xf] %v1647_v47  ;;  %v5235_v53 = vpack.c.bf16 %v877_v43, %v877_v43  ;;  %v880_v54 = vmul.f32 0.039215688, %v5857_v44  ;;  %v878_v55 = vmul.f32 0.039215688, %v5855_v45  ;;  %v701_v12 = vadd.f32 %v6710_v29, %v575_v26 }
 0x163   : > { %v775_v56 = vmin.f32 %v739_v46, 10.0  ;;  %v1309_v57 = vsel %vm6646_vm10, %v1301_v37, %v1308_v48  ;;  %v1651_v58 = vsel %vm6616_vm5, %v1310_v49, %v1650_v42  ;;  %v1329_v60 = vshrl.u32 %v5237_v50, 16  ;;  %v1657_v43 = vld [vmem:[#allocation2 + $0x20] sm:$0x1] }
 0x164   : > { %v1332_v61 = vshll.u32 %v5237_v50, 16  ;;  %1649 = vst [vmem:[#allocation2 + $0x10] sm:$0xf] %v1309_v57  ;;  %1652 = vst [vmem:[#allocation2 + $0x14] sm:$0x1] %v1651_v58  ;;  %v1312_v1 = vshrl.u32 %v5235_v53, 16  ;;  %v5238_v3 = vpack.c.bf16 %v880_v54, %v880_v54  ;;  %v5236_v4 = vpack.c.bf16 %v878_v55, %v878_v55 }
 0x165   : > { %v1315_v2 = vshll.u32 %v5235_v53, 16  ;;  %v5778_v6 = vpop.f32.mrb[12].mxu0  ;;  %v1331_v8 = vrot.slane %v1329_v60, 7  ;;  %v811_v10 = vmul.f32 25.5, %v775_v56  ;;  %v704_v13 = vadd.f32 %v5775_v34, %v6710_v29  ;;  %v1674_v58 = vld [vmem:[#allocation2 + $0x3c] sm:$0xf] }
 0x166   : > { %v591_v14 = vpop.f32.mrb[13].mxu0  ;;  %v1314_v15 = vrot.slane %v1312_v1, 7  ;;  %v1337_v16 = vshrl.u32 %v5238_v3, 16  ;;  %v1340_v17 = vshll.u32 %v5238_v3, 16  ;;  %v1320_v18 = vshrl.u32 %v5236_v4, 16 }
 0x167   : > { %v6735_v19 = vpop.f32.mrb[14].mxu0  ;;  %v1334_v20 = vor.u32 %v1332_v61, %v1331_v8  ;;  %v1335_v21 = vrot.slane %v1331_v8, 4  ;;  %v1323_v23 = vshll.u32 %v5236_v4, 16  ;;  %v5860_v24 = vround.rtne.f32 %v811_v10 }
 0x168   : > { %v6737_v25 = vpop.f32.mrb[15].mxu0  ;;  %v1317_v27 = vor.u32 %v1315_v2, %v1314_v15  ;;  %v1318_v26 = vrot.slane %v1314_v15, 4  ;;  %v1339_v28 = vrot.slane %v1337_v16, 7  ;;  %v1322_v30 = vrot.slane %v1320_v18, 7 }
 0x169   : > { %v1661_v31 = vsel %vm6637_vm9, %v1334_v20, %v1660_v9  ;;  %v883_v34 = vmul.f32 0.039215688, %v5860_v24  ;;  %v737_v35 = vmax.f32 %v701_v12, 0.0  ;;  %v740_v36 = vmax.f32 %v704_v13, 0.0  ;;  %v1830_v2 = vld [vmem:[#allocation2 + $0xc] sm:$0xf] }
 0x16a   : > { %1662 = vst [vmem:[#allocation2 + $0x24] sm:$0xf] %v1661_v31  ;;  %v1654_v37 = vsel %vm6637_vm9, %v1317_v27, %v1653_v22  ;;  %v1342_v38 = vor.u32 %v1340_v17, %v1339_v28  ;;  %v1344_v40 = vrot.slane %v1339_v28, 4  ;;  %v1325_v42 = vor.u32 %v1323_v23, %v1322_v30  ;;  %v6069_v9 = vld [vmem:[#allocation7 + $0x180] sm:$0xff]   ;;  %v6083_v28 = vld [vmem:[#allocation7 + $0x188] sm:$0xff]  }
 0x16b   : > { %1655 = vst [vmem:[#allocation2 + $0x18] sm:$0xf] %v1654_v37  ;;  %v1327_v44 = vrot.slane %v1322_v30, 4  ;;  %v5241_v45 = vpack.c.bf16 %v883_v34, %v883_v34  ;;  %v773_v46 = vmin.f32 %v737_v35, 10.0  ;;  %v776_v47 = vmin.f32 %v740_v36, 10.0 }
 0x16c   : > { %v1343_v48 = vsel %vm6646_vm10, %v1335_v21, %v1342_v38  ;;  %v1665_v49 = vsel %vm6616_vm5, %v1344_v40, %v1664_v32  ;;  %v1326_v50 = vsel %vm6646_vm10, %v1318_v26, %v1325_v42  ;;  %v702_v51 = vadd.f32 %v6710_v29, %v6725_v41  ;;  %v1831_v53 = vld [vmem:[#allocation2 + $0x10] sm:$0xf]  ;;  %v6755_v41 = vpop.f32.mrb[16].mxu0 }
 0x16d   : > { %1663 = vst [vmem:[#allocation2 + $0x28] sm:$0xf] %v1343_v48  ;;  %1666 = vst [vmem:[#allocation2 + $0x2c] sm:$0x1] %v1665_v49  ;;  %v1658_v54 = vsel %vm6616_vm5, %v1327_v44, %v1657_v43  ;;  %v1363_v55 = vshrl.u32 %v5241_v45, 16  ;;  %v1366_v56 = vshll.u32 %v5241_v45, 16  ;;  %v707_v63 = vadd.f32 %v5778_v6, %v6710_v29 }
 0x16e   : > { %1656 = vst [vmem:[#allocation2 + $0x1c] sm:$0xf] %v1326_v50  ;;  %v809_v57 = vmul.f32 25.5, %v773_v46  ;;  %1659 = vst [vmem:[#allocation2 + $0x20] sm:$0x1] %v1658_v54  ;;  %v812_v60 = vmul.f32 25.5, %v776_v47  ;;  %v705_v1 = vadd.f32 %v6710_v29, %v591_v14  ;;  %v6759_v7 = vcombine.low %v1830_v2, %v1831_v53 }
 0x16f   : > { %v738_v61 = vmax.f32 %v702_v51, 0.0  ;;  %v6757_v3 = vrot.slane %v1363_v55, 7  ;;  %v6761_v8 = vpop.f32.mrb[17].mxu0  ;;  %v743_v13 = vmax.f32 %v707_v63, 0.0  ;;  %v6082_v6 = vld [vmem:[#allocation7 + $0x1c8] sm:$0xff]   ;;  %v708_v26 = vadd.f32 %v6735_v19, %v6710_v29 }
 0x170   : > { %v5858_v4 = vround.rtne.f32 %v809_v57  ;;  %v5861_v10 = vround.rtne.f32 %v812_v60  ;;  %v741_v15 = vmax.f32 %v705_v1, 0.0  ;;  %v6763_v16 = vpop.f32.mrb[18].mxu0  ;;  %4122 = vmatprep.mubr.bf16.mxu0 %v6759_v7  ;;  %v6775_v38 = vld [vmem:[#allocation2 + $0x10] sm:$0xf]  ;;  %v706_v47 = vadd.f32 %v6710_v29, %v6737_v25  ;;  %v1767_v48 = vld [vmem:[#allocation2 + $0xc] sm:$0xf] }
 0x171   : > { %v774_v12 = vmin.f32 %v738_v61, 10.0  ;;  %v1368_v14 = vor.u32 %v1366_v56, %v6757_v3  ;;  %v779_v21 = vmin.f32 %v743_v13, 10.0  ;;  %4123 = vmatmul.mubr.bf16.vlgmr.msra.gmra.mrb[36].mxu0 %v6675_v52  ;;  %v6768_v23 = vpop.f32.mrb[19].mxu0  ;;  %v1369_v35 = vrot.slane %v6757_v3, 4  ;;  %v1667_v49 = vld [vmem:[#allocation2 + $0x30] sm:$0xf] }
 0x172   : > { %v881_v17 = vmul.f32 0.039215688, %v5858_v4  ;;  %v884_v18 = vmul.f32 0.039215688, %v5861_v10  ;;  %v777_v22 = vmin.f32 %v741_v15, 10.0  ;;  %5623 = vmatpush3.bf16.msra.mxu0 %v6069_v9  ;;  %v744_v37 = vmax.f32 %v708_v26, 0.0 }
 0x173   : > { %v810_v20 = vmul.f32 25.5, %v774_v12  ;;  %v1675_v24 = vsel %vm6637_vm9, %v1368_v14, %v1674_v58  ;;  %v815_v32 = vmul.f32 25.5, %v779_v21  ;;  %5624 = vmatprep.subr.bf16.mxu0 %v6082_v6  ;;  %v6780_v54 = vcombine.low %v1767_v48, %v6775_v38  ;;  %v1678_v57 = vld [vmem:[#allocation2 + $0x44] sm:$0x1] }
 0x174   : > { %v5239_v27 = vpack.c.bf16 %v881_v17, %v881_v17  ;;  %1676 = vst [vmem:[#allocation2 + $0x3c] sm:$0xf] %v1675_v24  ;;  %v5242_v30 = vpack.c.bf16 %v884_v18, %v884_v18  ;;  %v813_v34 = vmul.f32 25.5, %v777_v22  ;;  %v780_v46 = vmin.f32 %v744_v37, 10.0  ;;  %v6782_v3 = vpop.f32.mrb[20].mxu0 }
 0x175   : > { %v5859_v31 = vround.rtne.f32 %v810_v20  ;;  %v5864_v44 = vround.rtne.f32 %v815_v32  ;;  %v6786_v12 = vpop.f32.mrb[21].mxu0  ;;  %v742_v14 = vmax.f32 %v706_v47, 0.0  ;;  %v1671_v17 = vld [vmem:[#allocation2 + $0x38] sm:$0x1]  ;;  %v2117_v48 = vshrl.u32 %v6780_v54, 16 }
 0x176   : > { %v1346_v52 = vshrl.u32 %v5239_v27, 16  ;;  %v1349_v36 = vshll.u32 %v5239_v27, 16  ;;  %v1371_v40 = vshrl.u32 %v5242_v30, 16  ;;  %v1374_v42 = vshll.u32 %v5242_v30, 16  ;;  %5625 = vmatpush3.bf16.msra.mxu0 %v6083_v28  ;;  %v1688_v28 = vld [vmem:[#allocation2 + $0x54] sm:$0xf] }
 0x177   : > { %v882_v43 = vmul.f32 0.039215688, %v5859_v31  ;;  %v5862_v45 = vround.rtne.f32 %v813_v34  ;;  %v887_v53 = vmul.f32 0.039215688, %v5864_v44  ;;  %v816_v60 = vmul.f32 25.5, %v780_v46 }
 0x178   : > { %v1348_v19 = vrot.slane %v1346_v52, 7  ;;  %v1373_v50 = vrot.slane %v1371_v40, 7  ;;  %v6792_v24 = vld [vmem:[#allocation2 + $0x14] ss:$0 sps:$4 sm:$0x11]   ;;  %v778_v31 = vmin.f32 %v742_v14, 10.0 }
 0x179   : > { %v5240_v51 = vpack.c.bf16 %v882_v43, %v882_v43  ;;  %v885_v58 = vmul.f32 0.039215688, %v5862_v45  ;;  %v5245_v4 = vpack.c.bf16 %v887_v53, %v887_v53  ;;  %v5865_v10 = vround.rtne.f32 %v816_v60  ;;  %v6799_v52 = vpop.f32.mrb[22].mxu0  ;;  %v6098_v60 = vld [vmem:[#allocation7 + $0x170] sm:$0xff]  }
 0x17a   : > { %v1351_v55 = vor.u32 %v1349_v36, %v1348_v19  ;;  %v1352_v56 = vrot.slane %v1348_v19, 4  ;;  %v1376_v61 = vor.u32 %v1374_v42, %v1373_v50  ;;  %v1378_v63 = vrot.slane %v1373_v50, 4  ;;  %v6096_v36 = vld [vmem:[#allocation7 + $0x1d0] sm:$0xff]   ;;  %v1681_v42 = vld [vmem:[#allocation2 + $0x48] sm:$0xf]  ;;  %v6805_v45 = vpop.f32.mrb[23].mxu0  ;;  %5522 = vmatprep.subr.bf16.mxu1 %v6098_v60 }
 0x17b   : > { %v1354_v1 = vshrl.u32 %v5240_v51, 16  ;;  %v1357_v2 = vshll.u32 %v5240_v51, 16  ;;  %v5243_v9 = vpack.c.bf16 %v885_v58, %v885_v58  ;;  %v1397_v18 = vshrl.u32 %v5245_v4, 16  ;;  %v1833_v19 = vld [vmem:[#allocation2 + $0x1c] sm:$0xf]  ;;  %5626 = vmatprep.subr.bf16.mxu0 %v6096_v36 }
 0x17c   : > { %v1668_v25 = vsel %vm6637_vm9, %v1351_v55, %v1667_v49  ;;  %v1377_v13 = vsel %vm6646_vm10, %v1369_v35, %v1376_v61  ;;  %v1679_v15 = vsel %vm6616_vm5, %v1378_v63, %v1678_v57  ;;  %v1400_v20 = vshll.u32 %v5245_v4, 16  ;;  %v1832_v49 = vld [vmem:[#allocation2 + $0x18] sm:$0xf]  ;;  %v6810_v50 = vpop.f32.mrb[24].mxu0  ;;  %v6097_v51 = vld [vmem:[#allocation7 + $0x190] sm:$0xff]  }
 0x17d   : > { %1669 = vst [vmem:[#allocation2 + $0x30] sm:$0xf] %v1668_v25  ;;  %v1356_v6 = vrot.slane %v1354_v1, 7  ;;  %1677 = vst [vmem:[#allocation2 + $0x40] sm:$0xf] %v1377_v13  ;;  %v1380_v21 = vshrl.u32 %v5243_v9, 16  ;;  %v6819_v25 = vcombine.low %v1832_v49, %v1833_v19  ;;  %5627 = vmatpush3.bf16.msra.mxu0 %v6097_v51  ;;  %v709_v49 = vadd.f32 %v6710_v29, %v6761_v8 }
 0x17e   : > { %1680 = vst [vmem:[#allocation2 + $0x44] sm:$0x1] %v1679_v15  ;;  %v1383_v22 = vshll.u32 %v5243_v9, 16  ;;  %v888_v30 = vmul.f32 0.039215688, %v5865_v10  ;;  %v6794_v32 = vrot.slane %v1397_v18, 7 }
 0x17f   : > { %v1359_v27 = vor.u32 %v1357_v2, %v1356_v6  ;;  %v1361_v26 = vrot.slane %v1356_v6, 4  ;;  %v6796_v34 = vrot.slane %v1380_v21, 7  ;;  %v2119_v35 = vshll.u32 %v6780_v54, 16  ;;  %v6812_v58 = vpop.f32.mrb[25].mxu0  ;;  %v6099_v61 = vld [vmem:[#allocation7 + $0x130] sm:$0xff]   ;;  %4130 = vmatprep.mubr.bf16.mxu0 %v6819_v25 }
 0x180   : > { %v5246_v43 = vpack.c.bf16 %v888_v30, %v888_v30  ;;  %v814_v44 = vmul.f32 25.5, %v778_v31  ;;  %v1402_v46 = vor.u32 %v1400_v20, %v6794_v32  ;;  %v2124_v2 = vshll.u32 %v6792_v24, 16  ;;  %v1814_v4 = vld [vmem:[#allocation2 + $0xc] sm:$0xe]  ;;  %v6821_v9 = vpop.f32.mrb[26].mxu0  ;;  %5523 = vmatpush3.bf16.msra.mxu1 %v6099_v61 }
 0x181   : > { %v1360_v37 = vsel %vm6646_vm10, %v1352_v56, %v1359_v27  ;;  %v1672_v40 = vsel %vm6616_vm5, %v1361_v26, %v1671_v17  ;;  %v1385_v47 = vor.u32 %v1383_v22, %v6796_v34  ;;  %v2121_v57 = vrot.slane %v2119_v35, 1  ;;  %v6824_v14 = vpop.f32.mrb[27].mxu0  ;;  %v1692_v17 = vld [vmem:[#allocation2 + $0x5c] sm:$0x1]  ;;  %v1834_v30 = vld [vmem:[#allocation2 + $0x24] sm:$0xf] }
 0x182   : > { %1670 = vst [vmem:[#allocation2 + $0x34] sm:$0xf] %v1360_v37  ;;  %1673 = vst [vmem:[#allocation2 + $0x38] sm:$0x1] %v1672_v40  ;;  %v1405_v53 = vshrl.u32 %v5246_v43, 16  ;;  %v1408_v55 = vshll.u32 %v5246_v43, 16  ;;  %v5863_v56 = vround.rtne.f32 %v814_v44  ;;  %v1689_v63 = vsel %vm6637_vm9, %v1402_v46, %v1688_v28 }
 0x183   : > { %v1682_v1 = vsel %vm6637_vm9, %v1385_v47, %v1681_v42  ;;  %v1403_v10 = vrot.slane %v6794_v32, 4  ;;  %1690 = vst [vmem:[#allocation2 + $0x54] sm:$0xf] %v1689_v63  ;;  %v2122_v6 = vor.u32 %v2121_v57, %v2117_v48  ;;  %v2126_v18 = vrot.slane %v2124_v2, 1  ;;  %v1835_v31 = vld [vmem:[#allocation2 + $0x28] sm:$0xf] }
 0x184   : > { %1683 = vst [vmem:[#allocation2 + $0x48] sm:$0xf] %v1682_v1  ;;  %v1407_v13 = vrot.slane %v1405_v53, 7  ;;  %v886_v15 = vmul.f32 0.039215688, %v5863_v56  ;;  %v5046_v20 = vcombine.low %v1814_v4, %v6775_v38  ;;  %v2365_v21 = vrot.slane %v6792_v24, 1 }
 0x185   : > { %v6829_v22 = vpop.f32.mrb[28].mxu0  ;;  %v2127_v35 = vsel %vm2103_vm11, %v2122_v6, %v2126_v18  ;;  %v711_v37 = vadd.f32 %v6755_v41, %v6710_v29  ;;  %v6836_v40 = vld [vmem:[#allocation2 + $0x1c] sm:$0xf]  ;;  %v6838_v38 = vld [vmem:[#allocation2 + $0x20] ss:$0 sps:$4 sm:$0x11]   ;;  %v6848_v47 = vcombine.low %v1834_v30, %v1835_v31  ;;  %v710_v2 = vadd.f32 %v6710_v29, %v6768_v23 }
 0x186   : > { %v1410_v27 = vor.u32 %v1408_v55, %v1407_v13  ;;  %v1412_v26 = vrot.slane %v1407_v13, 4  ;;  %v5244_v28 = vpack.c.bf16 %v886_v15, %v886_v15  ;;  %v6831_v32 = vpop.f32.mrb[29].mxu0  ;;  %v2364_v36 = vrot.slane %v5046_v20, 1  ;;  %3969 = vmatprep.mubr.bf16.mxu1 %v2127_v35  ;;  %v1769_v19 = vld [vmem:[#allocation2 + $0x18] sm:$0xf]  ;;  %v6110_v53 = vld [vmem:[#allocation7 + $0x1d8] sm:$0xff]  }
 0x187   : > { %v6844_v46 = vld [vmem:[#allocation2 + $0x28] sm:$0xf]  ;;  %3970 = vmatmul.mubr.bf16.gmra.mrb[4].mxu1 %v6780_v54  ;;  %v747_v48 = vmax.f32 %v711_v37, 0.0  ;;  %v6852_v51 = vpop.f32.mrb[30].mxu0  ;;  %v1386_v55 = vrot.slane %v6796_v34, 4  ;;  %v5015_v60 = vcombine.low %v1769_v19, %v6836_v40  ;;  %v712_v54 = vadd.f32 %v6763_v16, %v6710_v29  ;;  %5628 = vmatprep.subr.bf16.mxu0 %v6110_v53 }
 0x188   : > { %v1411_v24 = vsel %vm6646_vm10, %v1403_v10, %v1410_v27  ;;  %v1693_v42 = vsel %vm6616_vm5, %v1412_v26, %v1692_v17  ;;  %v1388_v43 = vshrl.u32 %v5244_v28, 16  ;;  %v1391_v44 = vshll.u32 %v5244_v28, 16  ;;  %v1685_v57 = vld [vmem:[#allocation2 + $0x50] sm:$0x1]  ;;  %v6858_v61 = vpop.f32.mrb[31].mxu0 }
 0x189   : > { %1691 = vst [vmem:[#allocation2 + $0x58] sm:$0xf] %v1411_v24  ;;  %1694 = vst [vmem:[#allocation2 + $0x5c] sm:$0x1] %v1693_v42  ;;  %v2366_v41 = vsel %vm2360_vm12, %v2364_v36, %v2365_v21  ;;  %v783_v63 = vmin.f32 %v747_v48, 10.0  ;;  %v745_v1 = vmax.f32 %v709_v49, 0.0 }
 0x18a   : > { %v1390_v56 = vrot.slane %v1388_v43, 7  ;;  %4131 = vmatmul.mubr.bf16.gmra.mrb[40].mxu0 %v2366_v41  ;;  %v2136_v8 = vshll.u32 %v6838_v38, 16  ;;  %v1771_v34 = vld [vmem:[#allocation2 + $0x24] sm:$0xf]  ;;  %v2131_v13 = vshll.u32 %v5015_v60, 16  ;;  %v2129_v20 = vshrl.u32 %v5015_v60, 16 }
 0x18b   : > { %4138 = vmatprep.mubr.bf16.mxu0 %v6848_v47  ;;  %v6865_v15 = vcombine.low %v1771_v34, %v6844_v46  ;;  %v6867_v16 = vld [vmem:[#allocation2 + $0x2c] ss:$0 sps:$4 sm:$0x11]   ;;  %v819_v17 = vmul.f32 25.5, %v783_v63  ;;  %v781_v18 = vmin.f32 %v745_v1, 10.0  ;;  %v748_v21 = vmax.f32 %v712_v54, 0.0 }
 0x18c   : > { %v1393_v4 = vor.u32 %v1391_v44, %v1390_v56  ;;  %v1395_v10 = vrot.slane %v1390_v56, 4  ;;  %v5798_v6 = vpop.f32.mrb[32].mxu0  ;;  %v2133_v26 = vrot.slane %v2131_v13, 1  ;;  %v746_v28 = vmax.f32 %v710_v2, 0.0  ;;  %v1815_v19 = vld [vmem:[#allocation2 + $0x18] sm:$0xe] }
 0x18d   : > { %v5868_v30 = vround.rtne.f32 %v819_v17  ;;  %v817_v31 = vmul.f32 25.5, %v781_v18  ;;  %v2138_v35 = vrot.slane %v2136_v8, 1  ;;  %v784_v36 = vmin.f32 %v748_v21, 10.0  ;;  %v6873_v37 = vpop.f32.mrb[33].mxu0  ;;  %v1836_v56 = vld [vmem:[#allocation2 + $0x30] sm:$0xf] }
 0x18e   : > { %v1394_v27 = vsel %vm6646_vm10, %v1386_v55, %v1393_v4  ;;  %v1686_v23 = vsel %vm6616_vm5, %v1395_v10, %v1685_v57  ;;  %v2134_v24 = vor.u32 %v2133_v26, %v2129_v20  ;;  %v782_v42 = vmin.f32 %v746_v28, 10.0  ;;  %v5799_v41 = vpop.f32.mrb[34].mxu0  ;;  %v1837_v57 = vld [vmem:[#allocation2 + $0x34] sm:$0xf]  ;;  %v6111_v34 = vld [vmem:[#allocation7 + $0x198] sm:$0xff]  }
 0x18f   : > { %1684 = vst [vmem:[#allocation2 + $0x4c] sm:$0xf] %v1394_v27  ;;  %1687 = vst [vmem:[#allocation2 + $0x50] sm:$0x1] %v1686_v23  ;;  %v2143_v43 = vshll.u32 %v6865_v15, 16  ;;  %v2148_v44 = vshll.u32 %v6867_v16, 16  ;;  %v5866_v49 = vround.rtne.f32 %v817_v31  ;;  %v5047_v55 = vcombine.low %v1815_v19, %v6836_v40  ;;  %5629 = vmatpush3.bf16.msra.mxu0 %v6111_v34 }
 0x190   : > { %v891_v48 = vmul.f32 0.039215688, %v5868_v30  ;;  %v820_v53 = vmul.f32 25.5, %v784_v36  ;;  %v6878_v54 = vpop.f32.mrb[35].mxu0  ;;  %v2139_v63 = vsel %vm2103_vm11, %v2134_v24, %v2138_v35  ;;  %v818_v1 = vmul.f32 25.5, %v782_v42  ;;  %v6112_v26 = vld [vmem:[#allocation7 + $0x178] sm:$0xff]  }
 0x191   : > { %v2141_v8 = vshrl.u32 %v6865_v15, 16  ;;  %v2145_v2 = vrot.slane %v2143_v43, 1  ;;  %v889_v10 = vmul.f32 0.039215688, %v5866_v49  ;;  %3977 = vmatprep.mubr.bf16.mxu1 %v2139_v63  ;;  %v2367_v6 = vrot.slane %v5047_v55, 1  ;;  %v6113_v28 = vld [vmem:[#allocation7 + $0x138] sm:$0xff]   ;;  %5524 = vmatprep.subr.bf16.mxu1 %v6112_v26 }
 0x192   : > { %v5249_v4 = vpack.c.bf16 %v891_v48, %v891_v48  ;;  %v5869_v13 = vround.rtne.f32 %v820_v53  ;;  %v1773_v17 = vld [vmem:[#allocation2 + $0x30] sm:$0xf]  ;;  %v6882_v18 = vld [vmem:[#allocation2 + $0x38] ss:$0 sps:$4 sm:$0x11]   ;;  %3978 = vmatmul.mubr.bf16.gmra.mrb[8].mxu1 %v5015_v60  ;;  %v5867_v40 = vround.rtne.f32 %v818_v1  ;;  %v2150_v21 = vrot.slane %v2148_v44, 1 }
 0x193   : > { %v2146_v20 = vor.u32 %v2145_v2, %v2141_v8  ;;  %v2368_v27 = vrot.slane %v6838_v38, 1  ;;  %v6885_v23 = vld [vmem:[#allocation2 + $0x34] sm:$0xf]  ;;  %v5247_v35 = vpack.c.bf16 %v889_v10, %v889_v10  ;;  %v6117_v24 = vld [vmem:[#allocation7 + $0x1e0] sm:$0xff]   ;;  %v6889_v19 = vcombine.low %v1836_v56, %v1837_v57  ;;  %v1695_v63 = vld [vmem:[#allocation2 + $0x60] sm:$0xf]  ;;  %5525 = vmatpush3.bf16.msra.mxu1 %v6113_v28 }
 0x194   : > { %v1431_v30 = vshrl.u32 %v5249_v4, 16  ;;  %v1434_v31 = vshll.u32 %v5249_v4, 16  ;;  %v892_v36 = vmul.f32 0.039215688, %v5869_v13  ;;  %v890_v42 = vmul.f32 0.039215688, %v5867_v40  ;;  %5630 = vmatprep.subr.bf16.mxu0 %v6117_v24 }
 0x195   : > { %v2151_v43 = vsel %vm2103_vm11, %v2146_v20, %v2150_v21  ;;  %v2369_v60 = vsel %vm2360_vm12, %v2367_v6, %v2368_v27  ;;  %v6118_v44 = vld [vmem:[#allocation7 + $0x1a0] sm:$0xff]   ;;  %v1414_v48 = vshrl.u32 %v5247_v35, 16  ;;  %v1417_v49 = vshll.u32 %v5247_v35, 16  ;;  %v6119_v55 = vld [vmem:[#allocation7 + $0x1e8] sm:$0xff]   ;;  %v1816_v10 = vld [vmem:[#allocation2 + $0x24] sm:$0xe] }
 0x196   : > { %v1433_v38 = vrot.slane %v1431_v30, 7  ;;  %v1702_v41 = vld [vmem:[#allocation2 + $0x6c] sm:$0xf]  ;;  %v5250_v53 = vpack.c.bf16 %v892_v36, %v892_v36  ;;  %3985 = vmatprep.mubr.bf16.mxu1 %v2151_v43  ;;  %4139 = vmatmul.mubr.bf16.gmra.mrb[44].mxu0 %v2369_v60  ;;  %v5248_v1 = vpack.c.bf16 %v890_v42, %v890_v42  ;;  %v6893_v8 = vcombine.low %v1773_v17, %v6885_v23  ;;  %v1706_v6 = vld [vmem:[#allocation2 + $0x74] sm:$0x1]  ;;  %v6125_v42 = vld [vmem:[#allocation7 + $0x1f0] sm:$0xff]  }
 0x197   : > { %4146 = vmatprep.mubr.bf16.mxu0 %v6889_v19  ;;  %v2160_v56 = vshll.u32 %v6882_v18, 16  ;;  %v1416_v34 = vrot.slane %v1414_v48, 7  ;;  %v1838_v27 = vld [vmem:[#allocation2 + $0x3c] sm:$0xf]  ;;  %5631 = vmatpush3.bf16.msra.mxu0 %v6118_v44  ;;  %v6120_v26 = vld [vmem:[#allocation7 + $0x1a8] sm:$0xff]   ;;  %v5048_v44 = vcombine.low %v1816_v10, %v6844_v46 }
 0x198   : > { %v1436_v57 = vor.u32 %v1434_v31, %v1433_v38  ;;  %v1437_v2 = vrot.slane %v1433_v38, 4  ;;  %v1439_v4 = vshrl.u32 %v5250_v53, 16  ;;  %v1442_v13 = vshll.u32 %v5250_v53, 16  ;;  %v1699_v35 = vld [vmem:[#allocation2 + $0x68] sm:$0x1]  ;;  %5632 = vmatprep.subr.bf16.mxu0 %v6119_v55  ;;  %v6126_v55 = vld [vmem:[#allocation7 + $0x1b0] sm:$0xff]  }
 0x199   : > { %v1422_v40 = vshrl.u32 %v5248_v1, 16  ;;  %v1425_v20 = vshll.u32 %v5248_v1, 16  ;;  %v2153_v21 = vshrl.u32 %v6893_v8, 16  ;;  %v1419_v30 = vor.u32 %v1417_v49, %v1416_v34  ;;  %v1839_v36 = vld [vmem:[#allocation2 + $0x40] sm:$0xf] }
 0x19a   : > { %v1703_v17 = vsel %vm6637_vm9, %v1436_v57, %v1702_v41  ;;  %v1420_v28 = vrot.slane %v1416_v34, 4  ;;  %v1441_v31 = vrot.slane %v1439_v4, 7  ;;  %3986 = vmatmul.mubr.bf16.gmra.mrb[12].mxu1 %v6865_v15  ;;  %v2155_v43 = vshll.u32 %v6893_v8, 16  ;;  %v6905_v53 = vld [vmem:[#allocation2 + $0x44] ss:$0 sps:$4 sm:$0x11]  }
 0x19b   : > { %1704 = vst [vmem:[#allocation2 + $0x6c] sm:$0xf] %v1703_v17  ;;  %v1424_v24 = vrot.slane %v1422_v40, 7  ;;  %v2162_v60 = vrot.slane %v2160_v56, 1  ;;  %v1696_v38 = vsel %vm6637_vm9, %v1419_v30, %v1695_v63  ;;  %v2371_v49 = vrot.slane %v6867_v16, 1  ;;  %5633 = vmatpush3.bf16.msra.mxu0 %v6120_v26  ;;  %v6131_v4 = vld [vmem:[#allocation7 + $0x200] sm:$0xff]  }
 0x19c   : > { %v1444_v41 = vor.u32 %v1442_v13, %v1441_v31  ;;  %v1446_v48 = vrot.slane %v1441_v31, 4  ;;  %1697 = vst [vmem:[#allocation2 + $0x60] sm:$0xf] %v1696_v38  ;;  %v2157_v34 = vrot.slane %v2155_v43, 1  ;;  %v2370_v15 = vrot.slane %v5048_v44, 1  ;;  %5634 = vmatprep.subr.bf16.mxu0 %v6125_v42  ;;  %v6129_v13 = vld [vmem:[#allocation7 + $0x1f8] sm:$0xff]   ;;  %5800 = vmatprep.subr.bf16.mxu1 %v6131_v4 }
 0x19d   : > { %v1427_v1 = vor.u32 %v1425_v20, %v1424_v24  ;;  %v1429_v57 = vrot.slane %v1424_v24, 4  ;;  %v6911_v56 = vcombine.low %v1838_v27, %v1839_v36  ;;  %v1775_v10 = vld [vmem:[#allocation2 + $0x3c] sm:$0xf]  ;;  %v6913_v16 = vld [vmem:[#allocation2 + $0x40] sm:$0xf]  ;;  %v713_v27 = vadd.f32 %v6710_v29, %v6786_v12  ;;  %v6130_v36 = vld [vmem:[#allocation7 + $0x1b8] sm:$0xff]  }
 0x19e   : > { %v1445_v46 = vsel %vm6646_vm10, %v1437_v2, %v1444_v41  ;;  %v1707_v63 = vsel %vm6616_vm5, %v1446_v48, %v1706_v6  ;;  %v2158_v26 = vor.u32 %v2157_v34, %v2153_v21  ;;  %v2372_v2 = vsel %vm2360_vm12, %v2370_v15, %v2371_v49  ;;  %v1817_v17 = vld [vmem:[#allocation2 + $0x30] sm:$0xe]  ;;  %v6937_v15 = vld [vmem:[#allocation2 + $0x4c] sm:$0xf] }
 0x19f   : > { %1705 = vst [vmem:[#allocation2 + $0x70] sm:$0xf] %v1445_v46  ;;  %1708 = vst [vmem:[#allocation2 + $0x74] sm:$0x1] %v1707_v63  ;;  %v1428_v40 = vsel %vm6646_vm10, %v1420_v28, %v1427_v1  ;;  %v1700_v20 = vsel %vm6616_vm5, %v1429_v57, %v1699_v35  ;;  %4147 = vmatmul.mubr.bf16.gmra.mrb[48].mxu0 %v2372_v2  ;;  %v715_v6 = vadd.f32 %v6782_v3, %v6710_v29  ;;  %v1818_v63 = vld [vmem:[#allocation2 + $0x3c] sm:$0xe] }
 0x1a0   : > { %1698 = vst [vmem:[#allocation2 + $0x64] sm:$0xf] %v1428_v40  ;;  %1701 = vst [vmem:[#allocation2 + $0x68] sm:$0x1] %v1700_v20  ;;  %v716_v30 = vadd.f32 %v6799_v52, %v6710_v29  ;;  %v2163_v28 = vsel %vm2103_vm11, %v2158_v26, %v2162_v60  ;;  %4154 = vmatprep.mubr.bf16.mxu0 %v6911_v56  ;;  %v714_v21 = vadd.f32 %v6710_v29, %v6805_v45  ;;  %v1840_v52 = vld [vmem:[#allocation2 + $0x48] sm:$0xf] }
 0x1a1   : > { %v5018_v31 = vcombine.low %v1775_v10, %v6913_v16  ;;  %v2172_v35 = vshll.u32 %v6905_v53, 16  ;;  %5635 = vmatpush3.bf16.msra.mxu0 %v6126_v55  ;;  %3993 = vmatprep.mubr.bf16.mxu1 %v2163_v28  ;;  %v751_v3 = vmax.f32 %v715_v6, 0.0  ;;  %v749_v42 = vmax.f32 %v713_v27, 0.0  ;;  %v1777_v29 = vld [vmem:[#allocation2 + $0x48] sm:$0xf] }
 0x1a2   : > { %v752_v12 = vmax.f32 %v716_v30, 0.0  ;;  %v5049_v24 = vcombine.low %v1817_v17, %v6885_v23  ;;  %5636 = vmatprep.subr.bf16.mxu0 %v6129_v13  ;;  %3994 = vmatmul.mubr.bf16.gmra.mrb[16].mxu1 %v6893_v8  ;;  %v750_v43 = vmax.f32 %v714_v21, 0.0  ;;  %v6934_v45 = vld [vmem:[#allocation2 + $0x50] ss:$0 sps:$4 sm:$0x11]   ;;  %v2374_v23 = vrot.slane %v6882_v18, 1 }
 0x1a3   : > { %v2165_v60 = vshrl.u32 %v5018_v31, 16  ;;  %v2167_v44 = vshll.u32 %v5018_v31, 16  ;;  %v787_v38 = vmin.f32 %v751_v3, 10.0  ;;  %v785_v41 = vmin.f32 %v749_v42, 10.0  ;;  %v1841_v55 = vld [vmem:[#allocation2 + $0x4c] sm:$0xf] }
 0x1a4   : > { %v788_v48 = vmin.f32 %v752_v12, 10.0  ;;  %v2373_v49 = vrot.slane %v5049_v24, 1  ;;  %v786_v1 = vmin.f32 %v750_v43, 10.0  ;;  %v2174_v34 = vrot.slane %v2172_v35, 1  ;;  %v1842_v18 = vld [vmem:[#allocation2 + $0x54] sm:$0xf] }
 0x1a5   : > { %v2169_v57 = vrot.slane %v2167_v44, 1  ;;  %5637 = vmatpush3.bf16.msra.mxu0 %v6130_v36  ;;  %v823_v8 = vmul.f32 25.5, %v787_v38  ;;  %v821_v4 = vmul.f32 25.5, %v785_v41  ;;  %v6940_v20 = vcombine.low %v1840_v52, %v1841_v55  ;;  %v1843_v27 = vld [vmem:[#allocation2 + $0x58] sm:$0xf] }
 0x1a6   : > { %v824_v46 = vmul.f32 25.5, %v788_v48  ;;  %v822_v10 = vmul.f32 25.5, %v786_v1  ;;  %v2375_v40 = vsel %vm2360_vm12, %v2373_v49, %v2374_v23  ;;  %v6943_v6 = vcombine.low %v1777_v29, %v6937_v15  ;;  %v1709_v23 = vld [vmem:[#allocation2 + $0x78] sm:$0xf]  ;;  %v6210_v11 = vld [vmem:[#allocation2 + $0x70] sm:$0xf] }
 0x1a7   : > { %v2170_v13 = vor.u32 %v2169_v57, %v2165_v60  ;;  %v5872_v26 = vround.rtne.f32 %v823_v8  ;;  %v5870_v2 = vround.rtne.f32 %v821_v4  ;;  %4155 = vmatmul.mubr.bf16.gmra.mrb[52].mxu0 %v2375_v40  ;;  %v2184_v21 = vshll.u32 %v6934_v45, 16 }
 0x1a8   : > { %v5873_v17 = vround.rtne.f32 %v824_v46  ;;  %v5871_v30 = vround.rtne.f32 %v822_v10  ;;  %4162 = vmatprep.mubr.bf16.mxu0 %v6940_v20  ;;  %v5050_v35 = vcombine.low %v1818_v63, %v6913_v16  ;;  %v2177_v24 = vshrl.u32 %v6943_v6, 16 }
 0x1a9   : > { %v2175_v28 = vsel %vm2103_vm11, %v2170_v13, %v2174_v34  ;;  %v895_v36 = vmul.f32 0.039215688, %v5872_v26  ;;  %v893_v3 = vmul.f32 0.039215688, %v5870_v2  ;;  %v2179_v52 = vshll.u32 %v6943_v6, 16 }
 0x1aa   : > { %v896_v42 = vmul.f32 0.039215688, %v5873_v17  ;;  %4001 = vmatprep.mubr.bf16.mxu1 %v2175_v28  ;;  %v894_v12 = vmul.f32 0.039215688, %v5871_v30  ;;  %v6951_v43 = vcombine.low %v1842_v18, %v1843_v27  ;;  %v2376_v38 = vrot.slane %v5050_v35, 1 }
 0x1ab   : > { %4002 = vmatmul.mubr.bf16.gmra.mrb[20].mxu1 %v5018_v31  ;;  %v5253_v60 = vpack.c.bf16 %v895_v36, %v895_v36  ;;  %v5251_v44 = vpack.c.bf16 %v893_v3, %v893_v3  ;;  %v2181_v48 = vrot.slane %v2179_v52, 1  ;;  %v2186_v49 = vrot.slane %v2184_v21, 1  ;;  %v1716_v31 = vld [vmem:[#allocation2 + $0x84] sm:$0xf]  ;;  %v1720_v17 = vld [vmem:[#allocation2 + $0x8c] sm:$0x1] }
 0x1ac   : > { %v5254_v29 = vpack.c.bf16 %v896_v42, %v896_v42  ;;  %v5252_v41 = vpack.c.bf16 %v894_v12, %v894_v12  ;;  %v2377_v16 = vrot.slane %v6905_v53, 1  ;;  %v1713_v27 = vld [vmem:[#allocation2 + $0x80] sm:$0x1]  ;;  %v1779_v3 = vld [vmem:[#allocation2 + $0x54] sm:$0xf] }
 0x1ad   : > { %v1465_v55 = vshrl.u32 %v5253_v60, 16  ;;  %v1468_v1 = vshll.u32 %v5253_v60, 16  ;;  %v1448_v57 = vshrl.u32 %v5251_v44, 16  ;;  %v1451_v34 = vshll.u32 %v5251_v44, 16  ;;  %v6958_v53 = vld [vmem:[%s7893_s2] ss:$0 sm:$0xff] }
 0x1ae   : > { %v1473_v8 = vshrl.u32 %v5254_v29, 16  ;;  %v1476_v4 = vshll.u32 %v5254_v29, 16  ;;  %v1456_v46 = vshrl.u32 %v5252_v41, 16  ;;  %v1459_v63 = vshll.u32 %v5252_v41, 16  ;;  %v1819_v42 = vld [vmem:[#allocation2 + $0x48] sm:$0xe] }
 0x1af   : > { %v1467_v10 = vrot.slane %v1465_v55, 7  ;;  %v1450_v13 = vrot.slane %v1448_v57, 7  ;;  %v2182_v40 = vor.u32 %v2181_v48, %v2177_v24  ;;  %v2378_v26 = vsel %vm2360_vm12, %v2376_v38, %v2377_v16  ;;  %v6963_v44 = vld [vmem:[#allocation2 + $0x5c] ss:$0 sps:$4 sm:$0x11]  }
 0x1b0   : > { %v1475_v2 = vrot.slane %v1473_v8, 7  ;;  %v1458_v18 = vrot.slane %v1456_v46, 7  ;;  %4163 = vmatmul.mubr.bf16.gmra.mrb[56].mxu0 %v2378_v26  ;;  %v719_v30 = vadd.f32 %v6958_v53, %v6810_v50  ;;  %v6970_v48 = vld [vmem:[#allocation2 + $0x58] sm:$0xf]  ;;  %v1844_v8 = vld [vmem:[#allocation2 + $0x60] sm:$0xf] }
 0x1b1   : > { %v1470_v28 = vor.u32 %v1468_v1, %v1467_v10  ;;  %v1471_v21 = vrot.slane %v1467_v10, 4  ;;  %v1453_v35 = vor.u32 %v1451_v34, %v1450_v13  ;;  %v1454_v36 = vrot.slane %v1450_v13, 4  ;;  %4170 = vmatprep.mubr.bf16.mxu0 %v6951_v43 }
 0x1b2   : > { %v1478_v12 = vor.u32 %v1476_v4, %v1475_v2  ;;  %v1480_v24 = vrot.slane %v1475_v2, 4  ;;  %v1461_v52 = vor.u32 %v1459_v63, %v1458_v18  ;;  %v1463_v60 = vrot.slane %v1458_v18, 4  ;;  %v1845_v2 = vld [vmem:[#allocation2 + $0x64] sm:$0xf] }
 0x1b3   : > { %v1717_v29 = vsel %vm6637_vm9, %v1470_v28, %v1716_v31  ;;  %v1710_v50 = vsel %vm6637_vm9, %v1453_v35, %v1709_v23  ;;  %v2187_v38 = vsel %vm2103_vm11, %v2182_v40, %v2186_v49  ;;  %v755_v41 = vmax.f32 %v719_v30, 0.0  ;;  %v6993_v35 = vld [vmem:[#allocation2 + $0x64] sm:$0xf] }
 0x1b4   : > { %1718 = vst [vmem:[#allocation2 + $0x84] sm:$0xf] %v1717_v29  ;;  %1711 = vst [vmem:[#allocation2 + $0x78] sm:$0xf] %v1710_v50  ;;  %v1479_v16 = vsel %vm6646_vm10, %v1471_v21, %v1478_v12  ;;  %v1721_v55 = vsel %vm6616_vm5, %v1480_v24, %v1720_v17  ;;  %v1462_v1 = vsel %vm6646_vm10, %v1454_v36, %v1461_v52  ;;  %4009 = vmatprep.mubr.bf16.mxu1 %v2187_v38 }
 0x1b5   : > { %v1714_v57 = vsel %vm6616_vm5, %v1463_v60, %v1713_v27  ;;  %1719 = vst [vmem:[#allocation2 + $0x88] sm:$0xf] %v1479_v16  ;;  %1722 = vst [vmem:[#allocation2 + $0x8c] sm:$0x1] %v1721_v55  ;;  %v791_v49 = vmin.f32 %v755_v41, 10.0  ;;  %v717_v34 = vadd.f32 %v6958_v53, %v6812_v58  ;;  %v720_v31 = vadd.f32 %v6958_v53, %v6821_v9 }
 0x1b6   : > { %1712 = vst [vmem:[#allocation2 + $0x7c] sm:$0xf] %v1462_v1  ;;  %1715 = vst [vmem:[#allocation2 + $0x80] sm:$0x1] %v1714_v57  ;;  %4010 = vmatmul.mubr.bf16.gmra.mrb[24].mxu1 %v6943_v6  ;;  %v718_v23 = vadd.f32 %v6958_v53, %v6824_v14  ;;  %v5020_v4 = vcombine.low %v1779_v3, %v6970_v48  ;;  %v2196_v46 = vshll.u32 %v6963_v44, 16  ;;  %v2380_v10 = vrot.slane %v6934_v45, 1 }
 0x1b7   : > { %v5051_v63 = vcombine.low %v1819_v42, %v6937_v15  ;;  %v827_v13 = vmul.f32 25.5, %v791_v49  ;;  %v753_v40 = vmax.f32 %v717_v34, 0.0  ;;  %v756_v58 = vmax.f32 %v720_v31, 0.0  ;;  %v1781_v9 = vld [vmem:[#allocation2 + $0x60] sm:$0xf] }
 0x1b8   : > { %v754_v26 = vmax.f32 %v718_v23, 0.0  ;;  %v2189_v17 = vshrl.u32 %v5020_v4, 16  ;;  %v2191_v6 = vshll.u32 %v5020_v4, 16  ;;  %v6991_v27 = vld [vmem:[#allocation2 + $0x68] ss:$0 sps:$4 sm:$0x11]   ;;  %v6996_v3 = vcombine.low %v1844_v8, %v1845_v2 }
 0x1b9   : > { %v2379_v18 = vrot.slane %v5051_v63, 1  ;;  %v5876_v14 = vround.rtne.f32 %v827_v13  ;;  %v789_v30 = vmin.f32 %v753_v40, 10.0  ;;  %v792_v28 = vmin.f32 %v756_v58, 10.0  ;;  %v1820_v1 = vld [vmem:[#allocation2 + $0x54] sm:$0xe] }
 0x1ba   : > { %v790_v21 = vmin.f32 %v754_v26, 10.0  ;;  %v2193_v15 = vrot.slane %v2191_v6, 1  ;;  %v2198_v36 = vrot.slane %v2196_v46, 1  ;;  %v7000_v29 = vcombine.low %v1781_v9, %v6993_v35  ;;  %v1846_v31 = vld [vmem:[#allocation2 + $0x6c] sm:$0xf] }
 0x1bb   : > { %v2381_v45 = vsel %vm2360_vm12, %v2379_v18, %v2380_v10  ;;  %v899_v42 = vmul.f32 0.039215688, %v5876_v14  ;;  %v825_v12 = vmul.f32 25.5, %v789_v30  ;;  %v828_v24 = vmul.f32 25.5, %v792_v28  ;;  %v1847_v26 = vld [vmem:[#allocation2 + $0x70] sm:$0xf] }
 0x1bc   : > { %v826_v52 = vmul.f32 25.5, %v790_v21  ;;  %4171 = vmatmul.mubr.bf16.gmra.mrb[60].mxu0 %v2381_v45  ;;  %v2194_v60 = vor.u32 %v2193_v15, %v2189_v17  ;;  %v2208_v50 = vshll.u32 %v6991_v27, 16  ;;  %v2201_v49 = vshrl.u32 %v7000_v29, 16  ;;  %v1730_v18 = vld [vmem:[#allocation2 + $0x9c] sm:$0xf] }
 0x1bd   : > { %4178 = vmatprep.mubr.bf16.mxu0 %v6996_v3  ;;  %v5257_v38 = vpack.c.bf16 %v899_v42, %v899_v42  ;;  %v5874_v41 = vround.rtne.f32 %v825_v12  ;;  %v5877_v16 = vround.rtne.f32 %v828_v24  ;;  %v2203_v34 = vshll.u32 %v7000_v29, 16  ;;  %v1723_v42 = vld [vmem:[#allocation2 + $0x90] sm:$0xf] }
 0x1be   : > { %v5875_v55 = vround.rtne.f32 %v826_v52  ;;  %v2199_v57 = vsel %vm2103_vm11, %v2194_v60, %v2198_v36  ;;  %v2210_v40 = vrot.slane %v2208_v50, 1  ;;  %v5052_v58 = vcombine.low %v1820_v1, %v6970_v48 }
 0x1bf   : > { %v1499_v23 = vshrl.u32 %v5257_v38, 16  ;;  %v1502_v8 = vshll.u32 %v5257_v38, 16  ;;  %v897_v46 = vmul.f32 0.039215688, %v5874_v41  ;;  %v900_v63 = vmul.f32 0.039215688, %v5877_v16  ;;  %4017 = vmatprep.mubr.bf16.mxu1 %v2199_v57 }
 0x1c0   : > { %v898_v10 = vmul.f32 0.039215688, %v5875_v55  ;;  %4018 = vmatmul.mubr.bf16.gmra.mrb[28].mxu1 %v5020_v4  ;;  %v2205_v13 = vrot.slane %v2203_v34, 1  ;;  %v2383_v6 = vrot.slane %v6963_v44, 1  ;;  %v2382_v28 = vrot.slane %v5052_v58, 1 }
 0x1c1   : > { %v1501_v2 = vrot.slane %v1499_v23, 7  ;;  %v5255_v9 = vpack.c.bf16 %v897_v46, %v897_v46  ;;  %v5258_v17 = vpack.c.bf16 %v900_v63, %v900_v63  ;;  %v7008_v45 = vcombine.low %v1846_v31, %v1847_v26  ;;  %v1099_v4 = vld [vmem:[#allocation2 + $0xa8] sm:$0x1]  ;;  %v1734_v44 = vld [vmem:[#allocation2 + $0xa4] sm:$0x1] }
 0x1c2   : > { %v5256_v14 = vpack.c.bf16 %v898_v10, %v898_v10  ;;  %v2206_v30 = vor.u32 %v2205_v13, %v2201_v49  ;;  %v1727_v38 = vld [vmem:[#allocation2 + $0x98] sm:$0x1]  ;;  %v2384_v16 = vsel %vm2360_vm12, %v2382_v28, %v2383_v6  ;;  %v723_v49 = vadd.f32 %v6958_v53, %v6829_v22  ;;  %v1158_v34 = vld [vmem:[#allocation2 + $0xbc] sm:$0x1]  ;;  %v1155_v22 = vld [vmem:[#allocation2 + $0xb0] sm:$0x1] }
 0x1c3   : > { %v1504_v21 = vor.u32 %v1502_v8, %v1501_v2  ;;  %v1482_v15 = vshrl.u32 %v5255_v9, 16  ;;  %v1485_v36 = vshll.u32 %v5255_v9, 16  ;;  %v1507_v12 = vshrl.u32 %v5258_v17, 16  ;;  %v7021_v63 = vld [vmem:[#allocation2 + $0x74] ss:$0 sps:$4 sm:$0x11]  }
 0x1c4   : > { %v1510_v24 = vshll.u32 %v5258_v17, 16  ;;  %v1490_v48 = vshrl.u32 %v5256_v14, 16  ;;  %v1493_v52 = vshll.u32 %v5256_v14, 16  ;;  %v2211_v41 = vsel %vm2103_vm11, %v2206_v30, %v2210_v40  ;;  %4179 = vmatmul.mubr.bf16.gmra.mrb[64].mxu0 %v2384_v16  ;;  %v1783_v17 = vld [vmem:[#allocation2 + $0x6c] sm:$0xf] }
 0x1c5   : > { %v1731_v60 = vsel %vm6637_vm9, %v1504_v21, %v1730_v18  ;;  %v1484_v50 = vrot.slane %v1482_v15, 7  ;;  %v1505_v55 = vrot.slane %v1501_v2, 4  ;;  %v1509_v1 = vrot.slane %v1507_v12, 7  ;;  %4025 = vmatprep.mubr.bf16.mxu1 %v2211_v41  ;;  %4186 = vmatprep.mubr.bf16.mxu0 %v7008_v45  ;;  %v7028_v6 = vld [vmem:[#allocation2 + $0x70] sm:$0xf] }
 0x1c6   : > { %1732 = vst [vmem:[#allocation2 + $0x9c] sm:$0xf] %v1731_v60  ;;  %v1492_v57 = vrot.slane %v1490_v48, 7  ;;  %v721_v8 = vadd.f32 %v6958_v53, %v6831_v32  ;;  %v1100_v46 = vsel %vm6616_vm5, 0, %v1099_v4  ;;  %v759_v2 = vmax.f32 %v723_v49, 0.0 }
 0x1c7   : > { %v1487_v31 = vor.u32 %v1485_v36, %v1484_v50  ;;  %v1488_v23 = vrot.slane %v1484_v50, 4  ;;  %v1512_v10 = vor.u32 %v1510_v24, %v1509_v1  ;;  %v1514_v13 = vrot.slane %v1509_v1, 4  ;;  %1101 = vst [vmem:[#allocation2 + $0xa8] sm:$0x1] %v1100_v46  ;;  %v1821_v28 = vld [vmem:[#allocation2 + $0x60] sm:$0xe] }
 0x1c8   : > { %v1495_v40 = vor.u32 %v1493_v52, %v1492_v57  ;;  %v1497_v58 = vrot.slane %v1492_v57, 4  ;;  %4026 = vmatmul.mubr.bf16.gmra.mrb[32].mxu1 %v7000_v29  ;;  %v757_v9 = vmax.f32 %v721_v8, 0.0  ;;  %v724_v32 = vadd.f32 %v6958_v53, %v6852_v51 }
 0x1c9   : > { %v1724_v26 = vsel %vm6637_vm9, %v1487_v31, %v1723_v42  ;;  %v1513_v18 = vsel %vm6646_vm10, %v1505_v55, %v1512_v10  ;;  %v1735_v14 = vsel %vm6616_vm5, %v1514_v13, %v1734_v44  ;;  %v795_v51 = vmin.f32 %v759_v2, 10.0  ;;  %v1848_v44 = vld [vmem:[#allocation2 + $0x78] sm:$0xf]  ;;  %v7049_v31 = vld [vmem:[#allocation2 + $0x80] ss:$0 sps:$4 sm:$0x11]  }
 0x1ca   : > { %1725 = vst [vmem:[#allocation2 + $0x90] sm:$0xf] %v1724_v26  ;;  %v1496_v29 = vsel %vm6646_vm10, %v1488_v23, %v1495_v40  ;;  %v1728_v30 = vsel %vm6616_vm5, %v1497_v58, %v1727_v38  ;;  %1733 = vst [vmem:[#allocation2 + $0xa0] sm:$0xf] %v1513_v18  ;;  %v793_v21 = vmin.f32 %v757_v9, 10.0  ;;  %v760_v15 = vmax.f32 %v724_v32, 0.0 }
 0x1cb   : > { %1736 = vst [vmem:[#allocation2 + $0xa4] sm:$0x1] %v1735_v14  ;;  %1726 = vst [vmem:[#allocation2 + $0x94] sm:$0xf] %v1496_v29  ;;  %v1159_v36 = vsel %vm6624_vm6, 0, %v1158_v34  ;;  %v722_v4 = vadd.f32 %v6958_v53, %v6858_v61  ;;  %v1156_v42 = vsel %vm6624_vm6, 0, %v1155_v22  ;;  %v5022_v12 = vcombine.low %v1783_v17, %v7028_v6 }
 0x1cc   : > { %1729 = vst [vmem:[#allocation2 + $0x98] sm:$0x1] %v1728_v30  ;;  %1160 = vst [vmem:[#allocation2 + $0xbc] sm:$0x1] %v1159_v36  ;;  %v2220_v24 = vshll.u32 %v7021_v63, 16  ;;  %v831_v48 = vmul.f32 25.5, %v795_v51  ;;  %v5053_v50 = vcombine.low %v1821_v28, %v6993_v35 }
 0x1cd   : > { %v829_v52 = vmul.f32 25.5, %v793_v21  ;;  %v796_v60 = vmin.f32 %v760_v15, 10.0  ;;  %1157 = vst [vmem:[#allocation2 + $0xb0] sm:$0x1] %v1156_v42  ;;  %v7047_v38 = vld [vmem:[#allocation2 + $0x7c] sm:$0xf] }
 0x1ce   : > { %v758_v41 = vmax.f32 %v722_v4, 0.0  ;;  %v2213_v16 = vshrl.u32 %v5022_v12, 16  ;;  %v2215_v55 = vshll.u32 %v5022_v12, 16  ;;  %v1785_v61 = vld [vmem:[#allocation2 + $0x78] sm:$0xf]  ;;  %v5880_v1 = vround.rtne.f32 %v831_v48 }
 0x1cf   : > { %v5878_v57 = vround.rtne.f32 %v829_v52  ;;  %v832_v49 = vmul.f32 25.5, %v796_v60  ;;  %v2385_v34 = vrot.slane %v5053_v50, 1  ;;  %v2222_v46 = vrot.slane %v2220_v24, 1  ;;  %v7052_v13 = vld [vmem:[#allocation2 + $0x7c] sm:$0xf] }
 0x1d0   : > { %v794_v23 = vmin.f32 %v758_v41, 10.0  ;;  %v2217_v8 = vrot.slane %v2215_v55, 1  ;;  %v2386_v10 = vrot.slane %v6991_v27, 1  ;;  %v903_v35 = vmul.f32 0.039215688, %v5880_v1 }
 0x1d1   : > { %v901_v40 = vmul.f32 0.039215688, %v5878_v57  ;;  %v5881_v58 = vround.rtne.f32 %v832_v49  ;;  %v1822_v22 = vld [vmem:[#allocation2 + $0x6c] sm:$0xe]  ;;  %v7056_v32 = vcombine.low %v1848_v44, %v7047_v38  ;;  %v5023_v29 = vcombine.low %v1785_v61, %v7052_v13  ;;  %v1744_v50 = vld [vmem:[#allocation2 + $0xb4] sm:$0xf] }
 0x1d2   : > { %v830_v26 = vmul.f32 25.5, %v794_v23  ;;  %v2218_v2 = vor.u32 %v2217_v8, %v2213_v16  ;;  %v2387_v9 = vsel %vm2360_vm12, %v2385_v34, %v2386_v10  ;;  %v5261_v17 = vpack.c.bf16 %v903_v35, %v903_v35  ;;  %v1737_v16 = vld [vmem:[#allocation2 + $0xa8] sm:$0xf]  ;;  %v1787_v34 = vld [vmem:[#allocation2 + $0x84] sm:$0xf] }
 0x1d3   : > { %v5259_v18 = vpack.c.bf16 %v901_v40, %v901_v40  ;;  %v904_v14 = vmul.f32 0.039215688, %v5881_v58  ;;  %4187 = vmatmul.mubr.bf16.gmra.mrb[68].mxu0 %v2387_v9  ;;  %v2232_v28 = vshll.u32 %v7049_v31, 16  ;;  %v5054_v51 = vcombine.low %v1822_v22, %v7028_v6  ;;  %v1850_v6 = vld [vmem:[#allocation2 + $0x84] sm:$0xf] }
 0x1d4   : > { %v5879_v27 = vround.rtne.f32 %v830_v26  ;;  %v2223_v30 = vsel %vm2103_vm11, %v2218_v2, %v2222_v46  ;;  %4194 = vmatprep.mubr.bf16.mxu0 %v7056_v32  ;;  %v1533_v21 = vshrl.u32 %v5261_v17, 16  ;;  %v1536_v15 = vshll.u32 %v5261_v17, 16  ;;  %v1851_v49 = vld [vmem:[#allocation2 + $0x88] sm:$0xf] }
 0x1d5   : > { %v1516_v36 = vshrl.u32 %v5259_v18, 16  ;;  %v1519_v4 = vshll.u32 %v5259_v18, 16  ;;  %4033 = vmatprep.mubr.bf16.mxu1 %v2223_v30  ;;  %v5262_v42 = vpack.c.bf16 %v904_v14, %v904_v14  ;;  %v2225_v48 = vshrl.u32 %v5023_v29, 16  ;;  %v7063_v35 = vld [vmem:[#allocation2 + $0x88] sm:$0xf] }
 0x1d6   : > { %v902_v24 = vmul.f32 0.039215688, %v5879_v27  ;;  %4034 = vmatmul.mubr.bf16.gmra.mrb[36].mxu1 %v5022_v12  ;;  %v2227_v52 = vshll.u32 %v5023_v29, 16  ;;  %v1535_v60 = vrot.slane %v1533_v21, 7  ;;  %v2234_v41 = vrot.slane %v2232_v28, 1 }
 0x1d7   : > { %v1518_v44 = vrot.slane %v1516_v36, 7  ;;  %v1541_v55 = vshrl.u32 %v5262_v42, 16  ;;  %v1544_v61 = vshll.u32 %v5262_v42, 16  ;;  %v2388_v10 = vrot.slane %v5054_v51, 1  ;;  %v1748_v18 = vld [vmem:[#allocation2 + $0xbc] sm:$0x1] }
 0x1d8   : > { %v5260_v1 = vpack.c.bf16 %v902_v24, %v902_v24  ;;  %v2229_v57 = vrot.slane %v2227_v52, 1  ;;  %v1538_v23 = vor.u32 %v1536_v15, %v1535_v60  ;;  %v1539_v8 = vrot.slane %v1535_v60, 4  ;;  %v7065_v26 = vld [vmem:[#allocation2 + $0x8c] ss:$0 sps:$4 sm:$0x11]  }
 0x1d9   : > { %v1521_v46 = vor.u32 %v1519_v4, %v1518_v44  ;;  %v1543_v12 = vrot.slane %v1541_v55, 7  ;;  %v1522_v9 = vrot.slane %v1518_v44, 4  ;;  %v2389_v14 = vrot.slane %v7021_v63, 1  ;;  %v1823_v27 = vld [vmem:[#allocation2 + $0x78] sm:$0xe] }
 0x1da   : > { %v1524_v40 = vshrl.u32 %v5260_v1, 16  ;;  %v1527_v58 = vshll.u32 %v5260_v1, 16  ;;  %v2230_v22 = vor.u32 %v2229_v57, %v2225_v48  ;;  %v1745_v2 = vsel %vm6637_vm9, %v1538_v23, %v1744_v50  ;;  %v1741_v15 = vld [vmem:[#allocation2 + $0xb0] sm:$0x1]  ;;  %v1105_v24 = vld [vmem:[#allocation2 + $0xc0] sm:$0x1] }
 0x1db   : > { %v1738_v17 = vsel %vm6637_vm9, %v1521_v46, %v1737_v16  ;;  %1746 = vst [vmem:[#allocation2 + $0xb4] sm:$0xf] %v1745_v2  ;;  %v1546_v30 = vor.u32 %v1544_v61, %v1543_v12  ;;  %v1548_v28 = vrot.slane %v1543_v12, 4  ;;  %v2390_v36 = vsel %vm2360_vm12, %v2388_v10, %v2389_v14  ;;  %v1852_v50 = vld [vmem:[#allocation2 + $0x90] sm:$0xf] }
 0x1dc   : > { %1739 = vst [vmem:[#allocation2 + $0xa8] sm:$0xf] %v1738_v17  ;;  %v1526_v51 = vrot.slane %v1524_v40, 7  ;;  %v2235_v21 = vsel %vm2103_vm11, %v2230_v22, %v2234_v41  ;;  %v7074_v4 = vcombine.low %v1850_v6, %v1851_v49  ;;  %v5024_v42 = vcombine.low %v1787_v34, %v7063_v35  ;;  %4195 = vmatmul.mubr.bf16.gmra.mrb[72].mxu0 %v2390_v36  ;;  %v1853_v44 = vld [vmem:[#allocation2 + $0x94] sm:$0xf] }
 0x1dd   : > { %4041 = vmatprep.mubr.bf16.mxu1 %v2235_v21  ;;  %v1547_v63 = vsel %vm6646_vm10, %v1539_v8, %v1546_v30  ;;  %v1749_v48 = vsel %vm6616_vm5, %v1548_v28, %v1748_v18  ;;  %v1161_v41 = vld [vmem:[#allocation2 + $0xc8] sm:$0x1]  ;;  %v1789_v16 = vld [vmem:[#allocation2 + $0x90] sm:$0xf]  ;;  %v7081_v55 = vld [vmem:[#allocation2 + $0x94] sm:$0xf]  ;;  %v5055_v6 = vcombine.low %v1823_v27, %v7052_v13  ;;  %v725_v12 = vadd.f32 %v6958_v53, %v6873_v37 }
 0x1de   : > { %v1529_v52 = vor.u32 %v1527_v58, %v1526_v51  ;;  %v1531_v60 = vrot.slane %v1526_v51, 4  ;;  %4042 = vmatmul.mubr.bf16.gmra.mrb[40].mxu1 %v5023_v29  ;;  %1747 = vst [vmem:[#allocation2 + $0xb8] sm:$0xf] %v1547_v63  ;;  %1750 = vst [vmem:[#allocation2 + $0xbc] sm:$0x1] %v1749_v48  ;;  %4202 = vmatprep.mubr.bf16.mxu0 %v7074_v4  ;;  %v2237_v61 = vshrl.u32 %v5024_v42, 16 }
 0x1df   : > { %v2239_v1 = vshll.u32 %v5024_v42, 16  ;;  %v2244_v57 = vshll.u32 %v7065_v26, 16  ;;  %v2392_v34 = vrot.slane %v7049_v31, 1  ;;  %v7091_v23 = vld [vmem:[#allocation2 + $0x98] ss:$0 sps:$4 sm:$0x11]   ;;  %v726_v40 = vadd.f32 %v6958_v53, %v6878_v54 }
 0x1e0   : > { %v1530_v49 = vsel %vm6646_vm10, %v1522_v9, %v1529_v52  ;;  %v1742_v29 = vsel %vm6616_vm5, %v1531_v60, %v1741_v15  ;;  %v2391_v10 = vrot.slane %v5055_v6, 1  ;;  %v1106_v13 = vsel %vm6616_vm5, 0, %v1105_v24  ;;  %v1824_v58 = vld [vmem:[#allocation2 + $0x84] sm:$0xe]  ;;  %v1791_v22 = vld [vmem:[#allocation2 + $0x9c] sm:$0xf] }
 0x1e1   : > { %1740 = vst [vmem:[#allocation2 + $0xac] sm:$0xf] %v1530_v49  ;;  %1743 = vst [vmem:[#allocation2 + $0xb0] sm:$0x1] %v1742_v29  ;;  %v2241_v8 = vrot.slane %v2239_v1, 1  ;;  %v2246_v46 = vrot.slane %v2244_v57, 1  ;;  %v7099_v31 = vcombine.low %v1852_v50, %v1853_v44  ;;  %v5025_v17 = vcombine.low %v1789_v16, %v7081_v55 }
 0x1e2   : > { %1107 = vst [vmem:[#allocation2 + $0xc0] sm:$0x1] %v1106_v13  ;;  %v1162_v9 = vsel %vm6624_vm6, 0, %v1161_v41  ;;  %v7104_v18 = vld [vmem:[#allocation2 + $0xa4] ss:$0 sps:$4 sm:$0x11]   ;;  %v2393_v14 = vsel %vm2360_vm12, %v2391_v10, %v2392_v34  ;;  %v5056_v36 = vcombine.low %v1824_v58, %v7063_v35 }
 0x1e3   : > { %v2242_v2 = vor.u32 %v2241_v8, %v2237_v61  ;;  %v7106_v37 = vpop.f32.mrb[0].mxu1  ;;  %v761_v27 = vmax.f32 %v725_v12, 0.0  ;;  %v762_v30 = vmax.f32 %v726_v40, 0.0  ;;  %1163 = vst [vmem:[#allocation2 + $0xc8] sm:$0x1] %v1162_v9  ;;  %v2256_v54 = vshll.u32 %v7091_v23, 16 }
 0x1e4   : > { %v7110_v53 = vld [vmem:[#allocation2 + $0xa0] sm:$0xf]  ;;  %v7112_v28 = vpop.f32.mrb[1].mxu1  ;;  %v2249_v21 = vshrl.u32 %v5025_v17, 16  ;;  %v2251_v15 = vshll.u32 %v5025_v17, 16  ;;  %4203 = vmatmul.mubr.bf16.gmra.mrb[76].mxu0 %v2393_v14  ;;  %v2395_v35 = vrot.slane %v7065_v26, 1 }
 0x1e5   : > { %v2247_v51 = vsel %vm2103_vm11, %v2242_v2, %v2246_v46  ;;  %v797_v24 = vmin.f32 %v761_v27, 10.0  ;;  %v798_v63 = vmin.f32 %v762_v30, 10.0  ;;  %4210 = vmatprep.mubr.bf16.mxu0 %v7099_v31  ;;  %v2258_v52 = vrot.slane %v2256_v54, 1  ;;  %v1854_v60 = vld [vmem:[#allocation2 + $0x9c] sm:$0xf]  ;;  %v7120_v41 = vpop.f32.mrb[2].mxu1 }
 0x1e6   : > { %4049 = vmatprep.mubr.bf16.mxu1 %v2247_v51  ;;  %v2253_v48 = vrot.slane %v2251_v15, 1  ;;  %v1855_v50 = vld [vmem:[#allocation2 + $0xa0] sm:$0xf]  ;;  %v7118_v44 = vcombine.low %v1791_v22, %v7110_v53  ;;  %v2268_v1 = vshll.u32 %v7104_v18, 16  ;;  %v7124_v57 = vpop.f32.mrb[3].mxu1  ;;  %v2394_v49 = vrot.slane %v5056_v36, 1 }
 0x1e7   : > { %4050 = vmatmul.mubr.bf16.gmra.mrb[44].mxu1 %v5024_v42  ;;  %v833_v16 = vmul.f32 25.5, %v797_v24  ;;  %v834_v61 = vmul.f32 25.5, %v798_v63  ;;  %v1825_v34 = vld [vmem:[#allocation2 + $0x90] sm:$0xe]  ;;  %v1793_v10 = vld [vmem:[#allocation2 + $0xa8] sm:$0xf]  ;;  %v7131_v2 = vcombine.low %v1854_v60, %v1855_v50 }
 0x1e8   : > { %v2254_v6 = vor.u32 %v2253_v48, %v2249_v21  ;;  %v2261_v42 = vshrl.u32 %v7118_v44, 16  ;;  %v2263_v29 = vshll.u32 %v7118_v44, 16  ;;  %v7128_v12 = vld [vmem:[#allocation2 + $0xac] sm:$0xf]  ;;  %v2270_v26 = vrot.slane %v2268_v1, 1 }
 0x1e9   : > { %v5882_v8 = vround.rtne.f32 %v833_v16  ;;  %v5883_v46 = vround.rtne.f32 %v834_v61  ;;  %v2396_v9 = vsel %vm2360_vm12, %v2394_v49, %v2395_v35  ;;  %v5057_v27 = vcombine.low %v1825_v34, %v7081_v55  ;;  %v7138_v54 = vld [vmem:[#allocation2 + $0xb0] ss:$0 sps:$4 sm:$0x11]   ;;  %v1856_v15 = vld [vmem:[#allocation2 + $0xa8] sm:$0xf] }
 0x1ea   : > { %v2259_v13 = vsel %vm2103_vm11, %v2254_v6, %v2258_v52  ;;  %v2265_v40 = vrot.slane %v2263_v29, 1  ;;  %v7136_v30 = vcombine.low %v1793_v10, %v7128_v12  ;;  %v1857_v36 = vld [vmem:[#allocation2 + $0xac] sm:$0xf]  ;;  %v1795_v24 = vld [vmem:[#allocation2 + $0xb4] sm:$0xf]  ;;  %v2280_v52 = vshll.u32 %v7138_v54, 16 }
 0x1eb   : > { %v905_v58 = vmul.f32 0.039215688, %v5882_v8  ;;  %v906_v22 = vmul.f32 0.039215688, %v5883_v46  ;;  %4057 = vmatprep.mubr.bf16.mxu1 %v2259_v13  ;;  %v7145_v60 = vld [vmem:[#allocation2 + $0xb8] sm:$0xf]  ;;  %v7151_v13 = vcombine.low %v1856_v15, %v1857_v36 }
 0x1ec   : > { %v2266_v14 = vor.u32 %v2265_v40, %v2261_v42  ;;  %4211 = vmatmul.mubr.bf16.gmra.mrb[80].mxu0 %v2396_v9  ;;  %v2273_v48 = vshrl.u32 %v7136_v30, 16  ;;  %v2275_v55 = vshll.u32 %v7136_v30, 16  ;;  %v2397_v1 = vrot.slane %v5057_v27, 1  ;;  %v1826_v42 = vld [vmem:[#allocation2 + $0x9c] sm:$0xe] }
 0x1ed   : > { %v5263_v51 = vpack.c.bf16 %v905_v58, %v905_v58  ;;  %v5264_v21 = vpack.c.bf16 %v906_v22, %v906_v22  ;;  %4218 = vmatprep.mubr.bf16.mxu0 %v7131_v2  ;;  %v2398_v6 = vrot.slane %v7091_v23, 1  ;;  %v1751_v34 = vld [vmem:[#allocation2 + $0xc0] sm:$0xf]  ;;  %v7149_v46 = vcombine.low %v1795_v24, %v7145_v60  ;;  %v1755_v10 = vld [vmem:[#allocation2 + $0xc8] sm:$0x1]  ;;  %7924 = vst [vmem:[#allocation10_spill] sm:$0xff] %v7151_v13 }
 0x1ee   : > { %v2271_v63 = vsel %vm2103_vm11, %v2266_v14, %v2270_v26  ;;  %v2277_v49 = vrot.slane %v2275_v55, 1  ;;  %v7153_v26 = vld [vmem:[#allocation2 + $0xbc] ss:$0 sps:$4 sm:$0x11]   ;;  %v2401_v0 = vrot.slane %v7104_v18, 1 }
 0x1ef   : > { %4058 = vmatmul.mubr.bf16.gmra.mrb[48].mxu1 %v5025_v17  ;;  %v1550_v50 = vshrl.u32 %v5263_v51, 16  ;;  %v1553_v16 = vshll.u32 %v5263_v51, 16  ;;  %v1558_v61 = vshrl.u32 %v5264_v21, 16  ;;  %v1561_v35 = vshll.u32 %v5264_v21, 16 }
 0x1f0   : > { %4065 = vmatprep.mubr.bf16.mxu1 %v2271_v63  ;;  %v2282_v17 = vrot.slane %v2280_v52, 1  ;;  %v2278_v40 = vor.u32 %v2277_v49, %v2273_v48  ;;  %v2399_v23 = vsel %vm2360_vm12, %v2397_v1, %v2398_v6  ;;  %v5058_v51 = vcombine.low %v1826_v42, %v7110_v53  ;;  %v1858_v52 = vld [vmem:[#allocation2 + $0xb4] sm:$0xf]  ;;  %v1896_v1 = vld [vmem:[#allocation2 + $0x1c] sm:$0xf] }
 0x1f1   : > { %v1552_v29 = vrot.slane %v1550_v50, 7  ;;  %v1560_v8 = vrot.slane %v1558_v61, 7  ;;  %v2287_v21 = vshll.u32 %v7149_v46, 16  ;;  %v2285_v53 = vshrl.u32 %v7149_v46, 16  ;;  %v1859_v50 = vld [vmem:[#allocation2 + $0xb8] sm:$0xf] }
 0x1f2   : > { %v2283_v27 = vsel %vm2103_vm11, %v2278_v40, %v2282_v17  ;;  %v2292_v48 = vshll.u32 %v7153_v26, 16  ;;  %v2400_v55 = vrot.slane %v5058_v51, 1  ;;  %v7171_v49 = vcombine.low %v1858_v52, %v1859_v50  ;;  %v1895_v17 = vld [vmem:[#allocation2 + $0x18] sm:$0xf]  ;;  %v1878_v42 = vld [vmem:[#allocation2 + $0xc] sm:$0xe] }
 0x1f3   : > { %v1555_v58 = vor.u32 %v1553_v16, %v1552_v29  ;;  %v1556_v22 = vrot.slane %v1552_v29, 4  ;;  %v1563_v9 = vor.u32 %v1561_v35, %v1560_v8  ;;  %v1565_v14 = vrot.slane %v1560_v8, 4  ;;  %v1827_v16 = vld [vmem:[#allocation2 + $0xa8] sm:$0xe]  ;;  %v6202_v52 = vld [vmem:[#allocation2 + $0x1c] sm:$0xf] }
 0x1f4   : > { %4219 = vmatmul.mubr.bf16.gmra.mrb[84].mxu0 %v2399_v23  ;;  %v2289_v63 = vrot.slane %v2287_v21, 1  ;;  %v2294_v35 = vrot.slane %v2292_v48, 1  ;;  %v2402_v6 = vsel %vm2360_vm12, %v2400_v55, %v2401_v0  ;;  %7925 = vst [vmem:[#allocation11_spill] sm:$0xff] %v7171_v49  ;;  %v7174_v29 = vcombine.low %v1895_v17, %v1896_v1  ;;  %v1879_v48 = vld [vmem:[#allocation2 + $0x18] sm:$0xe] }
 0x1f5   : > { %v1752_v24 = vsel %vm6637_vm9, %v1555_v58, %v1751_v34  ;;  %v1564_v15 = vsel %vm6646_vm10, %v1556_v22, %v1563_v9  ;;  %v1756_v36 = vsel %vm6616_vm5, %v1565_v14, %v1755_v10  ;;  %4226 = vmatprep.mubr.bf16.mxu0 %v7151_v13  ;;  %v6201_v34 = vld [vmem:[#allocation2 + $0x10] sm:$0xf]  ;;  %v6124_v10 = vld [vmem:[#allocation2 + $0x14] ss:$0 sps:$4 sm:$0x11]   ;;  %v2572_v22 = vshll.u32 %v6759_v7, 16 }
 0x1f6   : > { %1753 = vst [vmem:[#allocation2 + $0xc0] sm:$0xf] %v1752_v24  ;;  %1754 = vst [vmem:[#allocation2 + $0xc4] sm:$0xf] %v1564_v15  ;;  %v2290_v61 = vor.u32 %v2289_v63, %v2285_v53  ;;  %v5093_v8 = vcombine.low %v1878_v42, %v6201_v34  ;;  %v2404_v9 = vrot.slane %v7138_v54, 1  ;;  %v3036_v23 = vshll.u32 %v7174_v29, 16 }
 0x1f7   : > { %1757 = vst [vmem:[#allocation2 + $0xc8] sm:$0x1] %v1756_v36  ;;  %4066 = vmatmul.mubr.bf16.gmra.mrb[52].mxu1 %v7118_v44  ;;  %v5059_v44 = vcombine.low %v1827_v16, %v7128_v12  ;;  %v1828_v14 = vld [vmem:[#allocation2 + $0xb4] sm:$0xe]  ;;  %v2826_v21 = vrot.slane %v6124_v10, 1  ;;  %v2574_v15 = vrot.slane %v2572_v22, 1  ;;  %v5094_v50 = vcombine.low %v1879_v48, %v6202_v52 }
 0x1f8   : > { %4073 = vmatprep.mubr.bf16.mxu1 %v2283_v27  ;;  %v2295_v18 = vsel %vm2103_vm11, %v2290_v61, %v2294_v35  ;;  %v2825_v51 = vrot.slane %v5093_v8, 1  ;;  %v7184_v24 = vld [vmem:[#allocation2 + $0x28] sm:$0xf]  ;;  %v5060_v53 = vcombine.low %v1828_v14, %v7145_v60  ;;  %v1897_v63 = vld [vmem:[#allocation2 + $0x24] sm:$0xf]  ;;  %v3038_v55 = vrot.slane %v3036_v23, 1 }
 0x1f9   : > { %v2403_v12 = vrot.slane %v5059_v44, 1  ;;  %v7189_v54 = vcombine.low %v1897_v63, %v7184_v24  ;;  %v2570_v0 = vshrl.u32 %v6759_v7, 16  ;;  %v2577_v16 = vshll.u32 %v6124_v10, 16  ;;  %v6132_v35 = vld [vmem:[#allocation2 + $0x20] ss:$0 sps:$4 sm:$0x11]  }
 0x1fa   : > { %v2827_v61 = vsel %vm2360_vm12, %v2825_v51, %v2826_v21  ;;  %v3034_v60 = vshrl.u32 %v7174_v29, 16  ;;  %v2407_v44 = vrot.slane %v7153_v26, 1  ;;  %v2584_v7 = vshll.u32 %v6819_v25, 16  ;;  %v7201_v22 = vld [vmem:[#allocation2 + $0x2c] ss:$0 sps:$4 sm:$0x11]  }
 0x1fb   : > { %v2405_v36 = vsel %vm2360_vm12, %v2403_v12, %v2404_v9  ;;  %v2575_v17 = vor.u32 %v2574_v15, %v2570_v0  ;;  %v3048_v34 = vshll.u32 %v7189_v54, 16  ;;  %v2579_v8 = vrot.slane %v2577_v16, 1  ;;  %v6138_v26 = vld [vmem:[#allocation7 + $0x208] sm:$0xff]   ;;  %v1880_v14 = vld [vmem:[#allocation2 + $0x24] sm:$0xe]  ;;  %v6204_v48 = vld [vmem:[#allocation7 + $0x200] sm:$0xff]  }
 0x1fc   : > { %4227 = vmatmul.mubr.bf16.gmra.mrb[88].mxu0 %v2402_v6  ;;  %v2406_v6 = vrot.slane %v5060_v53, 1  ;;  %v3039_v42 = vor.u32 %v3038_v55, %v3034_v60  ;;  %v2829_v10 = vrot.slane %v6132_v35, 1  ;;  %v2586_v21 = vrot.slane %v2584_v7, 1  ;;  %v6203_v15 = vld [vmem:[#allocation2 + $0x28] sm:$0xf]  ;;  %v6145_v60 = vld [vmem:[#allocation7 + $0x210] sm:$0xff]  }
 0x1fd   : > { %4234 = vmatprep.mubr.bf16.mxu0 %v7171_v49  ;;  %v1860_v40 = vld [vmem:[#allocation2 + $0xc0] sm:$0xf]  ;;  %v1861_v58 = vld [vmem:[#allocation2 + $0xc4] sm:$0xf]  ;;  %v2580_v9 = vsel %vm2103_vm11, %v2575_v17, %v2579_v8  ;;  %v3050_v51 = vrot.slane %v3048_v34, 1  ;;  %v3046_v55 = vshrl.u32 %v7189_v54, 16 }
 0x1fe   : > { %v7182_v27 = vcombine.low %v1860_v40, %v1861_v58  ;;  %v7199_v40 = vld [vmem:[#allocation2 + $0x34] sm:$0xf]  ;;  %v2408_v12 = vsel %vm2360_vm12, %v2406_v6, %v2407_v44  ;;  %v6135_v63 = vld [vmem:[#allocation2 + $0x2c] ss:$0 sps:$4 sm:$0x11]   ;;  %v3053_v0 = vshll.u32 %v7201_v22, 16 }
 0x1ff   : > { %4074 = vmatmul.mubr.bf16.gmra.mrb[56].mxu1 %v7136_v30  ;;  %v6128_v30 = vld [vmem:[#allocation2 + $0x20] ss:$0 sps:$4 sm:$0x11]   ;;  %v2582_v52 = vshrl.u32 %v6819_v25, 16  ;;  %v2596_v16 = vshll.u32 %v6848_v47, 16  ;;  %v2832_v34 = vrot.slane %v6135_v63, 1 }
 0x200   : > { %4081 = vmatprep.mubr.bf16.mxu1 %v2295_v18  ;;  %7926 = vst [vmem:[#allocation12_spill] sm:$0xff] %v7182_v27  ;;  %v3041_v1 = vshll.u32 %v6128_v30, 16  ;;  %v2828_v18 = vrot.slane %v5094_v50, 1  ;;  %v2589_v50 = vshll.u32 %v6132_v35, 16  ;;  %v1901_v17 = vld [vmem:[#allocation2 + $0x3c] sm:$0xf] }
 0x201   : > { %v2587_v6 = vor.u32 %v2586_v21, %v2582_v52  ;;  %v7217_v7 = vld [vmem:[#allocation2 + $0x40] sm:$0xf]  ;;  %v3055_v8 = vrot.slane %v3053_v0, 1  ;;  %v2598_v35 = vrot.slane %v2596_v16, 1  ;;  %v1904_v0 = vld [vmem:[#allocation2 + $0x4c] sm:$0xf] }
 0x202   : > { %v3043_v58 = vrot.slane %v3041_v1, 1  ;;  %v2830_v53 = vsel %vm2360_vm12, %v2828_v18, %v2829_v10  ;;  %v3051_v1 = vor.u32 %v3050_v51, %v3046_v55  ;;  %v2591_v18 = vrot.slane %v2589_v50, 1  ;;  %v6205_v51 = vld [vmem:[#allocation2 + $0x34] sm:$0xf]  ;;  %v1903_v55 = vld [vmem:[#allocation2 + $0x48] sm:$0xf] }
 0x203   : > { %v7221_v10 = vcombine.low %v1901_v17, %v7217_v7  ;;  %v6159_v52 = vld [vmem:[#allocation7 + $0x220] sm:$0xff]   ;;  %v2608_v50 = vshll.u32 %v6889_v19, 16 }
 0x204   : > { %4235 = vmatmul.mubr.bf16.gmra.mrb[92].mxu0 %v2405_v36  ;;  %v3044_v23 = vsel %vm2103_vm11, %v3039_v42, %v3043_v58  ;;  %v5095_v36 = vcombine.low %v1880_v14, %v6203_v15  ;;  %v6152_v58 = vld [vmem:[#allocation7 + $0x218] sm:$0xff]   ;;  %v2594_v15 = vshrl.u32 %v6848_v47, 16 }
 0x205   : > { %4242 = vmatprep.mubr.bf16.mxu0 %v7182_v27 }
 0x206   : > { %v2831_v42 = vrot.slane %v5095_v36, 1  ;;  %v2601_v36 = vshll.u32 %v6135_v63, 16  ;;  %v1882_v63 = vld [vmem:[#allocation2 + $0x3c] sm:$0xe] }
 0x207   : > { %4082 = vmatmul.mubr.bf16.gmra.mrb[60].mxu1 %v7149_v46  ;;  %v1899_v46 = vld [vmem:[#allocation2 + $0x30] sm:$0xf] }
 0x208   : > { %4283 = vmatprep.mubr.bf16.mxu1 %v2827_v61  ;;  %v7207_v30 = vcombine.low %v1899_v46, %v7199_v40  ;;  %v7214_v61 = vld [vmem:[#allocation2 + $0x38] ss:$0 sps:$4 sm:$0x11]   ;;  %v1881_v46 = vld [vmem:[#allocation2 + $0x30] sm:$0xe] }
 0x209   : > { %v5096_v21 = vcombine.low %v1881_v46, %v6205_v51  ;;  %v6142_v51 = vld [vmem:[#allocation2 + $0x44] ss:$0 sps:$4 sm:$0x11]  }
 0x20a   : > { %v3060_v44 = vshll.u32 %v7207_v30, 16  ;;  %v3058_v25 = vshrl.u32 %v7207_v30, 16 }
 0x20b   : > { %v2834_v17 = vrot.slane %v5096_v21, 1  ;;  %v2620_v21 = vshll.u32 %v6911_v56, 16 }
 0x20c   : > { %4243 = vmatmul.mubr.bf16.gmra.mrb[96].mxu0 %v2408_v12  ;;  %v3056_v12 = vsel %vm2103_vm11, %v3051_v1, %v3055_v8  ;;  %v3062_v14 = vrot.slane %v3060_v44, 1  ;;  %v2603_v44 = vrot.slane %v2601_v36, 1  ;;  %v2606_v8 = vshrl.u32 %v6889_v19, 16  ;;  %v6173_v36 = vld [vmem:[#allocation7 + $0x230] sm:$0xff]  }
 0x20d   : > { %4444 = vmatprep.mubr.bf16.mxu0 %v3044_v23  ;;  %v3065_v23 = vshll.u32 %v7214_v61, 16 }
 0x20e   : > { %v3063_v16 = vor.u32 %v3062_v14, %v3058_v25  ;;  %v6206_v14 = vld [vmem:[#allocation2 + $0x40] sm:$0xf] }
 0x20f   : > { %4284 = vmatmul.mubr.bf16.vlgmr.msra.gmra.mrb[64].mxu1 %v2580_v9  ;;  %v2592_v9 = vsel %vm2103_vm11, %v2587_v6, %v2591_v18  ;;  %v3067_v1 = vrot.slane %v3065_v23, 1  ;;  %v3072_v6 = vshll.u32 %v7221_v10, 16  ;;  %v6166_v18 = vld [vmem:[#allocation7 + $0x228] sm:$0xff]   ;;  %v5097_v23 = vcombine.low %v1882_v63, %v6206_v14  ;;  %v1907_v14 = vld [vmem:[#allocation2 + $0x60] sm:$0xf] }
 0x210   : > { %5801 = vmatpush3.bf16.msra.mxu1 %v6204_v48  ;;  %4291 = vmatprep.mubr.bf16.mxu1 %v2830_v53  ;;  %v6139_v53 = vld [vmem:[#allocation2 + $0x38] ss:$0 sps:$4 sm:$0x11]   ;;  %v7229_v48 = vld [vmem:[#allocation2 + $0x44] ss:$0 sps:$4 sm:$0x11]  }
 0x211   : > { %5802 = vmatprep.subr.bf16.mxu1 %v6138_v26  ;;  %v2835_v47 = vrot.slane %v6139_v53, 1  ;;  %v3077_v46 = vshll.u32 %v7229_v48, 16  ;;  %v3068_v25 = vsel %vm2103_vm11, %v3063_v16, %v3067_v1  ;;  %v2837_v16 = vrot.slane %v5097_v23, 1  ;;  %v7260_v23 = vld [vmem:[#allocation2 + $0x64] sm:$0xf] }
 0x212   : > { %v2838_v1 = vrot.slane %v6142_v51, 1  ;;  %v2618_v63 = vshrl.u32 %v6911_v56, 16 }
 0x213   : > { %v3079_v19 = vrot.slane %v3077_v46, 1  ;;  %v6180_v46 = vld [vmem:[#allocation7 + $0x238] sm:$0xff]  }
 0x214   : > { %5803 = vmatpush3.bf16.msra.mxu1 %v6138_v26  ;;  %4445 = vmatmul.mubr.bf16.vlgmr.msra.gmra.mrb[100].mxu0 %v7174_v29  ;;  %v2833_v26 = vsel %vm2360_vm12, %v2831_v42, %v2832_v34  ;;  %v2599_v29 = vor.u32 %v2598_v35, %v2594_v15  ;;  %v7233_v42 = vcombine.low %v1903_v55, %v1904_v0  ;;  %v3070_v34 = vshrl.u32 %v7221_v10, 16  ;;  %v1905_v15 = vld [vmem:[#allocation2 + $0x54] sm:$0xf]  ;;  %v6144_v0 = vld [vmem:[#allocation2 + $0x50] ss:$0 sps:$4 sm:$0x11]  }
 0x215   : > { %5804 = vmatprep.subr.bf16.mxu1 %v6145_v60  ;;  %4452 = vmatprep.mubr.bf16.mxu0 %v3056_v12  ;;  %v3074_v35 = vrot.slane %v3072_v6, 1  ;;  %v2610_v12 = vrot.slane %v2608_v50, 1  ;;  %v6207_v6 = vld [vmem:[#allocation2 + $0x4c] sm:$0xf]  ;;  %v2839_v56 = vsel %vm2360_vm12, %v2837_v16, %v2838_v1  ;;  %v2630_v1 = vshrl.u32 %v6940_v20, 16 }
 0x216   : > { %v3084_v50 = vshll.u32 %v7233_v42, 16 }
 0x217   : > { %4292 = vmatmul.mubr.bf16.gmra.mrb[68].mxu1 %v2592_v9  ;;  %v2613_v9 = vshll.u32 %v6139_v53, 16  ;;  %v2611_v53 = vor.u32 %v2610_v12, %v2606_v8  ;;  %v3089_v12 = vshll.u32 %v6144_v0, 16  ;;  %v7276_v0 = vcombine.low %v1907_v14, %v7260_v23 }
 0x218   : > { %4299 = vmatprep.mubr.bf16.mxu1 %v2833_v26  ;;  %5805 = vmatpush3.bf16.msra.mxu1 %v6145_v60  ;;  %v2604_v60 = vsel %vm2103_vm11, %v2599_v29, %v2603_v44  ;;  %v1883_v26 = vld [vmem:[#allocation2 + $0x48] sm:$0xe]  ;;  %v3075_v29 = vor.u32 %v3074_v35, %v3070_v34  ;;  %v2625_v34 = vshll.u32 %v6142_v51, 16  ;;  %v3086_v35 = vrot.slane %v3084_v50, 1  ;;  %v1909_v50 = vld [vmem:[#allocation2 + $0x6c] sm:$0xf] }
 0x219   : > { %5806 = vmatprep.subr.bf16.mxu1 %v6152_v58  ;;  %v2615_v55 = vrot.slane %v2613_v9, 1  ;;  %v5098_v44 = vcombine.low %v1883_v26, %v6207_v6  ;;  %v7256_v9 = vld [vmem:[#allocation2 + $0x5c] ss:$0 sps:$4 sm:$0x11]   ;;  %v3108_v14 = vshll.u32 %v7276_v0, 16 }
 0x21a   : > { %v3080_v8 = vsel %vm2103_vm11, %v3075_v29, %v3079_v19  ;;  %v2627_v19 = vrot.slane %v2625_v34, 1  ;;  %v7268_v29 = vld [vmem:[#allocation2 + $0x5c] ss:$0 sps:$4 sm:$0x11]   ;;  %v2656_v34 = vshll.u32 %v6996_v3, 16 }
 0x21b   : > { %v2840_v51 = vrot.slane %v5098_v44, 1 }
 0x21c   : > { %5807 = vmatpush3.bf16.msra.mxu1 %v6152_v58  ;;  %4453 = vmatmul.mubr.bf16.gmra.mrb[104].mxu0 %v7189_v54  ;;  %v2836_v58 = vsel %vm2360_vm12, %v2834_v17, %v2835_v47  ;;  %v7243_v54 = vld [vmem:[#allocation2 + $0x58] sm:$0xf]  ;;  %v7246_v17 = vld [vmem:[#allocation2 + $0x50] ss:$0 sps:$4 sm:$0x11]   ;;  %v3082_v47 = vshrl.u32 %v7233_v42, 16 }
 0x21d   : > { %5808 = vmatprep.subr.bf16.mxu1 %v6159_v52  ;;  %4460 = vmatprep.mubr.bf16.mxu0 %v3068_v25  ;;  %v2616_v25 = vsel %vm2103_vm11, %v2611_v53, %v2615_v55  ;;  %v7272_v53 = vadd.f32 %v7124_v57, %v7120_v41  ;;  %v2637_v44 = vshll.u32 %v7246_v17, 16  ;;  %v2644_v41 = vshll.u32 %v6951_v43, 16 }
 0x21e   : > { %v3087_v55 = vor.u32 %v3086_v35, %v3082_v47 }
 0x21f   : > { %4300 = vmatmul.mubr.bf16.gmra.mrb[72].mxu1 %v2604_v60  ;;  %v2622_v60 = vrot.slane %v2620_v21, 1 }
 0x220   : > { %4307 = vmatprep.mubr.bf16.mxu1 %v2836_v58  ;;  %5809 = vmatpush3.bf16.msra.mxu1 %v6159_v52  ;;  %v7249_v52 = vcombine.low %v1905_v15, %v7243_v54  ;;  %v1884_v58 = vld [vmem:[#allocation2 + $0x54] sm:$0xe]  ;;  %v2841_v15 = vrot.slane %v7246_v17, 1  ;;  %v1885_v17 = vld [vmem:[#allocation2 + $0x60] sm:$0xe] }
 0x221   : > { %5810 = vmatprep.subr.bf16.mxu1 %v6166_v18  ;;  %v2623_v26 = vor.u32 %v2622_v60, %v2618_v63  ;;  %v7280_v63 = vld [vmem:[#allocation2 + $0x70] sm:$0xf]  ;;  %v7284_v60 = vld [vmem:[#allocation2 + $0x68] ss:$0 sps:$4 sm:$0x11]  }
 0x222   : > { %v3096_v21 = vshll.u32 %v7249_v52, 16  ;;  %v3094_v57 = vshrl.u32 %v7249_v52, 16  ;;  %v2842_v35 = vsel %vm2360_vm12, %v2840_v51, %v2841_v15  ;;  %v2844_v51 = vrot.slane %v7268_v29, 1 }
 0x224   : > { %5811 = vmatpush3.bf16.msra.mxu1 %v6166_v18  ;;  %4461 = vmatmul.mubr.bf16.gmra.mrb[108].mxu0 %v7207_v30  ;;  %v2632_v18 = vshll.u32 %v6940_v20, 16  ;;  %v7264_v30 = vadd.f32 %v7112_v28, %v7106_v37  ;;  %v3091_v37 = vrot.slane %v3089_v12, 1  ;;  %v3101_v28 = vshll.u32 %v7256_v9, 16  ;;  %v7290_v12 = vld [vmem:[#allocation2 + $0x78] sm:$0xe] }
 0x225   : > { %5812 = vmatprep.subr.bf16.mxu1 %v6173_v36  ;;  %4468 = vmatprep.mubr.bf16.mxu0 %v3080_v8  ;;  %v3098_v47 = vrot.slane %v3096_v21, 1  ;;  %v1886_v8 = vld [vmem:[#allocation2 + $0x6c] sm:$0xe]  ;;  %v2628_v20 = vsel %vm2103_vm11, %v2623_v26, %v2627_v19  ;;  %v2639_v21 = vrot.slane %v2637_v44, 1  ;;  %v3110_v44 = vrot.slane %v3108_v14, 1 }
 0x226   : > { %v2634_v6 = vrot.slane %v2632_v18, 1  ;;  %v3092_v18 = vsel %vm2103_vm11, %v3087_v55, %v3091_v37  ;;  %v6153_v19 = vld [vmem:[#allocation2 + $0x68] ss:$0 sps:$4 sm:$0x11]   ;;  %v2642_v55 = vshrl.u32 %v6951_v43, 16  ;;  %v2646_v37 = vrot.slane %v2644_v41, 1 }
 0x227   : > { %4308 = vmatmul.mubr.bf16.gmra.mrb[76].mxu1 %v2616_v25  ;;  %v2668_v25 = vshll.u32 %v7008_v45, 16  ;;  %v3099_v15 = vor.u32 %v3098_v47, %v3094_v57  ;;  %v7308_v47 = vld [vmem:[#allocation2 + $0x7c] sm:$0xf]  ;;  %v2654_v41 = vshrl.u32 %v6996_v3, 16  ;;  %v2847_v49 = vrot.slane %v6153_v19, 1 }
 0x228   : > { %4315 = vmatprep.mubr.bf16.mxu1 %v2839_v56  ;;  %5813 = vmatpush3.bf16.msra.mxu1 %v6173_v36  ;;  %v6208_v36 = vld [vmem:[#allocation2 + $0x58] sm:$0xf]  ;;  %v3103_v56 = vrot.slane %v3101_v28, 1  ;;  %v6209_v28 = vld [vmem:[#allocation2 + $0x64] sm:$0xf] }
 0x229   : > { %5814 = vmatprep.subr.bf16.mxu1 %v6180_v46  ;;  %v5099_v16 = vcombine.low %v1884_v58, %v6208_v36  ;;  %v2635_v58 = vor.u32 %v2634_v6, %v2630_v1  ;;  %v5100_v36 = vcombine.low %v1885_v17, %v6209_v28  ;;  %v1911_v1 = vld [vmem:[#allocation2 + $0x78] sm:$0xf]  ;;  %v3106_v6 = vshrl.u32 %v7276_v0, 16 }
 0x22a   : > { %v7317_v13 = vcombine.low %v1911_v1, %v7308_v47 }
 0x22b   : > { %v2843_v26 = vrot.slane %v5099_v16, 1  ;;  %v5102_v16 = vcombine.low %v7290_v12, %v7047_v38  ;;  %v2640_v17 = vsel %vm2103_vm11, %v2635_v58, %v2639_v21  ;;  %v2647_v38 = vor.u32 %v2646_v37, %v2642_v55  ;;  %v7314_v12 = vld [vmem:[#allocation2 + $0x80] ss:$0 sps:$4 sm:$0x11]  }
 0x22c   : > { %5815 = vmatpush3.bf16.msra.mxu1 %v6180_v46  ;;  %4469 = vmatmul.mubr.bf16.gmra.mrb[112].mxu0 %v7221_v10  ;;  %v7296_v46 = vcombine.low %v1909_v50, %v7280_v63  ;;  %v3113_v10 = vshll.u32 %v7284_v60, 16  ;;  %v5101_v50 = vcombine.low %v1886_v8, %v6210_v11  ;;  %v2658_v11 = vrot.slane %v2656_v34, 1 }
 0x22d   : > { %4476 = vmatprep.mubr.bf16.mxu0 %v3092_v18  ;;  %v2649_v18 = vshll.u32 %v7268_v29, 16  ;;  %v2845_v43 = vsel %vm2360_vm12, %v2843_v26, %v2844_v51  ;;  %v2661_v8 = vshll.u32 %v6153_v19, 16  ;;  %v6156_v29 = vld [vmem:[#allocation2 + $0x74] ss:$0 sps:$4 sm:$0x11]   ;;  %v2846_v27 = vrot.slane %v5100_v36, 1 }
 0x22e   : > { %v3120_v57 = vshll.u32 %v7296_v46, 16  ;;  %v3115_v28 = vrot.slane %v3113_v10, 1  ;;  %v3111_v3 = vor.u32 %v3110_v44, %v3106_v6  ;;  %v3118_v34 = vshrl.u32 %v7296_v46, 16  ;;  %v1108_v10 = vld [vmem:[#allocation2 + $0xcc] sm:$0x1] }
 0x22f   : > { %4316 = vmatmul.mubr.bf16.gmra.mrb[80].mxu1 %v2628_v20  ;;  %v7302_v20 = vld [vmem:[#allocation2 + $0x74] ss:$0 sps:$4 sm:$0x11]   ;;  %v2651_v14 = vrot.slane %v2649_v18, 1  ;;  %v2659_v58 = vor.u32 %v2658_v11, %v2654_v41  ;;  %v2663_v21 = vrot.slane %v2661_v8, 1  ;;  %v2849_v51 = vrot.slane %v5101_v50, 1 }
 0x230   : > { %4323 = vmatprep.mubr.bf16.mxu1 %v2842_v35  ;;  %v3104_v35 = vsel %vm2103_vm11, %v3099_v15, %v3103_v56  ;;  %v3122_v26 = vrot.slane %v3120_v57, 1  ;;  %v3125_v56 = vshll.u32 %v7302_v20, 16  ;;  %v2850_v15 = vrot.slane %v6156_v29, 1  ;;  %v1164_v36 = vld [vmem:[#allocation2 + $0xd4] sm:$0x1] }
 0x231   : > { %v3137_v19 = vshll.u32 %v7314_v12, 16  ;;  %v2666_v55 = vshrl.u32 %v7008_v45, 16  ;;  %v2670_v37 = vrot.slane %v2668_v25, 1  ;;  %v2680_v18 = vshll.u32 %v7056_v32, 16  ;;  %v1945_v25 = vld [vmem:[#allocation2 + $0x30] sm:$0xe] }
 0x232   : > { %v2652_v1 = vsel %vm2103_vm11, %v2647_v38, %v2651_v14  ;;  %v2848_v6 = vsel %vm2360_vm12, %v2846_v27, %v2847_v49  ;;  %v3132_v44 = vshll.u32 %v7317_v13, 16  ;;  %v7328_v57 = vld [vmem:[#allocation2 + $0x80] ss:$0 sps:$4 sm:$0x11]   ;;  %v3116_v50 = vsel %vm2103_vm11, %v3111_v3, %v3115_v28  ;;  %v1913_v14 = vld [vmem:[#allocation2 + $0x84] sm:$0xf] }
 0x233   : > { %v3127_v41 = vrot.slane %v3125_v56, 1  ;;  %v1109_v45 = vsel %vm6616_vm5, 0, %v1108_v10  ;;  %v7334_v11 = vsel %vm2103_vm11, %v2659_v58, %v2663_v21  ;;  %v7337_v8 = vsel %vm2360_vm12, %v2849_v51, %v2850_v15  ;;  %v7344_v3 = vld [vmem:[#allocation2 + $0x88] sm:$0xf]  ;;  %v1948_v21 = vld [vmem:[#allocation2 + $0x54] sm:$0xe] }
 0x234   : > { %4477 = vmatmul.mubr.bf16.gmra.mrb[116].mxu0 %v7233_v42  ;;  %v2673_v42 = vshll.u32 %v6156_v29, 16  ;;  %v3130_v49 = vshrl.u32 %v7317_v13, 16  ;;  %1110 = vst [vmem:[#allocation2 + $0xcc] sm:$0x1] %v1109_v45  ;;  %v1165_v27 = vsel %vm6624_vm6, 0, %v1164_v36  ;;  %v2671_v28 = vor.u32 %v2670_v37, %v2666_v55 }
 0x235   : > { %4484 = vmatprep.mubr.bf16.mxu0 %v3104_v35  ;;  %v1944_v29 = vld [vmem:[#allocation2 + $0x24] sm:$0xe]  ;;  %v1946_v35 = vld [vmem:[#allocation2 + $0x3c] sm:$0xe]  ;;  %1166 = vst [vmem:[#allocation2 + $0xd4] sm:$0x1] %v1165_v27  ;;  %v5143_v39 = vcombine.low %v1945_v25, %v7199_v40  ;;  %v5146_v36 = vcombine.low %v1948_v21, %v7243_v54 }
 0x236   : > { %v2675_v38 = vrot.slane %v2673_v42, 1  ;;  %v7347_v56 = vrot.slane %v5102_v16, 1  ;;  %v3293_v58 = vrot.slane %v7201_v22, 1  ;;  %v3296_v10 = vrot.slane %v7214_v61, 1  ;;  %v1949_v55 = vld [vmem:[#allocation2 + $0x60] sm:$0xe] }
 0x237   : > { %4324 = vmatmul.mubr.bf16.gmra.mrb[84].mxu1 %v2640_v17  ;;  %v7342_v17 = vrot.slane %v3137_v19, 1  ;;  %v5144_v19 = vcombine.low %v1946_v35, %v7217_v7  ;;  %v7357_v16 = vcombine.low %v1913_v14, %v7344_v3  ;;  %v3295_v22 = vrot.slane %v5143_v39, 1  ;;  %v1950_v37 = vld [vmem:[#allocation2 + $0x6c] sm:$0xe]  ;;  %v1953_v35 = vld [vmem:[#allocation2 + $0x90] sm:$0xe] }
 0x238   : > { %4331 = vmatprep.mubr.bf16.mxu1 %v2845_v43  ;;  %v3123_v43 = vor.u32 %v3122_v26, %v3118_v34  ;;  %v5142_v34 = vcombine.low %v1944_v29, %v7184_v24  ;;  %v3134_v26 = vrot.slane %v3132_v44, 1  ;;  %v2853_v24 = vrot.slane %v7328_v57, 1  ;;  %v7363_v42 = vld [vmem:[#allocation2 + $0x8c] ss:$0 sps:$4 sm:$0x11]  }
 0x239   : > { %v3299_v40 = vrot.slane %v7229_v48, 1  ;;  %v3298_v7 = vrot.slane %v5144_v19, 1  ;;  %v7371_v44 = vld [vmem:[#allocation2 + $0x98] ss:$0 sps:$4 sm:$0x11]   ;;  %v3305_v48 = vrot.slane %v7256_v9, 1  ;;  %v5148_v29 = vcombine.low %v1950_v37, %v7280_v63 }
 0x23a   : > { %v3128_v51 = vsel %vm2103_vm11, %v3123_v43, %v3127_v41  ;;  %v3292_v15 = vrot.slane %v5142_v34, 1  ;;  %v1951_v43 = vld [vmem:[#allocation2 + $0x78] sm:$0xe]  ;;  %v1952_v41 = vld [vmem:[#allocation2 + $0x84] sm:$0xe]  ;;  %v3304_v54 = vrot.slane %v5146_v36, 1 }
 0x23b   : > { %v7378_v45 = vld [vmem:[#allocation2 + $0xa4] ss:$0 sps:$4 sm:$0x11]   ;;  %v1758_v25 = vld [vmem:[#allocation2 + $0xcc] sm:$0xf]  ;;  %v7381_v27 = vsel %vm2360_vm12, %v3298_v7, %v3299_v40  ;;  %v7927_v63 = vrot.slane %v6643_v62, 4  ;;  %v5149_v59 = vcombine.low %v1951_v43, %v7308_v47  ;;  %v5150_v33 = vcombine.low %v1952_v41, %v7344_v3 }
 0x23c   : > { %4485 = vmatmul.mubr.bf16.gmra.mrb[120].mxu0 %v7249_v52  ;;  %v7361_v52 = vsel %vm2103_vm11, %v2671_v28, %v2675_v38  ;;  %v7366_v61 = vsel %vm2360_vm12, %v3292_v15, %v3293_v58  ;;  %v3144_v28 = vshll.u32 %v7357_v16, 16  ;;  %v7386_v9 = vld [vmem:[#allocation2 + $0xb0] ss:$0 sps:$4 sm:$0x11]   ;;  %v1762_v14 = vld [vmem:[#allocation2 + $0xd4] sm:$0x1]  ;;  %v7399_v21 = vsel %vm2360_vm12, %v3304_v54, %v3305_v48 }
 0x23d   : > { %4492 = vmatprep.mubr.bf16.mxu0 %v3116_v50  ;;  %v7374_v50 = vsel %vm2360_vm12, %v3295_v22, %v3296_v10  ;;  %v7392_v39 = vld [vmem:[#allocation2 + $0xbc] ss:$0 sps:$4 sm:$0x11]   ;;  %v3310_v15 = vrot.slane %v5148_v29, 1  ;;  %v3314_v62 = vrot.slane %v7314_v12, 1  ;;  %v3313_v47 = vrot.slane %v5149_v59, 1 }
 0x23e   : > { %v1954_v22 = vld [vmem:[#allocation2 + $0x9c] sm:$0xe]  ;;  %v3317_v7 = vrot.slane %v7363_v42, 1  ;;  %v1955_v48 = vld [vmem:[#allocation2 + $0xa8] sm:$0xe]  ;;  %v3316_v43 = vrot.slane %v5150_v33, 1 }
 0x23f   : > { %4332 = vmatmul.mubr.bf16.gmra.mrb[88].mxu1 %v2652_v1  ;;  %v7369_v1 = vor.u32 %v3134_v26, %v3130_v49  ;;  %v3308_v49 = vrot.slane %v7284_v60, 1  ;;  %v3311_v26 = vrot.slane %v7302_v20, 1  ;;  %v1763_v60 = vsel %vm6616_vm5, %v7927_v63, %v1762_v14  ;;  %v1956_v41 = vld [vmem:[#allocation2 + $0xb4] sm:$0xe]  ;;  %v1957_v29 = vld [vmem:[#allocation2 + $0xc0] sm:$0xe] }
 0x240   : > { %4339 = vmatprep.mubr.bf16.mxu1 %v2848_v6  ;;  %v5147_v6 = vcombine.low %v1949_v55, %v7260_v23  ;;  %v1759_v23 = vsel %vm6637_vm9, %v6652_v5, %v1758_v25  ;;  %v1916_v5 = vld [vmem:[#allocation2 + $0x94] sm:$0xf]  ;;  %v7402_v55 = vld [vmem:[#allocation2 + $0xc8] ss:$0 sps:$4 sm:$0x11]   ;;  %v7425_v54 = vsel %vm2360_vm12, %v3313_v47, %v3314_v62  ;;  %v2678_v62 = vshrl.u32 %v7056_v32, 16 }
 0x241   : > { %1760 = vst [vmem:[#allocation2 + $0xcc] sm:$0xf] %v1759_v23  ;;  %1764 = vst [vmem:[#allocation2 + $0xd4] sm:$0x1] %v1763_v60  ;;  %v7411_v37 = vsel %vm2360_vm12, %v3310_v15, %v3311_v26  ;;  %v5151_v36 = vcombine.low %v1953_v35, %v1916_v5  ;;  %v7422_v25 = vld [vmem:[#allocation2 + $0xac] sm:$0xf]  ;;  %v3140_v32 = vsel %vm2103_vm11, %v7369_v1, %v7342_v17 }
 0x242   : > { %v3307_v34 = vrot.slane %v5147_v6, 1  ;;  %v7415_v6 = vld [vmem:[#allocation2 + $0xa0] sm:$0xf]  ;;  %v7432_v35 = vld [vmem:[#allocation2 + $0xb8] sm:$0xf]  ;;  %v3326_v23 = vrot.slane %v7386_v9, 1 }
 0x243   : > { %v1915_v14 = vld [vmem:[#allocation2 + $0x90] sm:$0xf]  ;;  %v5154_v63 = vcombine.low %v1956_v41, %v7432_v35  ;;  %v1888_v60 = vld [vmem:[#allocation2 + $0x84] sm:$0xe]  ;;  %v3149_v15 = vshll.u32 %v7363_v42, 16  ;;  %v2682_v33 = vrot.slane %v2680_v18, 1 }
 0x244   : > { %v5414_v38 = vpop.f32.mrb[36].mxu0  ;;  %v7405_v20 = vsel %vm2360_vm12, %v3307_v34, %v3308_v49  ;;  %4493 = vmatmul.mubr.bf16.gmra.mrb[124].mxu0 %v7276_v0  ;;  %v3320_v0 = vrot.slane %v7371_v44, 1  ;;  %v3323_v49 = vrot.slane %v7378_v45, 1  ;;  %v7439_v34 = vld [vmem:[#allocation2 + $0xc4] sm:$0xf]  ;;  %v3142_v47 = vshrl.u32 %v7357_v16, 16 }
 0x245   : > { %v5415_v58 = vpop.f32.mrb[37].mxu0  ;;  %4500 = vmatprep.mubr.bf16.mxu0 %v3128_v51  ;;  %v3319_v51 = vrot.slane %v5151_v36, 1  ;;  %v7456_v36 = vcombine.low %v1915_v14, %v1916_v5  ;;  %v3146_v18 = vrot.slane %v3144_v28, 1  ;;  %v7478_v17 = vld [vmem:[#allocation2 + $0xd0] sm:$0xf] }
 0x246   : > { %v5416_v10 = vadd.f32 %v5415_v58, %v5414_v38  ;;  %v5417_v19 = vpop.f32.mrb[38].mxu0  ;;  %v7435_v38 = vsel %vm2360_vm12, %v3316_v43, %v3317_v7  ;;  %v6163_v7 = vld [vmem:[#allocation2 + $0x8c] ss:$0 sps:$4 sm:$0x11]  }
 0x247   : > { %v5418_v40 = vpop.f32.mrb[39].mxu0  ;;  %4340 = vmatmul.mubr.bf16.gmra.mrb[92].mxu1 %v7334_v11  ;;  %v5152_v11 = vcombine.low %v1954_v22, %v7415_v6  ;;  %v7442_v26 = vsel %vm2360_vm12, %v3319_v51, %v3320_v0  ;;  %v6211_v0 = vld [vmem:[#allocation2 + $0x88] sm:$0xf]  ;;  %v2856_v14 = vrot.slane %v6163_v7, 1 }
 0x248   : > { %v7418_v12 = vadd.f32 %v5416_v10, %v7264_v30  ;;  %v5419_v3 = vadd.f32 %v5418_v40, %v5417_v19  ;;  %4347 = vmatprep.mubr.bf16.mxu1 %v7337_v8  ;;  %v5153_v8 = vcombine.low %v1955_v48, %v7422_v25  ;;  %v5155_v10 = vcombine.low %v1957_v29, %v7439_v34  ;;  %v7468_v43 = vld [vmem:[#allocation2 + $0xd4] ss:$0 sps:$4 sm:$0x11]   ;;  %v1958_v28 = vld [vmem:[#allocation2 + $0xcc] sm:$0xe] }
 0x249   : > { %v3322_v58 = vrot.slane %v5152_v11, 1  ;;  %v3332_v19 = vrot.slane %v7402_v55, 1  ;;  %v3328_v40 = vrot.slane %v5154_v63, 1  ;;  %v5103_v41 = vcombine.low %v1888_v60, %v6211_v0  ;;  %v1889_v63 = vld [vmem:[#allocation2 + $0x90] sm:$0xe] }
 0x24a   : > { %v7430_v30 = vadd.f32 %v5419_v3, %v7272_v53  ;;  %v3329_v53 = vrot.slane %v7392_v39, 1  ;;  %v3325_v59 = vrot.slane %v5153_v8, 1  ;;  %v3331_v48 = vrot.slane %v5155_v10, 1 }
 0x24b   : > { %v7453_v22 = vsel %vm2360_vm12, %v3322_v58, %v3323_v49  ;;  %v2685_v3 = vshll.u32 %v7328_v57, 16  ;;  %v5156_v51 = vcombine.low %v1958_v28, %v7478_v17  ;;  %v3335_v11 = vrot.slane %v7468_v43, 1  ;;  %v1917_v58 = vld [vmem:[#allocation2 + $0x9c] sm:$0xf] }
 0x24c   : > { %v7459_v42 = vsel %vm2360_vm12, %v3325_v59, %v3326_v23  ;;  %4501 = vmatmul.mubr.bf16.gmra.mrb[128].mxu0 %v7296_v46  ;;  %v7471_v5 = vsel %vm2360_vm12, %v3328_v40, %v3329_v53  ;;  %v2854_v46 = vsel %vm2360_vm12, %v7347_v56, %v2853_v24  ;;  %v7481_v1 = vsel %vm2360_vm12, %v3331_v48, %v3332_v19 }
 0x24d   : > { %4508 = vmatprep.mubr.bf16.mxu0 %v3140_v32  ;;  %v2692_v49 = vshll.u32 %v7074_v4, 16  ;;  %v3151_v29 = vrot.slane %v3149_v15, 1  ;;  %v3147_v57 = vor.u32 %v3146_v18, %v3142_v47  ;;  %v2683_v8 = vor.u32 %v2682_v33, %v2678_v62  ;;  %v6167_v32 = vld [vmem:[#allocation2 + $0x98] ss:$0 sps:$4 sm:$0x11]  }
 0x24e   : > { %v2687_v23 = vrot.slane %v2685_v3, 1  ;;  %v3334_v56 = vrot.slane %v5156_v51, 1  ;;  %v2855_v24 = vrot.slane %v5103_v41, 1  ;;  %v3161_v53 = vshll.u32 %v7371_v44, 16  ;;  %v6212_v44 = vld [vmem:[#allocation2 + $0x94] sm:$0xf] }
 0x24f   : > { %4348 = vmatmul.mubr.bf16.gmra.mrb[96].mxu1 %v7361_v52  ;;  %v3156_v52 = vshll.u32 %v7456_v36, 16  ;;  %v2690_v60 = vshrl.u32 %v7074_v4, 16  ;;  %v3154_v10 = vshrl.u32 %v7456_v36, 16  ;;  %v2694_v19 = vrot.slane %v2692_v49, 1  ;;  %v1890_v3 = vld [vmem:[#allocation2 + $0x9c] sm:$0xe] }
 0x250   : > { %4355 = vmatprep.mubr.bf16.mxu1 %v2854_v46  ;;  %v7490_v59 = vsel %vm2360_vm12, %v3334_v56, %v3335_v11  ;;  %v2697_v40 = vshll.u32 %v6163_v7, 16  ;;  %v3152_v62 = vsel %vm2103_vm11, %v3147_v57, %v3151_v29  ;;  %v2688_v33 = vsel %vm2103_vm11, %v2683_v8, %v2687_v23  ;;  %v1919_v29 = vld [vmem:[#allocation2 + $0xa8] sm:$0xf] }
 0x251   : > { %v3158_v15 = vrot.slane %v3156_v52, 1  ;;  %v7497_v47 = vcombine.low %v1917_v58, %v7415_v6  ;;  %v5104_v48 = vcombine.low %v1889_v63, %v6212_v44  ;;  %v2857_v4 = vsel %vm2360_vm12, %v2855_v24, %v2856_v14  ;;  %v6213_v6 = vld [vmem:[#allocation2 + $0xa0] sm:$0xf] }
 0x252   : > { %v2704_v18 = vshll.u32 %v7099_v31, 16  ;;  %v2695_v0 = vor.u32 %v2694_v19, %v2690_v60  ;;  %v2699_v41 = vrot.slane %v2697_v40, 1  ;;  %v5105_v51 = vcombine.low %v1890_v3, %v6213_v6  ;;  %v1891_v6 = vld [vmem:[#allocation2 + $0xa8] sm:$0xe] }
 0x253   : > { %v3159_v7 = vor.u32 %v3158_v15, %v3154_v10  ;;  %v3168_v46 = vshll.u32 %v7497_v47, 16  ;;  %v2858_v11 = vrot.slane %v5104_v48, 1  ;;  %v2859_v49 = vrot.slane %v6167_v32, 1  ;;  %v6170_v48 = vld [vmem:[#allocation2 + $0xa4] ss:$0 sps:$4 sm:$0x11]  }
 0x254   : > { %4509 = vmatmul.mubr.bf16.gmra.mrb[132].mxu0 %v7317_v13  ;;  %v3163_v13 = vrot.slane %v3161_v53, 1  ;;  %v3173_v8 = vshll.u32 %v7378_v45, 16  ;;  %v2702_v23 = vshrl.u32 %v7099_v31, 16  ;;  %v2706_v56 = vrot.slane %v2704_v18, 1 }
 0x255   : > { %4516 = vmatprep.mubr.bf16.mxu0 %v3152_v62  ;;  %v2700_v53 = vsel %vm2103_vm11, %v2695_v0, %v2699_v41  ;;  %v3166_v60 = vshrl.u32 %v7497_v47, 16  ;;  %v3170_v40 = vrot.slane %v3168_v46, 1  ;;  %v2709_v62 = vshll.u32 %v6167_v32, 16 }
 0x256   : > { %v3164_v63 = vsel %vm2103_vm11, %v3159_v7, %v3163_v13  ;;  %v7509_v45 = vcombine.low %v1919_v29, %v7422_v25  ;;  %v2860_v44 = vsel %vm2360_vm12, %v2858_v11, %v2859_v49  ;;  %v2716_v3 = vshll.u32 %v7131_v2, 16 }
 0x257   : > { %4356 = vmatmul.mubr.bf16.gmra.mrb[100].mxu1 %v2688_v33  ;;  %v3175_v7 = vrot.slane %v3173_v8, 1  ;;  %v3171_v32 = vor.u32 %v3170_v40, %v3166_v60  ;;  %v2707_v13 = vor.u32 %v2706_v56, %v2702_v23  ;;  %v2711_v25 = vrot.slane %v2709_v62, 1 }
 0x258   : > { %4363 = vmatprep.mubr.bf16.mxu1 %v2857_v4  ;;  %v3180_v0 = vshll.u32 %v7509_v45, 16  ;;  %v2861_v41 = vrot.slane %v5105_v51, 1  ;;  %v2862_v46 = vrot.slane %v6170_v48, 1  ;;  %v3185_v11 = vshll.u32 %v7386_v9, 16 }
 0x259   : > { %v3178_v49 = vshrl.u32 %v7509_v45, 16  ;;  %v2714_v29 = vshrl.u32 %v7131_v2, 16  ;;  %v3176_v23 = vsel %vm2103_vm11, %v3171_v32, %v3175_v7  ;;  %v2712_v56 = vsel %vm2103_vm11, %v2707_v13, %v2711_v25 }
 0x25a   : > { %v5308_v28 = vpop.f32.mrb[4].mxu1  ;;  %v2863_v2 = vsel %vm2360_vm12, %v2861_v41, %v2862_v46  ;;  %v1892_v41 = vld [vmem:[#allocation2 + $0xb4] sm:$0xe] }
 0x25b   : > { %v5309_v52 = vpop.f32.mrb[5].mxu1 }
 0x25c   : > { %v5310_v24 = vadd.f32 %v5309_v52, %v5308_v28  ;;  %v5311_v14 = vpop.f32.mrb[6].mxu1  ;;  %4517 = vmatmul.mubr.bf16.gmra.mrb[136].mxu0 %v7357_v16  ;;  %v1921_v28 = vld [vmem:[#allocation2 + $0xb4] sm:$0xf]  ;;  %v2718_v52 = vrot.slane %v2716_v3, 1 }
 0x25d   : > { %v5420_v57 = vpop.f32.mrb[40].mxu0  ;;  %v5312_v10 = vpop.f32.mrb[7].mxu1  ;;  %4524 = vmatprep.mubr.bf16.mxu0 %v3164_v63  ;;  %v7525_v51 = vcombine.low %v1921_v28, %v7432_v35  ;;  %v6174_v63 = vld [vmem:[#allocation2 + $0xb0] ss:$0 sps:$4 sm:$0x11]  }
 0x25e   : > { %v5421_v58 = vpop.f32.mrb[41].mxu0  ;;  %v5313_v31 = vadd.f32 %v5312_v10, %v5311_v14  ;;  %v7928_v10 = vld [vmem:[#allocation10_spill] sm:$0xff]  ;;  %v2719_v40 = vor.u32 %v2718_v52, %v2714_v29  ;;  %v2865_v32 = vrot.slane %v6174_v63, 1  ;;  %v2733_v29 = vshll.u32 %v6174_v63, 16 }
 0x25f   : > { %v5422_v15 = vadd.f32 %v5421_v58, %v5420_v57  ;;  %v5423_v19 = vpop.f32.mrb[42].mxu0  ;;  %4364 = vmatmul.mubr.bf16.gmra.mrb[104].mxu1 %v2700_v53  ;;  %v2721_v57 = vshll.u32 %v6170_v48, 16  ;;  %v6214_v58 = vld [vmem:[#allocation2 + $0xac] sm:$0xf]  ;;  %v3192_v48 = vshll.u32 %v7525_v51, 16  ;;  %v2726_v25 = vshrl.u32 %v7928_v10, 16 }
 0x260   : > { %v5424_v33 = vpop.f32.mrb[43].mxu0  ;;  %4371 = vmatprep.mubr.bf16.mxu1 %v2860_v44  ;;  %v5106_v9 = vcombine.low %v1891_v6, %v6214_v58  ;;  %v3187_v44 = vrot.slane %v3185_v11, 1  ;;  %v3190_v11 = vshrl.u32 %v7525_v51, 16  ;;  %v6215_v58 = vld [vmem:[#allocation2 + $0xb8] sm:$0xf] }
 0x261   : > { %v7512_v4 = vadd.f32 %v5422_v15, %v5310_v24  ;;  %v5425_v18 = vadd.f32 %v5424_v33, %v5423_v19  ;;  %v3182_v24 = vrot.slane %v3180_v0, 1  ;;  %v2723_v62 = vrot.slane %v2721_v57, 1  ;;  %v1923_v0 = vld [vmem:[#allocation2 + $0xc0] sm:$0xf] }
 0x262   : > { %v2864_v7 = vrot.slane %v5106_v9, 1  ;;  %v5107_v9 = vcombine.low %v1892_v41, %v6215_v58  ;;  %v6177_v63 = vld [vmem:[#allocation2 + $0xbc] ss:$0 sps:$4 sm:$0x11]  }
 0x263   : > { %v7515_v16 = vadd.f32 %v5425_v18, %v5313_v31  ;;  %v3183_v33 = vor.u32 %v3182_v24, %v3178_v49  ;;  %v2724_v52 = vsel %vm2103_vm11, %v2719_v40, %v2723_v62  ;;  %v3197_v49 = vshll.u32 %v7392_v39, 16  ;;  %v1925_v40 = vld [vmem:[#allocation2 + $0xcc] sm:$0xf]  ;;  %v6181_v58 = vld [vmem:[#allocation2 + $0xc8] ss:$0 sps:$4 sm:$0x11]  }
 0x264   : > { %4525 = vmatmul.mubr.bf16.gmra.mrb[140].mxu0 %v7456_v36  ;;  %v2728_v36 = vshll.u32 %v7928_v10, 16  ;;  %v7541_v24 = vcombine.low %v1923_v0, %v7439_v34 }
 0x265   : > { %v5314_v8 = vpop.f32.mrb[8].mxu1  ;;  %4532 = vmatprep.mubr.bf16.mxu0 %v3176_v23  ;;  %v3194_v23 = vrot.slane %v3192_v48, 1  ;;  %v3199_v62 = vrot.slane %v3197_v49, 1 }
 0x266   : > { %v5315_v14 = vpop.f32.mrb[9].mxu1  ;;  %v2730_v6 = vrot.slane %v2728_v36, 1  ;;  %v7929_v36 = vld [vmem:[#allocation11_spill] sm:$0xff]  ;;  %v3202_v0 = vshrl.u32 %v7541_v24, 16 }
 0x267   : > { %4372 = vmatmul.mubr.bf16.gmra.mrb[108].mxu1 %v2712_v56  ;;  %v5316_v53 = vadd.f32 %v5315_v14, %v5314_v8  ;;  %v5317_v60 = vpop.f32.mrb[10].mxu1  ;;  %v3188_v8 = vsel %vm2103_vm11, %v3183_v33, %v3187_v44  ;;  %v3195_v34 = vor.u32 %v3194_v23, %v3190_v11  ;;  %v2867_v33 = vrot.slane %v5107_v9, 1  ;;  %v6216_v23 = vld [vmem:[#allocation2 + $0xc4] sm:$0xf] }
 0x268   : > { %4379 = vmatprep.mubr.bf16.mxu1 %v2863_v2  ;;  %v5318_v19 = vpop.f32.mrb[11].mxu1  ;;  %v2866_v2 = vsel %vm2360_vm12, %v2864_v7, %v2865_v32  ;;  %v2868_v44 = vrot.slane %v6177_v63, 1  ;;  %v3209_v7 = vshll.u32 %v7402_v55, 16 }
 0x269   : > { %v5426_v15 = vpop.f32.mrb[44].mxu0  ;;  %v5319_v35 = vadd.f32 %v5318_v19, %v5317_v60  ;;  %v2735_v60 = vrot.slane %v2733_v29, 1  ;;  %v2745_v29 = vshll.u32 %v6177_v63, 16  ;;  %v3200_v11 = vsel %vm2103_vm11, %v3195_v34, %v3199_v62 }
 0x26a   : > { %v5427_v31 = vpop.f32.mrb[45].mxu0 }
 0x26b   : > { %v5428_v18 = vadd.f32 %v5427_v31, %v5426_v15  ;;  %v5429_v3 = vpop.f32.mrb[46].mxu0  ;;  %v2740_v15 = vshll.u32 %v7929_v36, 16  ;;  %v3204_v31 = vshll.u32 %v7541_v24, 16 }
 0x26c   : > { %v5430_v13 = vpop.f32.mrb[47].mxu0  ;;  %4533 = vmatmul.mubr.bf16.gmra.mrb[144].mxu0 %v7497_v47  ;;  %v2731_v47 = vor.u32 %v2730_v6, %v2726_v25  ;;  %v7549_v25 = vcombine.low %v1925_v40, %v7478_v17  ;;  %v3211_v40 = vrot.slane %v3209_v7, 1 }
 0x26d   : > { %v7531_v46 = vadd.f32 %v5428_v18, %v5316_v53  ;;  %v5431_v28 = vadd.f32 %v5430_v13, %v5429_v3  ;;  %v5320_v57 = vpop.f32.mrb[12].mxu1  ;;  %4540 = vmatprep.mubr.bf16.mxu0 %v3188_v8  ;;  %v1893_v18 = vld [vmem:[#allocation2 + $0xc0] sm:$0xe]  ;;  %v2742_v6 = vrot.slane %v2740_v15, 1  ;;  %v3206_v49 = vrot.slane %v3204_v31, 1 }
 0x26e   : > { %v5321_v14 = vpop.f32.mrb[13].mxu1  ;;  %v2736_v3 = vsel %vm2103_vm11, %v2731_v47, %v2735_v60  ;;  %v5108_v17 = vcombine.low %v1893_v18, %v6216_v23  ;;  %v7930_v47 = vld [vmem:[#allocation12_spill] sm:$0xff]  ;;  %v2871_v31 = vrot.slane %v6181_v58, 1  ;;  %v3221_v18 = vshll.u32 %v7468_v43, 16 }
 0x26f   : > { %v7538_v56 = vadd.f32 %v5431_v28, %v5319_v35  ;;  %4380 = vmatmul.mubr.bf16.gmra.mrb[112].mxu1 %v2724_v52  ;;  %v5322_v39 = vadd.f32 %v5321_v14, %v5320_v57  ;;  %v5323_v53 = vpop.f32.mrb[14].mxu1  ;;  %v2738_v28 = vshrl.u32 %v7929_v36, 16  ;;  %v2869_v14 = vsel %vm2360_vm12, %v2867_v33, %v2868_v44 }
 0x270   : > { %4387 = vmatprep.mubr.bf16.mxu1 %v2866_v2  ;;  %v5324_v10 = vpop.f32.mrb[15].mxu1  ;;  %v3207_v15 = vor.u32 %v3206_v49, %v3202_v0  ;;  %v2870_v62 = vrot.slane %v5108_v17, 1  ;;  %v6217_v49 = vld [vmem:[#allocation2 + $0x1c] sm:$0xf] }
 0x271   : > { %v5325_v19 = vadd.f32 %v5324_v10, %v5323_v53  ;;  %v3216_v53 = vshll.u32 %v7549_v25, 16  ;;  %v2743_v60 = vor.u32 %v2742_v6, %v2738_v28  ;;  %v2747_v10 = vrot.slane %v2745_v29, 1 }
 0x272   : > { %v5432_v35 = vpop.f32.mrb[48].mxu0  ;;  %v3212_v7 = vsel %vm2103_vm11, %v3207_v15, %v3211_v40  ;;  %v2757_v29 = vshll.u32 %v6181_v58, 16  ;;  %v2872_v43 = vsel %vm2360_vm12, %v2870_v62, %v2871_v31 }
 0x273   : > { %v5433_v48 = vpop.f32.mrb[49].mxu0 }
 0x274   : > { %v5434_v32 = vadd.f32 %v5433_v48, %v5432_v35  ;;  %v5435_v13 = vpop.f32.mrb[50].mxu0  ;;  %4541 = vmatmul.mubr.bf16.gmra.mrb[148].mxu0 %v7509_v45  ;;  %v3214_v48 = vshrl.u32 %v7549_v25, 16 }
 0x275   : > { %v5436_v41 = vpop.f32.mrb[51].mxu0  ;;  %v5326_v52 = vpop.f32.mrb[16].mxu1  ;;  %4548 = vmatprep.mubr.bf16.mxu0 %v3200_v11 }
 0x276   : > { %v7555_v57 = vadd.f32 %v5434_v32, %v5322_v39  ;;  %v5437_v55 = vadd.f32 %v5436_v41, %v5435_v13  ;;  %v5327_v8 = vpop.f32.mrb[17].mxu1  ;;  %v2752_v39 = vshll.u32 %v7930_v47, 16  ;;  %v2750_v13 = vshrl.u32 %v7930_v47, 16  ;;  %v6218_v47 = vld [vmem:[#allocation2 + $0x20] ss:$0 sps:$4 sm:$0x11]  }
 0x277   : > { %4388 = vmatmul.mubr.bf16.gmra.mrb[116].mxu1 %v2736_v3  ;;  %v5328_v9 = vadd.f32 %v5327_v8, %v5326_v52  ;;  %v5329_v2 = vpop.f32.mrb[18].mxu1  ;;  %v2748_v3 = vsel %vm2103_vm11, %v2743_v60, %v2747_v10  ;;  %v1943_v52 = vld [vmem:[#allocation2 + $0x18] sm:$0xe] }
 0x278   : > { %4395 = vmatprep.mubr.bf16.mxu1 %v2869_v14  ;;  %v7558_v63 = vadd.f32 %v5437_v55, %v5325_v19  ;;  %v5330_v45 = vpop.f32.mrb[19].mxu1  ;;  %v3218_v19 = vrot.slane %v3216_v53, 1  ;;  %v2754_v41 = vrot.slane %v2752_v39, 1  ;;  %v5141_v55 = vcombine.low %v1943_v52, %v6217_v49 }
 0x279   : > { %v5331_v36 = vadd.f32 %v5330_v45, %v5329_v2  ;;  %v3223_v14 = vrot.slane %v3221_v18, 1  ;;  %v2759_v53 = vrot.slane %v2757_v29, 1  ;;  %v3290_v39 = vrot.slane %v6218_v47, 1 }
 0x27a   : > { %v5438_v34 = vpop.f32.mrb[52].mxu0  ;;  %v2755_v45 = vor.u32 %v2754_v41, %v2750_v13  ;;  %v3289_v58 = vrot.slane %v5141_v55, 1 }
 0x27b   : > { %v5439_v35 = vpop.f32.mrb[53].mxu0 }
 0x27c   : > { %v5440_v33 = vadd.f32 %v5439_v35, %v5438_v34  ;;  %v5441_v44 = vpop.f32.mrb[54].mxu0  ;;  %4549 = vmatmul.mubr.bf16.gmra.mrb[152].mxu0 %v7525_v51  ;;  %v3219_v51 = vor.u32 %v3218_v19, %v3214_v48  ;;  %v3291_v31 = vsel %vm2360_vm12, %v3289_v58, %v3290_v39 }
 0x27d   : > { %v5442_v32 = vpop.f32.mrb[55].mxu0  ;;  %4556 = vmatprep.mubr.bf16.mxu0 %v3212_v7  ;;  %v6219_v7 = vld [vmem:[#allocation2 + $0x4c] sm:$0xf] }
 0x27e   : > { %v5332_v28 = vpop.f32.mrb[20].mxu1  ;;  %v7568_v0 = vadd.f32 %v5440_v33, %v5328_v9  ;;  %v5443_v6 = vadd.f32 %v5442_v32, %v5441_v44  ;;  %v3224_v10 = vsel %vm2103_vm11, %v3219_v51, %v3223_v14 }
 0x27f   : > { %v5333_v11 = vpop.f32.mrb[21].mxu1  ;;  %4396 = vmatmul.mubr.bf16.gmra.mrb[120].mxu1 %v2748_v3 }
 0x280   : > { %v5334_v8 = vadd.f32 %v5333_v11, %v5332_v28  ;;  %v5335_v23 = vpop.f32.mrb[22].mxu1  ;;  %4403 = vmatprep.mubr.bf16.mxu1 %v2872_v43  ;;  %v7571_v17 = vadd.f32 %v5443_v6, %v5331_v36  ;;  %v2760_v36 = vsel %vm2103_vm11, %v2755_v45, %v2759_v53 }
 0x281   : > { %v5336_v2 = vpop.f32.mrb[23].mxu1 }
 0x282   : > { %v5337_v9 = vadd.f32 %v5336_v2, %v5335_v23 }
 0x283   : > { %v5444_v60 = vpop.f32.mrb[56].mxu0 }
 0x284   : > { %v5445_v15 = vpop.f32.mrb[57].mxu0  ;;  %4557 = vmatmul.mubr.bf16.gmra.mrb[156].mxu0 %v7541_v24  ;;  %v1947_v24 = vld [vmem:[#allocation2 + $0x48] sm:$0xe] }
 0x285   : > { %v5446_v40 = vadd.f32 %v5445_v15, %v5444_v60  ;;  %v5447_v34 = vpop.f32.mrb[58].mxu0  ;;  %4564 = vmatprep.mubr.bf16.mxu0 %v3224_v10  ;;  %v5145_v6 = vcombine.low %v1947_v24, %v6219_v7 }
 0x286   : > { %v5448_v62 = vpop.f32.mrb[59].mxu0 }
 0x287   : > { %4404 = vmatmul.mubr.bf16.gmra.mrb[124].mxu1 %v2760_v36  ;;  %v7577_v35 = vadd.f32 %v5446_v40, %v5334_v8  ;;  %v5449_v33 = vadd.f32 %v5448_v62, %v5447_v34  ;;  %v3301_v55 = vrot.slane %v5145_v6, 1  ;;  %v6220_v8 = vld [vmem:[#allocation2 + $0x50] ss:$0 sps:$4 sm:$0x11]  }
 0x288   : > { %5816 = vmatprep.mubr.bf16.mxu1 %v3291_v31  ;;  %v3302_v23 = vrot.slane %v6220_v8, 1 }
 0x289   : > { %v5338_v44 = vpop.f32.mrb[24].mxu1  ;;  %v7579_v48 = vadd.f32 %v5449_v33, %v5337_v9 }
 0x28a   : > { %v5339_v19 = vpop.f32.mrb[25].mxu1 }
 0x28b   : > { %v5340_v18 = vadd.f32 %v5339_v19, %v5338_v44  ;;  %v5341_v3 = vpop.f32.mrb[26].mxu1 }
 0x28c   : > { %v5342_v32 = vpop.f32.mrb[27].mxu1  ;;  %4565 = vmatmul.mubr.bf16.gmra.mrb[160].mxu0 %v7549_v25 }
 0x28d   : > { %v5343_v13 = vadd.f32 %v5342_v32, %v5341_v3 }
 0x28f   : > { %v5450_v41 = vpop.f32.mrb[60].mxu0  ;;  %5817 = vmatmul.mubr.bf16.vlgmr.msra.gmra.mrb[128].mxu1 %v7366_v61 }
 0x290   : > { %v5451_v28 = vpop.f32.mrb[61].mxu0  ;;  %5820 = vmatprep.mubr.bf16.mxu1 %v7374_v50  ;;  %v3303_v50 = vsel %vm2360_vm12, %v3301_v55, %v3302_v23 }
 0x291   : > { %v5452_v29 = vadd.f32 %v5451_v28, %v5450_v41  ;;  %v5453_v52 = vpop.f32.mrb[62].mxu0 }
 0x292   : > { %v5454_v11 = vpop.f32.mrb[63].mxu0 }
 0x293   : > { %v7584_v43 = vadd.f32 %v5452_v29, %v5340_v18  ;;  %v5455_v49 = vadd.f32 %v5454_v11, %v5453_v52  ;;  %v5344_v51 = vpop.f32.mrb[28].mxu1 }
 0x294   : > { %v5345_v25 = vpop.f32.mrb[29].mxu1 }
 0x295   : > { %v7586_v14 = vadd.f32 %v5455_v49, %v5343_v13  ;;  %v5346_v2 = vadd.f32 %v5345_v25, %v5344_v51  ;;  %v5347_v61 = vpop.f32.mrb[30].mxu1 }
 0x296   : > { %v5348_v9 = vpop.f32.mrb[31].mxu1 }
 0x297   : > { %5821 = vmatmul.mubr.bf16.gmra.mrb[132].mxu1 %v7381_v27  ;;  %v5349_v45 = vadd.f32 %v5348_v9, %v5347_v61  ;;  %v5456_v53 = vpop.f32.mrb[64].mxu0 }
 0x298   : > { %5824 = vmatprep.mubr.bf16.mxu1 %v3303_v50  ;;  %v5457_v58 = vpop.f32.mrb[65].mxu0 }
 0x299   : > { %v5458_v47 = vadd.f32 %v5457_v58, %v5456_v53  ;;  %v5459_v39 = vpop.f32.mrb[66].mxu0 }
 0x29a   : > { %v5460_v10 = vpop.f32.mrb[67].mxu0 }
 0x29b   : > { %v5350_v60 = vpop.f32.mrb[32].mxu1  ;;  %v7590_v40 = vadd.f32 %v5458_v47, %v5346_v2  ;;  %v5461_v34 = vadd.f32 %v5460_v10, %v5459_v39 }
 0x29c   : > { %v5351_v15 = vpop.f32.mrb[33].mxu1 }
 0x29d   : > { %v5352_v36 = vadd.f32 %v5351_v15, %v5350_v60  ;;  %v5353_v62 = vpop.f32.mrb[34].mxu1  ;;  %v7592_v33 = vadd.f32 %v5461_v34, %v5349_v45 }
 0x29e   : > { %v5354_v31 = vpop.f32.mrb[35].mxu1 }
 0x29f   : > { %5825 = vmatmul.mubr.bf16.gmra.mrb[136].mxu1 %v7399_v21  ;;  %v5355_v27 = vadd.f32 %v5354_v31, %v5353_v62 }
 0x2a0   : > { %5828 = vmatprep.mubr.bf16.mxu1 %v7405_v20 }
 0x2a6   : > { %v5462_v44 = vpop.f32.mrb[68].mxu0 }
 0x2a7   : > { %v5463_v19 = vpop.f32.mrb[69].mxu0  ;;  %5829 = vmatmul.mubr.bf16.gmra.mrb[140].mxu1 %v7411_v37 }
 0x2a8   : > { %v5464_v18 = vadd.f32 %v5463_v19, %v5462_v44  ;;  %v5465_v3 = vpop.f32.mrb[70].mxu0  ;;  %5832 = vmatprep.mubr.bf16.mxu1 %v7425_v54 }
 0x2a9   : > { %v5466_v32 = vpop.f32.mrb[71].mxu0  ;;  %v5356_v13 = vpop.f32.mrb[36].mxu1 }
 0x2aa   : > { %v7598_v24 = vadd.f32 %v5464_v18, %v5352_v36  ;;  %v5467_v41 = vadd.f32 %v5466_v32, %v5465_v3  ;;  %v5357_v28 = vpop.f32.mrb[37].mxu1 }
 0x2ab   : > { %v5358_v7 = vadd.f32 %v5357_v28, %v5356_v13  ;;  %v5359_v6 = vpop.f32.mrb[38].mxu1 }
 0x2ac   : > { %v7600_v21 = vadd.f32 %v5467_v41, %v5355_v27  ;;  %v5360_v29 = vpop.f32.mrb[39].mxu1 }
 0x2ad   : > { %v5361_v20 = vadd.f32 %v5360_v29, %v5359_v6 }
 0x2af   : > { %5833 = vmatmul.mubr.bf16.gmra.mrb[144].mxu1 %v7435_v38  ;;  %v5468_v37 = vpop.f32.mrb[72].mxu0 }
 0x2b0   : > { %5836 = vmatprep.mubr.bf16.mxu1 %v7442_v26  ;;  %v5469_v11 = vpop.f32.mrb[73].mxu0 }
 0x2b1   : > { %v5362_v52 = vpop.f32.mrb[40].mxu1  ;;  %v5470_v49 = vadd.f32 %v5469_v11, %v5468_v37  ;;  %v5471_v55 = vpop.f32.mrb[74].mxu0 }
 0x2b2   : > { %v5363_v54 = vpop.f32.mrb[41].mxu1  ;;  %v5472_v51 = vpop.f32.mrb[75].mxu0 }
 0x2b3   : > { %v5364_v8 = vadd.f32 %v5363_v54, %v5362_v52  ;;  %v5365_v23 = vpop.f32.mrb[42].mxu1  ;;  %v7604_v2 = vadd.f32 %v5470_v49, %v5358_v7  ;;  %v5473_v61 = vadd.f32 %v5472_v51, %v5471_v55 }
 0x2b4   : > { %v5366_v25 = vpop.f32.mrb[43].mxu1 }
 0x2b5   : > { %v5367_v9 = vadd.f32 %v5366_v25, %v5365_v23  ;;  %v7606_v50 = vadd.f32 %v5473_v61, %v5361_v20 }
 0x2b7   : > { %5837 = vmatmul.mubr.bf16.gmra.mrb[148].mxu1 %v7453_v22  ;;  %v5474_v38 = vpop.f32.mrb[76].mxu0 }
 0x2b8   : > { %5840 = vmatprep.mubr.bf16.mxu1 %v7459_v42  ;;  %v5475_v26 = vpop.f32.mrb[77].mxu0 }
 0x2b9   : > { %v5476_v53 = vadd.f32 %v5475_v26, %v5474_v38  ;;  %v5477_v58 = vpop.f32.mrb[78].mxu0 }
 0x2ba   : > { %v5368_v45 = vpop.f32.mrb[44].mxu1  ;;  %v5478_v39 = vpop.f32.mrb[79].mxu0 }
 0x2bb   : > { %v5369_v47 = vpop.f32.mrb[45].mxu1  ;;  %v7610_v15 = vadd.f32 %v5476_v53, %v5364_v8  ;;  %v5479_v34 = vadd.f32 %v5478_v39, %v5477_v58 }
 0x2bc   : > { %v5370_v60 = vadd.f32 %v5369_v47, %v5368_v45  ;;  %v5371_v10 = vpop.f32.mrb[46].mxu1 }
 0x2bd   : > { %v5372_v36 = vpop.f32.mrb[47].mxu1  ;;  %v7612_v31 = vadd.f32 %v5479_v34, %v5367_v9 }
 0x2be   : > { %v5373_v62 = vadd.f32 %v5372_v36, %v5371_v10 }
 0x2bf   : > { %5841 = vmatmul.mubr.bf16.gmra.mrb[152].mxu1 %v7471_v5  ;;  %v5480_v22 = vpop.f32.mrb[80].mxu0 }
 0x2c0   : > { %5844 = vmatprep.mubr.bf16.mxu1 %v7481_v1  ;;  %v5481_v42 = vpop.f32.mrb[81].mxu0 }
 0x2c1   : > { %v5482_v44 = vadd.f32 %v5481_v42, %v5480_v22  ;;  %v5483_v19 = vpop.f32.mrb[82].mxu0 }
 0x2c2   : > { %v5374_v27 = vpop.f32.mrb[48].mxu1  ;;  %v5484_v3 = vpop.f32.mrb[83].mxu0 }
 0x2c3   : > { %v5375_v18 = vpop.f32.mrb[49].mxu1  ;;  %v7616_v41 = vadd.f32 %v5482_v44, %v5370_v60  ;;  %v5485_v28 = vadd.f32 %v5484_v3, %v5483_v19 }
 0x2c4   : > { %v5376_v32 = vadd.f32 %v5375_v18, %v5374_v27  ;;  %v5377_v13 = vpop.f32.mrb[50].mxu1 }
 0x2c5   : > { %v5378_v7 = vpop.f32.mrb[51].mxu1  ;;  %v7618_v29 = vadd.f32 %v5485_v28, %v5373_v62 }
 0x2c6   : > { %v5379_v6 = vadd.f32 %v5378_v7, %v5377_v13 }
 0x2c7   : > { %5845 = vmatmul.mubr.bf16.gmra.mrb[156].mxu1 %v7490_v59  ;;  %v5486_v5 = vpop.f32.mrb[84].mxu0 }
 0x2c8   : > { %v5487_v1 = vpop.f32.mrb[85].mxu0 }
 0x2c9   : > { %v5488_v37 = vadd.f32 %v5487_v1, %v5486_v5  ;;  %v5489_v52 = vpop.f32.mrb[86].mxu0 }
 0x2ca   : > { %v5380_v20 = vpop.f32.mrb[52].mxu1  ;;  %v5490_v54 = vpop.f32.mrb[87].mxu0 }
 0x2cb   : > { %v5381_v11 = vpop.f32.mrb[53].mxu1  ;;  %v7621_v8 = vadd.f32 %v5488_v37, %v5376_v32  ;;  %v5491_v23 = vadd.f32 %v5490_v54, %v5489_v52 }
 0x2cc   : > { %v5382_v49 = vadd.f32 %v5381_v11, %v5380_v20  ;;  %v5383_v55 = vpop.f32.mrb[54].mxu1 }
 0x2cd   : > { %v5384_v51 = vpop.f32.mrb[55].mxu1  ;;  %v7623_v61 = vadd.f32 %v5491_v23, %v5379_v6 }
 0x2ce   : > { %v5385_v25 = vadd.f32 %v5384_v51, %v5383_v55 }
 0x2cf   : > { %v5492_v9 = vpop.f32.mrb[88].mxu0 }
 0x2d0   : > { %v5493_v38 = vpop.f32.mrb[89].mxu0 }
 0x2d1   : > { %v5494_v59 = vadd.f32 %v5493_v38, %v5492_v9  ;;  %v5495_v45 = vpop.f32.mrb[90].mxu0 }
 0x2d2   : > { %v5386_v26 = vpop.f32.mrb[56].mxu1  ;;  %v5496_v58 = vpop.f32.mrb[91].mxu0 }
 0x2d3   : > { %v5387_v53 = vpop.f32.mrb[57].mxu1  ;;  %v7625_v60 = vadd.f32 %v5494_v59, %v5382_v49  ;;  %v5497_v10 = vadd.f32 %v5496_v58, %v5495_v45 }
 0x2d4   : > { %v5388_v47 = vadd.f32 %v5387_v53, %v5386_v26  ;;  %v5389_v39 = vpop.f32.mrb[58].mxu1 }
 0x2d5   : > { %v5390_v34 = vpop.f32.mrb[59].mxu1  ;;  %v7627_v62 = vadd.f32 %v5497_v10, %v5385_v25 }
 0x2d6   : > { %v5391_v36 = vadd.f32 %v5390_v34, %v5389_v39 }
 0x2d7   : > { %v5498_v22 = vpop.f32.mrb[92].mxu0 }
 0x2d8   : > { %v5499_v42 = vpop.f32.mrb[93].mxu0 }
 0x2d9   : > { %v5500_v44 = vadd.f32 %v5499_v42, %v5498_v22  ;;  %v5501_v19 = vpop.f32.mrb[94].mxu0 }
 0x2da   : > { %v5392_v27 = vpop.f32.mrb[60].mxu1  ;;  %v5502_v3 = vpop.f32.mrb[95].mxu0 }
 0x2db   : > { %v5393_v18 = vpop.f32.mrb[61].mxu1  ;;  %v7629_v28 = vadd.f32 %v5500_v44, %v5388_v47  ;;  %v5503_v7 = vadd.f32 %v5502_v3, %v5501_v19 }
 0x2dc   : > { %v5394_v32 = vadd.f32 %v5393_v18, %v5392_v27  ;;  %v5395_v13 = vpop.f32.mrb[62].mxu1 }
 0x2dd   : > { %v5396_v6 = vpop.f32.mrb[63].mxu1  ;;  %v7631_v1 = vadd.f32 %v5503_v7, %v5391_v36 }
 0x2de   : > { %v5397_v5 = vadd.f32 %v5396_v6, %v5395_v13 }
 0x2df   : > { %v5504_v20 = vpop.f32.mrb[96].mxu0 }
 0x2e0   : > { %v5505_v37 = vpop.f32.mrb[97].mxu0 }
 0x2e1   : > { %v5506_v11 = vadd.f32 %v5505_v37, %v5504_v20  ;;  %v5507_v54 = vpop.f32.mrb[98].mxu0 }
 0x2e2   : > { %v5526_v52 = vpop.f32.mrb[64].mxu1  ;;  %v5508_v55 = vpop.f32.mrb[99].mxu0 }
 0x2e3   : > { %v5527_v49 = vpop.f32.mrb[65].mxu1  ;;  %v7633_v25 = vadd.f32 %v5506_v11, %v5394_v32  ;;  %v5509_v9 = vadd.f32 %v5508_v55, %v5507_v54 }
 0x2e4   : > { %v5528_v23 = vadd.f32 %v5527_v49, %v5526_v52  ;;  %v5529_v51 = vpop.f32.mrb[66].mxu1 }
 0x2e5   : > { %v5530_v38 = vpop.f32.mrb[67].mxu1  ;;  %v7636_v45 = vadd.f32 %v5509_v9, %v5397_v5 }
 0x2e6   : > { %v4286_v26 = vadd.f32 %v5528_v23, %v7418_v12  ;;  %v5531_v59 = vadd.f32 %v5530_v38, %v5529_v51 }
 0x2e7   : > { %v5638_v58 = vpop.f32.mrb[100].mxu0 }
 0x2e8   : > { %v4289_v53 = vadd.f32 %v5531_v59, %v7430_v30  ;;  %v5639_v47 = vpop.f32.mrb[101].mxu0 }
 0x2e9   : > { %v5640_v10 = vadd.f32 %v5639_v47, %v5638_v58  ;;  %v5641_v34 = vpop.f32.mrb[102].mxu0 }
 0x2ea   : > { %v5532_v39 = vpop.f32.mrb[68].mxu1  ;;  %v5642_v22 = vpop.f32.mrb[103].mxu0 }
 0x2eb   : > { %v5533_v36 = vpop.f32.mrb[69].mxu1  ;;  %v5643_v44 = vadd.f32 %v5642_v22, %v5641_v34  ;;  %v7639_v18 = vadd.f32 %v5640_v10, %v4286_v26 }
 0x2ec   : > { %v5534_v42 = vadd.f32 %v5533_v36, %v5532_v39  ;;  %v5535_v27 = vpop.f32.mrb[70].mxu1 }
 0x2ed   : > { %v5536_v19 = vpop.f32.mrb[71].mxu1  ;;  %v7642_v32 = vadd.f32 %v5643_v44, %v4289_v53 }
 0x2ee   : > { %v4294_v12 = vadd.f32 %v5534_v42, %v7512_v4  ;;  %v5537_v3 = vadd.f32 %v5536_v19, %v5535_v27 }
 0x2ef   : > { %v5644_v13 = vpop.f32.mrb[104].mxu0 }
 0x2f0   : > { %v4297_v30 = vadd.f32 %v5537_v3, %v7515_v16  ;;  %v5645_v7 = vpop.f32.mrb[105].mxu0 }
 0x2f1   : > { %v5646_v5 = vadd.f32 %v5645_v7, %v5644_v13  ;;  %v5647_v20 = vpop.f32.mrb[106].mxu0 }
 0x2f2   : > { %v5538_v6 = vpop.f32.mrb[72].mxu1  ;;  %v5648_v52 = vpop.f32.mrb[107].mxu0 }
 0x2f3   : > { %v5539_v37 = vpop.f32.mrb[73].mxu1  ;;  %v5649_v49 = vadd.f32 %v5648_v52, %v5647_v20  ;;  %v7645_v23 = vadd.f32 %v5646_v5, %v4294_v12 }
 0x2f4   : > { %v5540_v11 = vadd.f32 %v5539_v37, %v5538_v6  ;;  %v5541_v54 = vpop.f32.mrb[74].mxu1 }
 0x2f5   : > { %v5542_v55 = vpop.f32.mrb[75].mxu1  ;;  %v7648_v9 = vadd.f32 %v5649_v49, %v4297_v30 }
 0x2f6   : > { %v4302_v4 = vadd.f32 %v5540_v11, %v7531_v46  ;;  %v5543_v51 = vadd.f32 %v5542_v55, %v5541_v54 }
 0x2f7   : > { %v5650_v38 = vpop.f32.mrb[108].mxu0 }
 0x2f8   : > { %v4305_v16 = vadd.f32 %v5543_v51, %v7538_v56  ;;  %v5651_v26 = vpop.f32.mrb[109].mxu0 }
 0x2f9   : > { %v5652_v53 = vadd.f32 %v5651_v26, %v5650_v38  ;;  %v5653_v58 = vpop.f32.mrb[110].mxu0 }
 0x2fa   : > { %v5544_v59 = vpop.f32.mrb[76].mxu1  ;;  %v5654_v39 = vpop.f32.mrb[111].mxu0 }
 0x2fb   : > { %v5545_v47 = vpop.f32.mrb[77].mxu1  ;;  %v5655_v36 = vadd.f32 %v5654_v39, %v5653_v58  ;;  %v7651_v42 = vadd.f32 %v5652_v53, %v4302_v4 }
 0x2fc   : > { %v5546_v10 = vadd.f32 %v5545_v47, %v5544_v59  ;;  %v5547_v34 = vpop.f32.mrb[78].mxu1 }
 0x2fd   : > { %v5548_v22 = vpop.f32.mrb[79].mxu1  ;;  %v7654_v44 = vadd.f32 %v5655_v36, %v4305_v16 }
 0x2fe   : > { %v4310_v46 = vadd.f32 %v5546_v10, %v7555_v57  ;;  %v5549_v27 = vadd.f32 %v5548_v22, %v5547_v34 }
 0x2ff   : > { %v5656_v19 = vpop.f32.mrb[112].mxu0 }
 0x300   : > { %v4313_v56 = vadd.f32 %v5549_v27, %v7558_v63  ;;  %v5657_v12 = vpop.f32.mrb[113].mxu0 }
 0x301   : > { %v5658_v30 = vadd.f32 %v5657_v12, %v5656_v19  ;;  %v5659_v13 = vpop.f32.mrb[114].mxu0 }
 0x302   : > { %v5550_v3 = vpop.f32.mrb[80].mxu1  ;;  %v5660_v6 = vpop.f32.mrb[115].mxu0 }
 0x303   : > { %v5551_v7 = vpop.f32.mrb[81].mxu1  ;;  %v5661_v37 = vadd.f32 %v5660_v6, %v5659_v13  ;;  %v7657_v11 = vadd.f32 %v5658_v30, %v4310_v46 }
 0x304   : > { %v5552_v5 = vadd.f32 %v5551_v7, %v5550_v3  ;;  %v5553_v20 = vpop.f32.mrb[82].mxu1 }
 0x305   : > { %v5554_v52 = vpop.f32.mrb[83].mxu1  ;;  %v7660_v49 = vadd.f32 %v5661_v37, %v4313_v56 }
 0x306   : > { %v4318_v57 = vadd.f32 %v5552_v5, %v7568_v0  ;;  %v5555_v54 = vadd.f32 %v5554_v52, %v5553_v20 }
 0x307   : > { %v5662_v55 = vpop.f32.mrb[116].mxu0 }
 0x308   : > { %v4321_v63 = vadd.f32 %v5555_v54, %v7571_v17  ;;  %v5663_v4 = vpop.f32.mrb[117].mxu0 }
 0x309   : > { %v5664_v16 = vadd.f32 %v5663_v4, %v5662_v55  ;;  %v5665_v38 = vpop.f32.mrb[118].mxu0 }
 0x30a   : > { %v5556_v51 = vpop.f32.mrb[84].mxu1  ;;  %v5666_v59 = vpop.f32.mrb[119].mxu0 }
 0x30b   : > { %v5557_v26 = vpop.f32.mrb[85].mxu1  ;;  %v5667_v47 = vadd.f32 %v5666_v59, %v5665_v38  ;;  %v7663_v10 = vadd.f32 %v5664_v16, %v4318_v57 }
 0x30c   : > { %v5558_v53 = vadd.f32 %v5557_v26, %v5556_v51  ;;  %v5559_v58 = vpop.f32.mrb[86].mxu1 }
 0x30d   : > { %v5560_v39 = vpop.f32.mrb[87].mxu1  ;;  %v7666_v36 = vadd.f32 %v5667_v47, %v4321_v63 }
 0x30e   : > { %v4326_v0 = vadd.f32 %v5558_v53, %v7577_v35  ;;  %v5561_v34 = vadd.f32 %v5560_v39, %v5559_v58 }
 0x30f   : > { %v5668_v22 = vpop.f32.mrb[120].mxu0 }
 0x310   : > { %v4329_v17 = vadd.f32 %v5561_v34, %v7579_v48  ;;  %v5669_v46 = vpop.f32.mrb[121].mxu0 }
 0x311   : > { %v5670_v56 = vadd.f32 %v5669_v46, %v5668_v22  ;;  %v5671_v19 = vpop.f32.mrb[122].mxu0 }
 0x312   : > { %v5562_v27 = vpop.f32.mrb[88].mxu1  ;;  %v5672_v3 = vpop.f32.mrb[123].mxu0 }
 0x313   : > { %v5563_v12 = vpop.f32.mrb[89].mxu1  ;;  %v5673_v7 = vadd.f32 %v5672_v3, %v5671_v19  ;;  %v7669_v5 = vadd.f32 %v5670_v56, %v4326_v0 }
 0x314   : > { %v5564_v30 = vadd.f32 %v5563_v12, %v5562_v27  ;;  %v5565_v13 = vpop.f32.mrb[90].mxu1 }
 0x315   : > { %v5566_v6 = vpop.f32.mrb[91].mxu1  ;;  %v7672_v37 = vadd.f32 %v5673_v7, %v4329_v17 }
 0x316   : > { %v4334_v35 = vadd.f32 %v5564_v30, %v7584_v43  ;;  %v5567_v20 = vadd.f32 %v5566_v6, %v5565_v13 }
 0x317   : > { %v5674_v52 = vpop.f32.mrb[124].mxu0 }
 0x318   : > { %v4337_v48 = vadd.f32 %v5567_v20, %v7586_v14  ;;  %v5675_v57 = vpop.f32.mrb[125].mxu0 }
 0x319   : > { %v5676_v63 = vadd.f32 %v5675_v57, %v5674_v52  ;;  %v5677_v55 = vpop.f32.mrb[126].mxu0 }
 0x31a   : > { %v5568_v54 = vpop.f32.mrb[92].mxu1  ;;  %v5678_v51 = vpop.f32.mrb[127].mxu0 }
 0x31b   : > { %v5569_v4 = vpop.f32.mrb[93].mxu1  ;;  %v5679_v26 = vadd.f32 %v5678_v51, %v5677_v55  ;;  %v7675_v53 = vadd.f32 %v5676_v63, %v4334_v35 }
 0x31c   : > { %v5570_v16 = vadd.f32 %v5569_v4, %v5568_v54  ;;  %v5571_v38 = vpop.f32.mrb[94].mxu1 }
 0x31d   : > { %v5572_v59 = vpop.f32.mrb[95].mxu1  ;;  %v7678_v47 = vadd.f32 %v5679_v26, %v4337_v48 }
 0x31e   : > { %v4342_v43 = vadd.f32 %v5570_v16, %v7590_v40  ;;  %v5573_v58 = vadd.f32 %v5572_v59, %v5571_v38 }
 0x31f   : > { %v5680_v39 = vpop.f32.mrb[128].mxu0 }
 0x320   : > { %v4345_v14 = vadd.f32 %v5573_v58, %v7592_v33  ;;  %v5681_v0 = vpop.f32.mrb[129].mxu0 }
 0x321   : > { %v5682_v17 = vadd.f32 %v5681_v0, %v5680_v39  ;;  %v5683_v22 = vpop.f32.mrb[130].mxu0 }
 0x322   : > { %v5574_v34 = vpop.f32.mrb[96].mxu1  ;;  %v5684_v27 = vpop.f32.mrb[131].mxu0 }
 0x323   : > { %v5575_v46 = vpop.f32.mrb[97].mxu1  ;;  %v5685_v12 = vadd.f32 %v5684_v27, %v5683_v22  ;;  %v7681_v30 = vadd.f32 %v5682_v17, %v4342_v43 }
 0x324   : > { %v5576_v56 = vadd.f32 %v5575_v46, %v5574_v34  ;;  %v5577_v19 = vpop.f32.mrb[98].mxu1 }
 0x325   : > { %v5578_v3 = vpop.f32.mrb[99].mxu1  ;;  %v7684_v7 = vadd.f32 %v5685_v12, %v4345_v14 }
 0x326   : > { %v4350_v40 = vadd.f32 %v5576_v56, %v7598_v24  ;;  %v5579_v13 = vadd.f32 %v5578_v3, %v5577_v19 }
 0x327   : > { %v5686_v6 = vpop.f32.mrb[132].mxu0 }
 0x328   : > { %v4353_v33 = vadd.f32 %v5579_v13, %v7600_v21  ;;  %v5687_v35 = vpop.f32.mrb[133].mxu0 }
 0x329   : > { %v5688_v48 = vadd.f32 %v5687_v35, %v5686_v6  ;;  %v5689_v52 = vpop.f32.mrb[134].mxu0 }
 0x32a   : > { %v5580_v20 = vpop.f32.mrb[100].mxu1  ;;  %v5690_v54 = vpop.f32.mrb[135].mxu0 }
 0x32b   : > { %v5581_v57 = vpop.f32.mrb[101].mxu1  ;;  %v5691_v4 = vadd.f32 %v5690_v54, %v5689_v52  ;;  %v7687_v16 = vadd.f32 %v5688_v48, %v4350_v40 }
 0x32c   : > { %v5582_v63 = vadd.f32 %v5581_v57, %v5580_v20  ;;  %v5583_v55 = vpop.f32.mrb[102].mxu1 }
 0x32d   : > { %v5584_v51 = vpop.f32.mrb[103].mxu1  ;;  %v7690_v26 = vadd.f32 %v5691_v4, %v4353_v33 }
 0x32e   : > { %v4358_v24 = vadd.f32 %v5582_v63, %v7604_v2  ;;  %v5585_v38 = vadd.f32 %v5584_v51, %v5583_v55 }
 0x32f   : > { %v5692_v59 = vpop.f32.mrb[136].mxu0 }
 0x330   : > { %v4361_v21 = vadd.f32 %v5585_v38, %v7606_v50  ;;  %v5693_v43 = vpop.f32.mrb[137].mxu0 }
 0x331   : > { %v5694_v14 = vadd.f32 %v5693_v43, %v5692_v59  ;;  %v5695_v39 = vpop.f32.mrb[138].mxu0 }
 0x332   : > { %v5586_v58 = vpop.f32.mrb[104].mxu1  ;;  %v5696_v34 = vpop.f32.mrb[139].mxu0 }
 0x333   : > { %v5587_v0 = vpop.f32.mrb[105].mxu1  ;;  %v5697_v46 = vadd.f32 %v5696_v34, %v5695_v39  ;;  %v7693_v56 = vadd.f32 %v5694_v14, %v4358_v24 }
 0x334   : > { %v5588_v17 = vadd.f32 %v5587_v0, %v5586_v58  ;;  %v5589_v22 = vpop.f32.mrb[106].mxu1 }
 0x335   : > { %v5590_v27 = vpop.f32.mrb[107].mxu1  ;;  %v7696_v12 = vadd.f32 %v5697_v46, %v4361_v21 }
 0x336   : > { %v4366_v2 = vadd.f32 %v5588_v17, %v7610_v15  ;;  %v5591_v19 = vadd.f32 %v5590_v27, %v5589_v22 }
 0x337   : > { %v5698_v3 = vpop.f32.mrb[140].mxu0 }
 0x338   : > { %v4369_v50 = vadd.f32 %v5591_v19, %v7612_v31  ;;  %v5699_v40 = vpop.f32.mrb[141].mxu0 }
 0x339   : > { %v5700_v33 = vadd.f32 %v5699_v40, %v5698_v3  ;;  %v5701_v6 = vpop.f32.mrb[142].mxu0 }
 0x33a   : > { %v5592_v13 = vpop.f32.mrb[108].mxu1  ;;  %v5702_v20 = vpop.f32.mrb[143].mxu0 }
 0x33b   : > { %v5593_v35 = vpop.f32.mrb[109].mxu1  ;;  %v5703_v57 = vadd.f32 %v5702_v20, %v5701_v6  ;;  %v7699_v63 = vadd.f32 %v5700_v33, %v4366_v2 }
 0x33c   : > { %v5594_v48 = vadd.f32 %v5593_v35, %v5592_v13  ;;  %v5595_v52 = vpop.f32.mrb[110].mxu1 }
 0x33d   : > { %v5596_v54 = vpop.f32.mrb[111].mxu1  ;;  %v7702_v4 = vadd.f32 %v5703_v57, %v4369_v50 }
 0x33e   : > { %v4374_v15 = vadd.f32 %v5594_v48, %v7616_v41  ;;  %v5597_v55 = vadd.f32 %v5596_v54, %v5595_v52 }
 0x33f   : > { %v5704_v51 = vpop.f32.mrb[144].mxu0 }
 0x340   : > { %v4377_v31 = vadd.f32 %v5597_v55, %v7618_v29  ;;  %v5705_v24 = vpop.f32.mrb[145].mxu0 }
 0x341   : > { %v5706_v21 = vadd.f32 %v5705_v24, %v5704_v51  ;;  %v5707_v59 = vpop.f32.mrb[146].mxu0 }
 0x342   : > { %v5598_v38 = vpop.f32.mrb[112].mxu1  ;;  %v5708_v58 = vpop.f32.mrb[147].mxu0 }
 0x343   : > { %v5599_v43 = vpop.f32.mrb[113].mxu1  ;;  %v5709_v0 = vadd.f32 %v5708_v58, %v5707_v59  ;;  %v7705_v17 = vadd.f32 %v5706_v21, %v4374_v15 }
 0x344   : > { %v5600_v14 = vadd.f32 %v5599_v43, %v5598_v38  ;;  %v5601_v39 = vpop.f32.mrb[114].mxu1 }
 0x345   : > { %v5602_v34 = vpop.f32.mrb[115].mxu1  ;;  %v7708_v46 = vadd.f32 %v5709_v0, %v4377_v31 }
 0x346   : > { %v4382_v41 = vadd.f32 %v5600_v14, %v7621_v8  ;;  %v5603_v22 = vadd.f32 %v5602_v34, %v5601_v39 }
 0x347   : > { %v5710_v27 = vpop.f32.mrb[148].mxu0 }
 0x348   : > { %v4385_v29 = vadd.f32 %v5603_v22, %v7623_v61  ;;  %v5711_v2 = vpop.f32.mrb[149].mxu0 }
 0x349   : > { %v5712_v50 = vadd.f32 %v5711_v2, %v5710_v27  ;;  %v5713_v3 = vpop.f32.mrb[150].mxu0 }
 0x34a   : > { %v5604_v19 = vpop.f32.mrb[116].mxu1  ;;  %v5714_v13 = vpop.f32.mrb[151].mxu0 }
 0x34b   : > { %v5605_v40 = vpop.f32.mrb[117].mxu1  ;;  %v5715_v35 = vadd.f32 %v5714_v13, %v5713_v3  ;;  %v7711_v48 = vadd.f32 %v5712_v50, %v4382_v41 }
 0x34c   : > { %v5606_v33 = vadd.f32 %v5605_v40, %v5604_v19  ;;  %v5607_v6 = vpop.f32.mrb[118].mxu1 }
 0x34d   : > { %v5608_v20 = vpop.f32.mrb[119].mxu1  ;;  %v7714_v57 = vadd.f32 %v5715_v35, %v4385_v29 }
 0x34e   : > { %v4390_v8 = vadd.f32 %v5606_v33, %v7625_v60  ;;  %v5609_v52 = vadd.f32 %v5608_v20, %v5607_v6 }
 0x34f   : > { %v5716_v54 = vpop.f32.mrb[152].mxu0 }
 0x350   : > { %v4393_v61 = vadd.f32 %v5609_v52, %v7627_v62  ;;  %v5717_v15 = vpop.f32.mrb[153].mxu0 }
 0x351   : > { %v5718_v31 = vadd.f32 %v5717_v15, %v5716_v54  ;;  %v5719_v51 = vpop.f32.mrb[154].mxu0 }
 0x352   : > { %v5610_v55 = vpop.f32.mrb[120].mxu1  ;;  %v5720_v38 = vpop.f32.mrb[155].mxu0 }
 0x353   : > { %v5611_v24 = vpop.f32.mrb[121].mxu1  ;;  %v5721_v43 = vadd.f32 %v5720_v38, %v5719_v51  ;;  %v7717_v14 = vadd.f32 %v5718_v31, %v4390_v8 }
 0x354   : > { %v5612_v21 = vadd.f32 %v5611_v24, %v5610_v55  ;;  %v5613_v59 = vpop.f32.mrb[122].mxu1 }
 0x355   : > { %v5614_v58 = vpop.f32.mrb[123].mxu1  ;;  %v7720_v0 = vadd.f32 %v5721_v43, %v4393_v61  ;;  %v7734_v61 = vld [vmem:[%s7895_s4] ss:$0 sm:$0xff] }
 0x356   : > { %v4398_v60 = vadd.f32 %v5612_v21, %v7629_v28  ;;  %v5615_v39 = vadd.f32 %v5614_v58, %v5613_v59 }
 0x357   : > { %v5722_v34 = vpop.f32.mrb[156].mxu0 }
 0x358   : > { %v4401_v62 = vadd.f32 %v5615_v39, %v7631_v1  ;;  %v5723_v41 = vpop.f32.mrb[157].mxu0 }
 0x359   : > { %v5724_v29 = vadd.f32 %v5723_v41, %v5722_v34  ;;  %v5725_v27 = vpop.f32.mrb[158].mxu0 }
 0x35a   : > { %v5616_v22 = vpop.f32.mrb[124].mxu1  ;;  %v5726_v19 = vpop.f32.mrb[159].mxu0 }
 0x35b   : > { %v5617_v2 = vpop.f32.mrb[125].mxu1  ;;  %v5727_v40 = vadd.f32 %v5726_v19, %v5725_v27  ;;  %v7725_v28 = vadd.f32 %v5724_v29, %v4398_v60 }
 0x35c   : > { %v5618_v50 = vadd.f32 %v5617_v2, %v5616_v22  ;;  %v5619_v3 = vpop.f32.mrb[126].mxu1 }
 0x35d   : > { %v5620_v13 = vpop.f32.mrb[127].mxu1  ;;  %v7728_v35 = vadd.f32 %v5727_v40, %v4401_v62 }
 0x35e   : > { %v4406_v33 = vadd.f32 %v5618_v50, %v7633_v25  ;;  %v5621_v6 = vadd.f32 %v5620_v13, %v5619_v3 }
 0x35f   : > { %v5728_v20 = vpop.f32.mrb[160].mxu0 }
 0x360   : > { %v4409_v1 = vadd.f32 %v5621_v6, %v7636_v45  ;;  %v5729_v8 = vpop.f32.mrb[161].mxu0 }
 0x361   : > { %v5730_v54 = vadd.f32 %v5729_v8, %v5728_v20  ;;  %v5731_v15 = vpop.f32.mrb[162].mxu0 }
 0x362   : > { %v5818_v52 = vpop.f32.mrb[128].mxu1  ;;  %v5732_v25 = vpop.f32.mrb[163].mxu0 }
 0x363   : > { %v4616_v55 = vadd.f32 %v5818_v52, %v7645_v23  ;;  %v4607_v31 = vpop.f32.mrb[129].mxu1  ;;  %v5733_v24 = vadd.f32 %v5732_v25, %v5731_v15  ;;  %v7745_v59 = vadd.f32 %v5730_v54, %v4406_v33 }
 0x364   : > { %v4608_v45 = vadd.f32 %v4607_v31, %v7639_v18  ;;  %v5819_v51 = vpop.f32.mrb[130].mxu1 }
 0x365   : > { %v4743_v38 = vadd.f32 %v7734_v61, %v4616_v55  ;;  %v4619_v23 = vadd.f32 %v5819_v51, %v7648_v9  ;;  %v4610_v21 = vpop.f32.mrb[131].mxu1  ;;  %v7752_v39 = vadd.f32 %v5733_v24, %v4409_v1 }
 0x366   : > { %v4741_v43 = vadd.f32 %v7734_v61, %v4608_v45  ;;  %v4611_v58 = vadd.f32 %v4610_v21, %v7642_v32 }
 0x367   : > { %4776 = vst.msk [vmem:[%s7740_s10 + $0x10] sm:$0xff] %vm4773_vm13, %v4743_v38  ;;  %v4744_v60 = vadd.f32 %v7734_v61, %v4619_v23 }
 0x368   : > { %4774 = vst.msk [vmem:[%s7740_s10] sm:$0xff] %vm4773_vm13, %v4741_v43  ;;  %v4742_v18 = vadd.f32 %v7734_v61, %v4611_v58 }
 0x369   : > { %4777 = vst.msk [vmem:[%s7740_s10 + $0x18] sm:$0xff] %vm4773_vm13, %v4744_v60 }
 0x36a   : > { %4775 = vst.msk [vmem:[%s7740_s10 + $0x8] sm:$0xff] %vm4773_vm13, %v4742_v18  ;;  %v5822_v9 = vpop.f32.mrb[132].mxu1 }
 0x36b   : > { %v4632_v32 = vadd.f32 %v5822_v9, %v7657_v11  ;;  %v4623_v62 = vpop.f32.mrb[133].mxu1 }
 0x36c   : > { %v4624_v34 = vadd.f32 %v4623_v62, %v7651_v42  ;;  %v5823_v41 = vpop.f32.mrb[134].mxu1 }
 0x36d   : > { %v4747_v22 = vadd.f32 %v7734_v61, %v4632_v32  ;;  %v4635_v29 = vadd.f32 %v5823_v41, %v7660_v49  ;;  %v4626_v27 = vpop.f32.mrb[135].mxu1 }
 0x36e   : > { %v4745_v2 = vadd.f32 %v7734_v61, %v4624_v34  ;;  %v4627_v19 = vadd.f32 %v4626_v27, %v7654_v44 }
 0x36f   : > { %4780 = vst.msk [vmem:[%s7740_s10 + $0x30] sm:$0xff] %vm4773_vm13, %v4747_v22  ;;  %v4748_v50 = vadd.f32 %v7734_v61, %v4635_v29 }
 0x370   : > { %4778 = vst.msk [vmem:[%s7740_s10 + $0x20] sm:$0xff] %vm4773_vm13, %v4745_v2  ;;  %v4746_v42 = vadd.f32 %v7734_v61, %v4627_v19 }
 0x371   : > { %4781 = vst.msk [vmem:[%s7740_s10 + $0x38] sm:$0xff] %vm4773_vm13, %v4748_v50 }
 0x372   : > { %4779 = vst.msk [vmem:[%s7740_s10 + $0x28] sm:$0xff] %vm4773_vm13, %v4746_v42  ;;  %v5826_v11 = vpop.f32.mrb[136].mxu1 }
 0x373   : > { %v4648_v49 = vadd.f32 %v5826_v11, %v7669_v5  ;;  %v4639_v44 = vpop.f32.mrb[137].mxu1 }
 0x374   : > { %v4640_v3 = vadd.f32 %v4639_v44, %v7663_v10  ;;  %v5827_v40 = vpop.f32.mrb[138].mxu1 }
 0x375   : > { %v4751_v13 = vadd.f32 %v7734_v61, %v4648_v49  ;;  %v4651_v33 = vadd.f32 %v5827_v40, %v7672_v37  ;;  %v4642_v6 = vpop.f32.mrb[139].mxu1 }
 0x376   : > { %v4749_v1 = vadd.f32 %v7734_v61, %v4640_v3  ;;  %v4643_v20 = vadd.f32 %v4642_v6, %v7666_v36 }
 0x377   : > { %4784 = vst.msk [vmem:[%s7740_s10 + $0x50] sm:$0xff] %vm4773_vm13, %v4751_v13  ;;  %v4752_v8 = vadd.f32 %v7734_v61, %v4651_v33 }
 0x378   : > { %4782 = vst.msk [vmem:[%s7740_s10 + $0x40] sm:$0xff] %vm4773_vm13, %v4749_v1  ;;  %v4750_v10 = vadd.f32 %v7734_v61, %v4643_v20 }
 0x379   : > { %4785 = vst.msk [vmem:[%s7740_s10 + $0x58] sm:$0xff] %vm4773_vm13, %v4752_v8 }
 0x37a   : > { %4783 = vst.msk [vmem:[%s7740_s10 + $0x48] sm:$0xff] %vm4773_vm13, %v4750_v10  ;;  %v5830_v5 = vpop.f32.mrb[140].mxu1 }
 0x37b   : > { %v4664_v37 = vadd.f32 %v5830_v5, %v7681_v30  ;;  %v4655_v36 = vpop.f32.mrb[141].mxu1 }
 0x37c   : > { %v4656_v52 = vadd.f32 %v4655_v36, %v7675_v53  ;;  %v5831_v54 = vpop.f32.mrb[142].mxu1 }
 0x37d   : > { %v4755_v15 = vadd.f32 %v7734_v61, %v4664_v37  ;;  %v4667_v55 = vadd.f32 %v5831_v54, %v7684_v7  ;;  %v4658_v31 = vpop.f32.mrb[143].mxu1 }
 0x37e   : > { %v4753_v25 = vadd.f32 %v7734_v61, %v4656_v52  ;;  %v4659_v45 = vadd.f32 %v4658_v31, %v7678_v47 }
 0x37f   : > { %4788 = vst.msk [vmem:[%s7740_s10 + $0x70] sm:$0xff] %vm4773_vm13, %v4755_v15  ;;  %v4756_v51 = vadd.f32 %v7734_v61, %v4667_v55 }
 0x380   : > { %4786 = vst.msk [vmem:[%s7740_s10 + $0x60] sm:$0xff] %vm4773_vm13, %v4753_v25  ;;  %v4754_v53 = vadd.f32 %v7734_v61, %v4659_v45 }
 0x381   : > { %4789 = vst.msk [vmem:[%s7740_s10 + $0x78] sm:$0xff] %vm4773_vm13, %v4756_v51 }
 0x382   : > { %4787 = vst.msk [vmem:[%s7740_s10 + $0x68] sm:$0xff] %vm4773_vm13, %v4754_v53  ;;  %v5834_v30 = vpop.f32.mrb[144].mxu1 }
 0x383   : > { %v4680_v7 = vadd.f32 %v5834_v30, %v7693_v56  ;;  %v4671_v47 = vpop.f32.mrb[145].mxu1 }
 0x384   : > { %v4672_v24 = vadd.f32 %v4671_v47, %v7687_v16  ;;  %v5835_v38 = vpop.f32.mrb[146].mxu1 }
 0x385   : > { %v4759_v23 = vadd.f32 %v7734_v61, %v4680_v7  ;;  %v4683_v21 = vadd.f32 %v5835_v38, %v7696_v12  ;;  %v4674_v43 = vpop.f32.mrb[147].mxu1 }
 0x386   : > { %v4757_v58 = vadd.f32 %v7734_v61, %v4672_v24  ;;  %v4675_v60 = vadd.f32 %v4674_v43, %v7690_v26 }
 0x387   : > { %4792 = vst.msk [vmem:[%s7740_s10 + $0x90] sm:$0xff] %vm4773_vm13, %v4759_v23  ;;  %v4760_v18 = vadd.f32 %v7734_v61, %v4683_v21 }
 0x388   : > { %4790 = vst.msk [vmem:[%s7740_s10 + $0x80] sm:$0xff] %vm4773_vm13, %v4757_v58  ;;  %v4758_v16 = vadd.f32 %v7734_v61, %v4675_v60 }
 0x389   : > { %4793 = vst.msk [vmem:[%s7740_s10 + $0x98] sm:$0xff] %vm4773_vm13, %v4760_v18 }
 0x38a   : > { %4791 = vst.msk [vmem:[%s7740_s10 + $0x88] sm:$0xff] %vm4773_vm13, %v4758_v16  ;;  %v5838_v56 = vpop.f32.mrb[148].mxu1 }
 0x38b   : > { %v4696_v12 = vadd.f32 %v5838_v56, %v7705_v17  ;;  %v4687_v26 = vpop.f32.mrb[149].mxu1 }
 0x38c   : > { %v4688_v9 = vadd.f32 %v4687_v26, %v7699_v63  ;;  %v5839_v32 = vpop.f32.mrb[150].mxu1 }
 0x38d   : > { %v4763_v62 = vadd.f32 %v7734_v61, %v4696_v12  ;;  %v4699_v34 = vadd.f32 %v5839_v32, %v7708_v46  ;;  %v4690_v41 = vpop.f32.mrb[151].mxu1 }
 0x38e   : > { %v4761_v22 = vadd.f32 %v7734_v61, %v4688_v9  ;;  %v4691_v29 = vadd.f32 %v4690_v41, %v7702_v4 }
 0x38f   : > { %4796 = vst.msk [vmem:[%s7740_s10 + $0xb0] sm:$0xff] %vm4773_vm13, %v4763_v62  ;;  %v4764_v27 = vadd.f32 %v7734_v61, %v4699_v34 }
 0x390   : > { %4794 = vst.msk [vmem:[%s7740_s10 + $0xa0] sm:$0xff] %vm4773_vm13, %v4761_v22  ;;  %v4762_v63 = vadd.f32 %v7734_v61, %v4691_v29 }
 0x391   : > { %4797 = vst.msk [vmem:[%s7740_s10 + $0xb8] sm:$0xff] %vm4773_vm13, %v4764_v27 }
 0x392   : > { %4795 = vst.msk [vmem:[%s7740_s10 + $0xa8] sm:$0xff] %vm4773_vm13, %v4762_v63  ;;  %v5842_v17 = vpop.f32.mrb[152].mxu1 }
 0x393   : > { %v4712_v46 = vadd.f32 %v5842_v17, %v7717_v14  ;;  %v4703_v4 = vpop.f32.mrb[153].mxu1 }
 0x394   : > { %v4704_v2 = vadd.f32 %v4703_v4, %v7711_v48  ;;  %v5843_v19 = vpop.f32.mrb[154].mxu1 }
 0x395   : > { %v4767_v50 = vadd.f32 %v7734_v61, %v4712_v46  ;;  %v4715_v42 = vadd.f32 %v5843_v19, %v7720_v0  ;;  %v4706_v11 = vpop.f32.mrb[155].mxu1 }
 0x396   : > { %v4765_v49 = vadd.f32 %v7734_v61, %v4704_v2  ;;  %v4707_v44 = vadd.f32 %v4706_v11, %v7714_v57 }
 0x397   : > { %4800 = vst.msk [vmem:[%s7740_s10 + $0xd0] sm:$0xff] %vm4773_vm13, %v4767_v50  ;;  %v4768_v3 = vadd.f32 %v7734_v61, %v4715_v42 }
 0x398   : > { %4798 = vst.msk [vmem:[%s7740_s10 + $0xc0] sm:$0xff] %vm4773_vm13, %v4765_v49  ;;  %v4766_v48 = vadd.f32 %v7734_v61, %v4707_v44 }
 0x399   : > { %4801 = vst.msk [vmem:[%s7740_s10 + $0xd8] sm:$0xff] %vm4773_vm13, %v4768_v3 }
 0x39a   : > { %4799 = vst.msk [vmem:[%s7740_s10 + $0xc8] sm:$0xff] %vm4773_vm13, %v4766_v48  ;;  %v5846_v14 = vpop.f32.mrb[156].mxu1 }
 0x39b   : > { %v4728_v0 = vadd.f32 %v5846_v14, %v7745_v59  ;;  %v4719_v57 = vpop.f32.mrb[157].mxu1 }
 0x39c   : > { %v4720_v40 = vadd.f32 %v4719_v57, %v7725_v28  ;;  %v5847_v13 = vpop.f32.mrb[158].mxu1 }
 0x39d   : > { %v4771_v33 = vadd.f32 %v7734_v61, %v4728_v0  ;;  %v4731_v6 = vadd.f32 %v5847_v13, %v7752_v39  ;;  %v4722_v1 = vpop.f32.mrb[159].mxu1 }
 0x39e   : > { %v4769_v20 = vadd.f32 %v7734_v61, %v4720_v40  ;;  %v4723_v8 = vadd.f32 %v4722_v1, %v7728_v35 }
 0x39f   : > { %4804 = vst.msk [vmem:[%s7740_s10 + $0xf0] sm:$0xff] %vm4773_vm13, %v4771_v33  ;;  %v4772_v10 = vadd.f32 %v7734_v61, %v4731_v6 }
 0x3a0   : > { %4802 = vst.msk [vmem:[%s7740_s10 + $0xe0] sm:$0xff] %vm4773_vm13, %v4769_v20  ;;  %v4770_v59 = vadd.f32 %v7734_v61, %v4723_v8 }
 0x3a1   : > { %4805 = vst.msk [vmem:[%s7740_s10 + $0xf8] sm:$0xff] %vm4773_vm13, %v4772_v10 }
 0x3a2   : > { %4803 = vst.msk [vmem:[%s7740_s10 + $0xe8] sm:$0xff] %vm4773_vm13, %v4770_v59 }
 0x3a3 PF: > { %s19_s23 = sadd.s32 1, %s6361_s23   ;;  %s7931_s18 = smov %s6345_s19 }
 0x3a4   : > { %p16_p9 = scmp.ge.s32.totalorder %s19_s23, 4   ;;  %s7932_s19 = smov %s6349_s20 }
 0x3a5   : > { %s7933_s20 = smov %s6525_s7  ;;  %s7934_s21 = smov %s6357_s22 }
 0x3a6   : > { %s7935_s22 = smov %s7937_s15  ;;  %18 = sbr.rel (!%p16_p9) target bundleno = 5 (0x5), region = 91 }
 0x3ad   :  { %4838 = vsyncpa [#allocation4], 1 }
 0x3ae   :  { %4840 = vsyncpa [#allocation4 + $0x1], 1 }
 0x3af   :  { %4841 = vsyncpa [#allocation6], 1 }

</bundles_post_ra>
